<compile_context>
chip_gen: v7x
topology: tpu7x:2x2x1
jax: 0.10.0
libtpu: 0.0.40
codegen_flags: <defaults>
</compile_context>

<pallas_src>
import jax
import jax.numpy as jnp
from jax.experimental import pallas as pl
from jax.experimental.pallas import tpu as pltpu


def _round_up(x, m):
    return ((x + m - 1) // m) * m


# ----------------------------------------------------------------------------- kernel
def _make_decoder_kernel(Bb, N, H, U, M1, T, tau):
    """Build the decoder kernel with static shape/config baked in.  Bb is the
    per-grid-block batch slice."""
    G3 = 3 * H
    LP = _round_up(N, 128)          # lane-padded pointer width
    LA = _round_up(M1, 128)         # lane-padded adjacency width
    rows_pad = _round_up(T * Bb, 8)

    def kernel(gum_ref, enc_ref, mask_ref, hg_ref,
               wgate_ref, bgate_ref, w1t_ref, w2fo_ref, b2_ref, vecs_ref,
               ptr_ref, adj_ref, closs_ref):
        f32, bf16 = jnp.float32, jnp.bfloat16

        # ---- step-invariant operands, loaded once ------------------------------
        enc = enc_ref[...]                               # (Bb, N, H)  bf16
        wgate = wgate_ref[...]                           # (2H+M1, 6H) bf16
        bgate = bgate_ref[...]                           # (1, 6H)     f32
        w2fo = w2fo_ref[...]                             # (H, U+M1)   bf16
        b2 = b2_ref[...]                                 # (1, U+M1)   f32
        wc_vec = vecs_ref[0, :]                          # (U,)        f32
        v_vec = vecs_ref[1, :]                           # (U,)        f32

        # hoisted softmax mask (additive bias, computed once before the loop)
        mask_bias = jnp.where(mask_ref[:, 0, :] > 0.5, f32(0.0), f32(-1e30))  # (Bb, N)

        # hoisted, step-invariant encoder projection W1(encoder_out)
        w1e = jnp.dot(enc.reshape(Bb * N, H), w1t_ref[...],
                      preferred_element_type=f32).reshape(Bb, N, U)

        iota_n = jax.lax.broadcasted_iota(jnp.int32, (Bb, N), 1)
        iota_lane = jax.lax.broadcasted_iota(jnp.int32, (Bb, LP), 1)
        iota_m = jax.lax.broadcasted_iota(jnp.int32, (Bb, M1), 1)

        hprev = hg_ref[:, 0, :]                          # decoder_hidden = hg
        chosen = jnp.zeros((Bb, H), f32)                 # chosen part of decoder_input
        theta = jnp.zeros((Bb, M1), f32)                 # theta  part of decoder_input
        cov = jnp.zeros((Bb, N), f32)                    # coverage vector
        cl = jnp.zeros((Bb, N), f32)                     # cov-loss accumulator terms
        ptr_rows, adj_rows = [], []

        # T = max_out_node_size is tiny; fully unrolled static loop.
        for i in range(T):
            # -- GRUCell: one fused MXU pass  [gi | gh] = [chosen|theta|h] @ Wgate
            x_full = jnp.concatenate([chosen, theta, hprev], axis=1).astype(bf16)
            g = jnp.dot(x_full, wgate, preferred_element_type=f32) + bgate      # (Bb, 6H)
            r = jax.nn.sigmoid(g[:, 0:H] + g[:, G3:G3 + H])
            z = jax.nn.sigmoid(g[:, H:2 * H] + g[:, G3 + H:G3 + 2 * H])
            n = jnp.tanh(g[:, 2 * H:G3] + r * g[:, G3 + 2 * H:2 * G3])
            hnew = (1.0 - z) * n + z * hprev

            # -- fused W2 / fout projection of the new hidden state
            proj = jnp.dot(hnew.astype(bf16), w2fo, preferred_element_type=f32) + b2
            w2h = proj[:, 0:U]
            theta_full = jax.nn.sigmoid(proj[:, U:U + M1])

            # -- coverage attention + masked softmax
            uj = jnp.tanh(w1e + w2h[:, None, :]
                          + cov[:, :, None] * wc_vec[None, None, :])
            scores = jnp.sum(uj * v_vec[None, None, :], axis=2) + mask_bias      # (Bb, N)
            smax = jnp.max(scores, axis=1, keepdims=True)
            e = jnp.exp(scores - smax)
            s = jnp.sum(e, axis=1, keepdims=True)
            inv = pl.reciprocal(s, approx=True)
            inv = inv * (2.0 - s * inv)          # one NR step: near f32-exact coverage
            att = e * inv                                                         # (Bb, N)

            # coverage-loss terms (reduced once after the loop) + coverage update
            cl = cl + jnp.minimum(att, cov)
            cov = cov + att

            # -- hard gumbel-softmax pointer from the masked log-softmax
            gsc = (scores - smax - jnp.log(s) + gum_ref[:, i, :]) / f32(tau)
            gmax = jnp.max(gsc, axis=1, keepdims=True)
            idx = jnp.min(jnp.where(gsc == gmax, iota_n, jnp.int32(N)),
                          axis=1, keepdims=True)
            onehot = (iota_n == idx).astype(f32)                                  # (Bb, N)
            ptr_rows.append((iota_lane == idx).astype(f32))   # lane-padded copy (Bb, LP)

            # chosen_node_emb = enc^T @ onehot (per batch row)
            chosen = jnp.sum(enc * onehot[:, :, None], axis=1)                    # (Bb, H)
            # theta masked to the first i positions (all-zero at step 0)
            theta = theta_full * (iota_m < i).astype(f32)                         # (Bb, M1)
            adj_rows.append(theta)

            hprev = hnew

        # ---- single lane-dense stores after the loop --------------------------
        pad_rows = rows_pad - T * Bb
        ptr_pieces = ptr_rows + ([jnp.zeros((pad_rows, LP), f32)] if pad_rows else [])
        ptr_ref[0] = jnp.concatenate(ptr_pieces, axis=0)                          # (rows_pad, LP)

        adj_pieces = adj_rows + ([jnp.zeros((pad_rows, M1), f32)] if pad_rows else [])
        adj_stack = jnp.concatenate(adj_pieces, axis=0)                           # (rows_pad, M1)
        if LA > M1:
            adj_stack = jnp.concatenate(
                [adj_stack, jnp.zeros((rows_pad, LA - M1), f32)], axis=1)
        adj_ref[0] = adj_stack                                                    # (rows_pad, LA)

        closs_ref[0] = jnp.sum(cl, axis=(0, 1), keepdims=True)                    # (1, 1)

    return kernel


# ----------------------------------------------------------------------------- wrapper
def gpt_grnn_decoder_s(encoder_out, mask_f, hg, gumbel, params,
                       max_out_node_size, tau):
    f32, bf16 = jnp.float32, jnp.bfloat16
    B, N, H = encoder_out.shape
    T = max_out_node_size
    M1 = T - 1
    U = params["w1"].shape[0]
    G3 = 3 * H

    # batch-parallel split: 2 grid blocks -> both TensorCores on v7x
    nblk = 2 if (B % 2 == 0 and B >= 2) else 1
    Bb = B // nblk
    LP = _round_up(N, 128)
    LA = _round_up(M1, 128)
    rows_pad = _round_up(T * Bb, 8)

    # ---- pack GRU gate weights into ONE MXU operand ----------------------------
    #   [chosen | theta | h_prev] @ Wgate = [gi | gh]
    wih_T = params["w_ih"].T.astype(f32)                 # (H+M1, 3H)
    whh_T = params["w_hh"].T.astype(f32)                 # (H,    3H)
    K = 2 * H + M1
    wgate = jnp.zeros((K, 2 * G3), f32)
    wgate = wgate.at[:H + M1, :G3].set(wih_T)
    wgate = wgate.at[H + M1:, G3:].set(whh_T)
    wgate = wgate.astype(bf16)
    bgate = jnp.concatenate([params["b_ih"], params["b_hh"]])[None, :].astype(f32)  # (1, 6H)

    w1T = params["w1"].T.astype(bf16)                                             # (H, U)
    w2fo = jnp.concatenate([params["w2"].T, params["fout_w"].T], axis=1).astype(bf16)  # (H, U+M1)
    b2 = jnp.concatenate([jnp.zeros((U,), f32),
                          params["fout_b"].astype(f32)])[None, :]                 # (1, U+M1)
    vecs = jnp.stack([params["wc"][:, 0], params["v"][0]], axis=0).astype(f32)    # (2, U)

    gum_btn = jnp.transpose(gumbel, (1, 0, 2)).astype(f32)     # (B, T, N)
    enc_bf = encoder_out.astype(bf16)                          # (B, N, H)  bf16 MXU operand
    mask3 = mask_f.astype(f32)[:, None, :]                     # (B, 1, N)
    hg3 = hg.astype(f32)[:, None, :]                           # (B, 1, H)

    kernel = _make_decoder_kernel(Bb, N, H, U, M1, T, tau)

    in_specs = [
        pl.BlockSpec((Bb, T, N), lambda i: (i, 0, 0)),         # gumbel noise
        pl.BlockSpec((Bb, N, H), lambda i: (i, 0, 0)),         # encoder_out (bf16)
        pl.BlockSpec((Bb, 1, N), lambda i: (i, 0, 0)),         # node mask
        pl.BlockSpec((Bb, 1, H), lambda i: (i, 0, 0)),         # hg
        pl.BlockSpec((K, 2 * G3), lambda i: (0, 0)),           # fused GRU gate weight
        pl.BlockSpec((1, 2 * G3), lambda i: (0, 0)),           # [b_ih | b_hh]
        pl.BlockSpec((H, U), lambda i: (0, 0)),                # W1^T
        pl.BlockSpec((H, U + M1), lambda i: (0, 0)),           # [W2^T | foutW^T]
        pl.BlockSpec((1, U + M1), lambda i: (0, 0)),           # [0 | fout_b]
        pl.BlockSpec((2, U), lambda i: (0, 0)),                # [wc ; v]
    ]
    out_specs = [
        pl.BlockSpec((1, rows_pad, LP), lambda i: (i, 0, 0)),  # pointer one-hot slab
        pl.BlockSpec((1, rows_pad, LA), lambda i: (i, 0, 0)),  # adjacency theta slab
        pl.BlockSpec((1, 1, 1), lambda i: (i, 0, 0)),          # partial coverage loss
    ]

    ptr_slab, adj_slab, closs = pl.pallas_call(
        kernel,
        out_shape=[
            jax.ShapeDtypeStruct((nblk, rows_pad, LP), f32),
            jax.ShapeDtypeStruct((nblk, rows_pad, LA), f32),
            jax.ShapeDtypeStruct((nblk, 1, 1), f32),
        ],
        grid=(nblk,),
        in_specs=in_specs,
        out_specs=out_specs,
        compiler_params=pltpu.CompilerParams(
            dimension_semantics=("parallel",),
            vmem_limit_bytes=32 * 1024 * 1024),
    )(gum_btn, enc_bf, mask3, hg3, wgate, bgate, w1T, w2fo, b2, vecs)

    # ---- unpack lane-dense slabs back into module-layout outputs ---------------
    nrow = T * Bb
    ptr_tbn = ptr_slab[:, :nrow, :N].reshape(nblk, T, Bb, N)
    ptr_tbn = jnp.transpose(ptr_tbn, (1, 0, 2, 3)).reshape(T, B, N)
    pointer_argmaxs = jnp.transpose(ptr_tbn, (1, 2, 0))        # (B, N, T)

    adj_tbm = adj_slab[:, :nrow, :M1].reshape(nblk, T, Bb, M1)
    adj_tbm = jnp.transpose(adj_tbm, (1, 0, 2, 3)).reshape(T, B, M1)
    adj_vecs = jnp.transpose(adj_tbm, (1, 2, 0))               # (B, M-1, T)

    cov_loss = jnp.sum(closs) / B
    return pointer_argmaxs, cov_loss, encoder_out, adj_vecs


# ----------------------------------------------------------------------------- pure-JAX reference
def reference_forward(encoder_out, mask_f, hg, gumbel, p, max_out_node_size, tau):
    # Mirrors the module math step-by-step; matmul operands are cast to bf16
    # (f32 accumulation) to match the kernel's MXU-native precision choice.
    bf = jnp.bfloat16
    B, N, H = encoder_out.shape
    M1 = max_out_node_size - 1
    enc_b = encoder_out.astype(bf)
    wih_b, whh_b = p["w_ih"].T.astype(bf), p["w_hh"].T.astype(bf)
    w1_b, w2_b = p["w1"].T.astype(bf), p["w2"].T.astype(bf)
    foutw_b = p["fout_w"].T.astype(bf)
    w1e = jnp.dot(enc_b, w1_b, preferred_element_type=jnp.float32)      # (B, N, U)

    dec_in = jnp.zeros((B, H + M1), jnp.float32)
    dec_h = hg
    cov = jnp.zeros((B, N), jnp.float32)
    cov_loss = jnp.float32(0.0)
    ptrs, adjs = [], []
    for i in range(max_out_node_size):
        gi = jnp.dot(dec_in.astype(bf), wih_b, preferred_element_type=jnp.float32) + p["b_ih"]
        gh = jnp.dot(dec_h.astype(bf), whh_b, preferred_element_type=jnp.float32) + p["b_hh"]
        r = jax.nn.sigmoid(gi[:, :H] + gh[:, :H])
        z = jax.nn.sigmoid(gi[:, H:2 * H] + gh[:, H:2 * H])
        n = jnp.tanh(gi[:, 2 * H:] + r * gh[:, 2 * H:])
        dec_h = (1.0 - z) * n + z * dec_h
        w2h = jnp.dot(dec_h.astype(bf), w2_b, preferred_element_type=jnp.float32)
        uj = w1e + w2h[:, None, :] + cov[:, :, None] * p["wc"][:, 0][None, None, :]
        scores = jnp.sum(jnp.tanh(uj) * p["v"][0][None, None, :], axis=2)
        scores = jnp.where(mask_f > 0.5, scores, jnp.float32(-1e30))
        e = jnp.exp(scores - jnp.max(scores, axis=1, keepdims=True))
        att = e / jnp.sum(e, axis=1, keepdims=True)
        cov_loss = cov_loss + jnp.sum(jnp.minimum(att, cov))
        cov = cov + att
        gsc = (jnp.log(att + 1e-12) + gumbel[i]) / tau      # PyTorch's (att + 1e-12).log()
        iota = jnp.arange(N)[None, :]
        gmax = jnp.max(gsc, axis=1, keepdims=True)
        idx = jnp.min(jnp.where(gsc == gmax, iota, N), axis=1, keepdims=True)
        onehot = (iota == idx).astype(jnp.float32)
        ptrs.append(onehot)
        chosen = jnp.sum(encoder_out * onehot[:, :, None], axis=1)
        theta = jax.nn.sigmoid(jnp.dot(dec_h.astype(bf), foutw_b,
                                       preferred_element_type=jnp.float32) + p["fout_b"])
        theta = theta * (jnp.arange(M1)[None, :] < i).astype(jnp.float32)
        adjs.append(theta)
        dec_in = jnp.concatenate([chosen, theta], axis=1)
    return jnp.stack(ptrs, axis=2), cov_loss / B, jnp.stack(adjs, axis=2)


# ----------------------------------------------------------------------------- main
if __name__ == "__main__":
    # small config consistent with the module
    B = 4                     # batch of graphs
    H = 32                    # encoder_hidden_size (GCN emb size)
    U = 16                    # attention_units
    M = 6                     # max_out_node_size -> T = 6 decode steps
    TAU = 1.0
    M1 = M - 1
    IN = H + M1
    lengths = [16, 12, 9, 5]  # g.batch_num_nodes()
    N = max(lengths)          # max nodes after pad_sequence
    T = M

    key = jax.random.PRNGKey(0)
    keys = jax.random.split(key, 16)

    def init(k, shape, scale=0.1):
        return (scale * jax.random.normal(k, shape)).astype(jnp.float32)

    params = {
        "w_ih":   init(keys[0], (3 * H, IN)),
        "w_hh":   init(keys[1], (3 * H, H)),
        "b_ih":   init(keys[2], (3 * H,)),
        "b_hh":   init(keys[3], (3 * H,)),
        "w1":     init(keys[4], (U, H)),
        "w2":     init(keys[5], (U, H)),
        "wc":     init(keys[6], (U, 1)),
        "v":      init(keys[7], (1, U)),
        "fout_w": init(keys[8], (M1, H)),
        "fout_b": init(keys[9], (M1,)),
    }

    # node features h (concat over graphs) and graph embedding hg
    h = init(keys[10], (sum(lengths), H), scale=1.0)
    hg = init(keys[11], (B, H), scale=1.0)
    # deterministic Gumbel(0,1) noise for the hard gumbel-softmax, one slab per step
    gumbel = jax.random.gumbel(keys[12], (T, B, N)).astype(jnp.float32)

    # glue: pad_sequence(h per-graph) and sequence-length mask (plain JAX)
    encoder_out = jnp.zeros((B, N, H), jnp.float32)
    off = 0
    for b, L in enumerate(lengths):
        encoder_out = encoder_out.at[b, :L, :].set(h[off:off + L, :])
        off += L
    mask_f = (jnp.arange(N)[None, :] < jnp.array(lengths)[:, None]).astype(jnp.float32)

    # run kernel
    ptr_k, cov_loss_k, enc_k, adj_k = gpt_grnn_decoder_s(
        encoder_out, mask_f, hg, gumbel, params, M, TAU)
    jax.block_until_ready((ptr_k, cov_loss_k, enc_k, adj_k))

    # pure-JAX reference check
    ptr_r, cov_loss_r, adj_r = reference_forward(
        encoder_out, mask_f, hg, gumbel, params, M, TAU)

    assert ptr_k.shape == (B, N, T) and adj_k.shape == (B, M1, T)
    assert jnp.allclose(ptr_k, ptr_r, atol=1e-6), "pointer mismatch"
    assert jnp.allclose(adj_k, adj_r, atol=2e-3), "adj_vecs mismatch"
    assert jnp.allclose(cov_loss_k, cov_loss_r, atol=1e-2), "cov_loss mismatch"
    assert jnp.allclose(enc_k, encoder_out), "encoder_out mismatch"
    # each pointer column is a valid one-hot
    assert jnp.allclose(jnp.sum(ptr_k, axis=1), 1.0)

    print("KERNEL_OK")
</pallas_src>

<mosaic_0001>
module attributes {stable_mosaic.version = 11 : i64} {
  func.func @kernel(%arg0: i32, %arg1: memref<2x6x16xf32, #tpu.memory_space<vmem>>, %arg2: memref<2x16x32xbf16, #tpu.memory_space<vmem>>, %arg3: memref<2x1x16xf32, #tpu.memory_space<vmem>>, %arg4: memref<2x1x32xf32, #tpu.memory_space<vmem>>, %arg5: memref<69x192xbf16, #tpu.memory_space<vmem>>, %arg6: memref<1x192xf32, #tpu.memory_space<vmem>>, %arg7: memref<32x16xbf16, #tpu.memory_space<vmem>>, %arg8: memref<32x21xbf16, #tpu.memory_space<vmem>>, %arg9: memref<1x21xf32, #tpu.memory_space<vmem>>, %arg10: memref<2x16xf32, #tpu.memory_space<vmem>>, %arg11: memref<1x16x128xf32, #tpu.memory_space<vmem>>, %arg12: memref<1x16x128xf32, #tpu.memory_space<vmem>>, %arg13: memref<1x1x1xf32, #tpu.memory_space<vmem>>) attributes {dimension_semantics = [#tpu.dimension_semantics<parallel>], iteration_bounds = array<i64: 2>, scalar_prefetch = 0 : i64, scratch_operands = 0 : i64, tpu.core_type = #tpu.core_type<tc>, window_params = [{transform_indices = @transform_0, window_bounds = array<i64: 2, 6, 16>}, {transform_indices = @transform_1, window_bounds = array<i64: 2, 16, 32>}, {transform_indices = @transform_2, window_bounds = array<i64: 2, 1, 16>}, {transform_indices = @transform_3, window_bounds = array<i64: 2, 1, 32>}, {pipeline_mode = #tpu.pipeline_mode<synchronous>, transform_indices = @transform_4, window_bounds = array<i64: 69, 192>}, {pipeline_mode = #tpu.pipeline_mode<synchronous>, transform_indices = @transform_5, window_bounds = array<i64: 1, 192>}, {pipeline_mode = #tpu.pipeline_mode<synchronous>, transform_indices = @transform_6, window_bounds = array<i64: 32, 16>}, {pipeline_mode = #tpu.pipeline_mode<synchronous>, transform_indices = @transform_7, window_bounds = array<i64: 32, 21>}, {pipeline_mode = #tpu.pipeline_mode<synchronous>, transform_indices = @transform_8, window_bounds = array<i64: 1, 21>}, {pipeline_mode = #tpu.pipeline_mode<synchronous>, transform_indices = @transform_9, window_bounds = array<i64: 2, 16>}, {transform_indices = @transform_10, window_bounds = array<i64: 1, 16, 128>}, {transform_indices = @transform_11, window_bounds = array<i64: 1, 16, 128>}, {transform_indices = @transform_12, window_bounds = array<i64: 1, 1, 1>}]} {
    %c0 = arith.constant 0 : index
    %c0_0 = arith.constant 0 : index
    %c0_1 = arith.constant 0 : index
    %0 = vector.load %arg2[%c0, %c0_0, %c0_1] : memref<2x16x32xbf16, #tpu.memory_space<vmem>>, vector<2x16x32xbf16>
    %c0_2 = arith.constant 0 : index
    %c0_3 = arith.constant 0 : index
    %1 = vector.load %arg5[%c0_2, %c0_3] : memref<69x192xbf16, #tpu.memory_space<vmem>>, vector<69x192xbf16>
    %c0_4 = arith.constant 0 : index
    %c0_5 = arith.constant 0 : index
    %2 = vector.load %arg6[%c0_4, %c0_5] : memref<1x192xf32, #tpu.memory_space<vmem>>, vector<1x192xf32>
    %c0_6 = arith.constant 0 : index
    %c0_7 = arith.constant 0 : index
    %3 = vector.load %arg8[%c0_6, %c0_7] : memref<32x21xbf16, #tpu.memory_space<vmem>>, vector<32x21xbf16>
    %c0_8 = arith.constant 0 : index
    %c0_9 = arith.constant 0 : index
    %4 = vector.load %arg9[%c0_8, %c0_9] : memref<1x21xf32, #tpu.memory_space<vmem>>, vector<1x21xf32>
    %c0_10 = arith.constant 0 : index
    %c0_11 = arith.constant 0 : index
    %5 = vector.load %arg10[%c0_10, %c0_11] : memref<2x16xf32, #tpu.memory_space<vmem>>, vector<1x16xf32>
    %6 = vector.shape_cast %5 : vector<1x16xf32> to vector<16xf32>
    %c1 = arith.constant 1 : index
    %c0_12 = arith.constant 0 : index
    %7 = vector.load %arg10[%c1, %c0_12] : memref<2x16xf32, #tpu.memory_space<vmem>>, vector<1x16xf32>
    %8 = vector.shape_cast %7 : vector<1x16xf32> to vector<16xf32>
    %c0_13 = arith.constant 0 : index
    %c0_14 = arith.constant 0 : index
    %c0_15 = arith.constant 0 : index
    %9 = vector.load %arg3[%c0_13, %c0_14, %c0_15] : memref<2x1x16xf32, #tpu.memory_space<vmem>>, vector<2x1x16xf32>
    %10 = vector.shape_cast %9 : vector<2x1x16xf32> to vector<2x16xf32>
    %cst = arith.constant 5.000000e-01 : f32
    %11 = vector.broadcast %cst : f32 to vector<2x16xf32>
    %12 = arith.cmpf ogt, %10, %11 : vector<2x16xf32>
    %cst_16 = arith.constant 0.000000e+00 : f32
    %cst_17 = arith.constant -1.000000e+30 : f32
    %13 = vector.broadcast %cst_16 : f32 to vector<2x16xf32>
    %14 = vector.broadcast %cst_17 : f32 to vector<2x16xf32>
    %15 = arith.select %12, %13, %14 : vector<2x16xi1>, vector<2x16xf32>
    %16 = vector.shape_cast %0 : vector<2x16x32xbf16> to vector<32x32xbf16>
    %c0_18 = arith.constant 0 : index
    %c0_19 = arith.constant 0 : index
    %17 = vector.load %arg7[%c0_18, %c0_19] : memref<32x16xbf16, #tpu.memory_space<vmem>>, vector<32x16xbf16>
    %cst_20 = arith.constant dense<0.000000e+00> : vector<32x16xf32>
    %18 = tpu.matmul %16, %17, %cst_20 {dimension_numbers = #tpu.dot_dimension_numbers<[1], [0], [0], [1], [0, 0, 1, 1], [], []>} : vector<32x32xbf16>, vector<32x16xbf16>, vector<32x16xf32> -> vector<32x16xf32>
    %19 = vector.shape_cast %18 : vector<32x16xf32> to vector<2x16x16xf32>
    %20 = tpu.iota {dimensions = array<i32: 1>} : vector<2x16xi32>
    %21 = tpu.iota {dimensions = array<i32: 1>} : vector<2x128xi32>
    %22 = tpu.iota {dimensions = array<i32: 1>} : vector<2x5xi32>
    %c0_21 = arith.constant 0 : index
    %c0_22 = arith.constant 0 : index
    %c0_23 = arith.constant 0 : index
    %23 = vector.load %arg4[%c0_21, %c0_22, %c0_23] : memref<2x1x32xf32, #tpu.memory_space<vmem>>, vector<2x1x32xf32>
    %24 = vector.shape_cast %23 : vector<2x1x32xf32> to vector<2x32xf32>
    %cst_24 = arith.constant 0.000000e+00 : f32
    %25 = vector.broadcast %cst_24 : f32 to vector<2x32xf32>
    %cst_25 = arith.constant 0.000000e+00 : f32
    %26 = vector.broadcast %cst_25 : f32 to vector<2x5xf32>
    %cst_26 = arith.constant 0.000000e+00 : f32
    %27 = vector.broadcast %cst_26 : f32 to vector<2x16xf32>
    %cst_27 = arith.constant 0.000000e+00 : f32
    %28 = vector.broadcast %cst_27 : f32 to vector<2x16xf32>
    %29 = tpu.concatenate %25, %26, %24 in 1 : vector<2x32xf32>, vector<2x5xf32>, vector<2x32xf32> -> vector<2x69xf32>
    %30 = arith.truncf %29 : vector<2x69xf32> to vector<2x69xbf16>
    %cst_28 = arith.constant dense<0.000000e+00> : vector<2x192xf32>
    %31 = tpu.matmul %30, %1, %cst_28 {dimension_numbers = #tpu.dot_dimension_numbers<[1], [0], [0], [1], [0, 0, 1, 1], [], []>} : vector<2x69xbf16>, vector<69x192xbf16>, vector<2x192xf32> -> vector<2x192xf32>
    %32 = vector.broadcast %2 : vector<1x192xf32> to vector<2x192xf32>
    %33 = arith.addf %31, %32 : vector<2x192xf32>
    %34 = vector.extract_strided_slice %33 {offsets = [0, 0], sizes = [2, 32], strides = [1, 1]} : vector<2x192xf32> to vector<2x32xf32>
    %35 = vector.extract_strided_slice %33 {offsets = [0, 96], sizes = [2, 32], strides = [1, 1]} : vector<2x192xf32> to vector<2x32xf32>
    %36 = arith.addf %34, %35 : vector<2x32xf32>
    %37 = arith.negf %36 : vector<2x32xf32>
    %38 = math.exp %37 : vector<2x32xf32>
    %cst_29 = arith.constant 1.000000e+00 : f32
    %39 = vector.broadcast %cst_29 : f32 to vector<2x32xf32>
    %40 = arith.addf %39, %38 : vector<2x32xf32>
    %41 = arith.divf %39, %40 : vector<2x32xf32>
    %42 = vector.extract_strided_slice %33 {offsets = [0, 32], sizes = [2, 32], strides = [1, 1]} : vector<2x192xf32> to vector<2x32xf32>
    %43 = vector.extract_strided_slice %33 {offsets = [0, 128], sizes = [2, 32], strides = [1, 1]} : vector<2x192xf32> to vector<2x32xf32>
    %44 = arith.addf %42, %43 : vector<2x32xf32>
    %45 = arith.negf %44 : vector<2x32xf32>
    %46 = math.exp %45 : vector<2x32xf32>
    %cst_30 = arith.constant 1.000000e+00 : f32
    %47 = vector.broadcast %cst_30 : f32 to vector<2x32xf32>
    %48 = arith.addf %47, %46 : vector<2x32xf32>
    %49 = arith.divf %47, %48 : vector<2x32xf32>
    %50 = vector.extract_strided_slice %33 {offsets = [0, 64], sizes = [2, 32], strides = [1, 1]} : vector<2x192xf32> to vector<2x32xf32>
    %51 = vector.extract_strided_slice %33 {offsets = [0, 160], sizes = [2, 32], strides = [1, 1]} : vector<2x192xf32> to vector<2x32xf32>
    %52 = arith.mulf %41, %51 : vector<2x32xf32>
    %53 = arith.addf %50, %52 : vector<2x32xf32>
    %54 = math.tanh %53 : vector<2x32xf32>
    %cst_31 = arith.constant 1.000000e+00 : f32
    %55 = vector.broadcast %cst_31 : f32 to vector<2x32xf32>
    %56 = arith.subf %55, %49 : vector<2x32xf32>
    %57 = arith.mulf %56, %54 : vector<2x32xf32>
    %58 = arith.mulf %49, %24 : vector<2x32xf32>
    %59 = arith.addf %57, %58 : vector<2x32xf32>
    %60 = arith.truncf %59 : vector<2x32xf32> to vector<2x32xbf16>
    %cst_32 = arith.constant dense<0.000000e+00> : vector<2x21xf32>
    %61 = tpu.matmul %60, %3, %cst_32 {dimension_numbers = #tpu.dot_dimension_numbers<[1], [0], [0], [1], [0, 0, 1, 1], [], []>} : vector<2x32xbf16>, vector<32x21xbf16>, vector<2x21xf32> -> vector<2x21xf32>
    %62 = vector.broadcast %4 : vector<1x21xf32> to vector<2x21xf32>
    %63 = arith.addf %61, %62 : vector<2x21xf32>
    %64 = vector.extract_strided_slice %63 {offsets = [0, 0], sizes = [2, 16], strides = [1, 1]} : vector<2x21xf32> to vector<2x16xf32>
    %65 = vector.extract_strided_slice %63 {offsets = [0, 16], sizes = [2, 5], strides = [1, 1]} : vector<2x21xf32> to vector<2x5xf32>
    %66 = arith.negf %65 : vector<2x5xf32>
    %67 = math.exp %66 : vector<2x5xf32>
    %cst_33 = arith.constant 1.000000e+00 : f32
    %68 = vector.broadcast %cst_33 : f32 to vector<2x5xf32>
    %69 = arith.addf %68, %67 : vector<2x5xf32>
    %70 = arith.divf %68, %69 : vector<2x5xf32>
    %71 = vector.shape_cast %64 : vector<2x16xf32> to vector<2x1x16xf32>
    %72 = vector.broadcast %71 : vector<2x1x16xf32> to vector<2x16x16xf32>
    %73 = arith.addf %19, %72 : vector<2x16x16xf32>
    %74 = vector.shape_cast %27 : vector<2x16xf32> to vector<2x16x1xf32>
    %75 = vector.shape_cast %6 : vector<16xf32> to vector<1x1x16xf32>
    %76 = vector.broadcast %74 : vector<2x16x1xf32> to vector<2x16x16xf32>
    %77 = vector.broadcast %75 : vector<1x1x16xf32> to vector<2x16x16xf32>
    %78 = arith.mulf %76, %77 : vector<2x16x16xf32>
    %79 = arith.addf %73, %78 : vector<2x16x16xf32>
    %80 = math.tanh %79 : vector<2x16x16xf32>
    %81 = vector.shape_cast %8 : vector<16xf32> to vector<1x1x16xf32>
    %82 = vector.broadcast %81 : vector<1x1x16xf32> to vector<2x16x16xf32>
    %83 = arith.mulf %80, %82 : vector<2x16x16xf32>
    %cst_34 = arith.constant dense<0.000000e+00> : vector<2x16xf32>
    %84 = vector.multi_reduction <add>, %83, %cst_34 [2] : vector<2x16x16xf32> to vector<2x16xf32>
    %85 = arith.addf %84, %15 : vector<2x16xf32>
    %cst_35 = arith.constant dense<0xFF800000> : vector<2xf32>
    %86 = vector.multi_reduction <maximumf>, %85, %cst_35 [1] : vector<2x16xf32> to vector<2xf32>
    %87 = vector.shape_cast %86 : vector<2xf32> to vector<2x1xf32>
    %88 = vector.broadcast %87 : vector<2x1xf32> to vector<2x16xf32>
    %89 = arith.subf %85, %88 : vector<2x16xf32>
    %90 = math.exp %89 : vector<2x16xf32>
    %cst_36 = arith.constant dense<0.000000e+00> : vector<2xf32>
    %91 = vector.multi_reduction <add>, %90, %cst_36 [1] : vector<2x16xf32> to vector<2xf32>
    %92 = vector.shape_cast %91 : vector<2xf32> to vector<2x1xf32>
    %93 = tpu.reciprocal %92 {approx = true} : vector<2x1xf32> -> vector<2x1xf32>
    %94 = arith.mulf %92, %93 : vector<2x1xf32>
    %cst_37 = arith.constant 2.000000e+00 : f32
    %95 = vector.broadcast %cst_37 : f32 to vector<2x1xf32>
    %96 = arith.subf %95, %94 : vector<2x1xf32>
    %97 = arith.mulf %93, %96 : vector<2x1xf32>
    %98 = vector.broadcast %97 : vector<2x1xf32> to vector<2x16xf32>
    %99 = arith.mulf %90, %98 : vector<2x16xf32>
    %100 = arith.minimumf %99, %27 : vector<2x16xf32>
    %101 = arith.addf %28, %100 : vector<2x16xf32>
    %102 = arith.addf %27, %99 : vector<2x16xf32>
    %103 = vector.broadcast %87 : vector<2x1xf32> to vector<2x16xf32>
    %104 = arith.subf %85, %103 : vector<2x16xf32>
    %105 = math.log %92 : vector<2x1xf32>
    %106 = vector.broadcast %105 : vector<2x1xf32> to vector<2x16xf32>
    %107 = arith.subf %104, %106 : vector<2x16xf32>
    %c0_38 = arith.constant 0 : index
    %c0_39 = arith.constant 0 : index
    %c0_40 = arith.constant 0 : index
    %108 = vector.load %arg1[%c0_38, %c0_39, %c0_40] : memref<2x6x16xf32, #tpu.memory_space<vmem>>, vector<2x1x16xf32>
    %109 = vector.shape_cast %108 : vector<2x1x16xf32> to vector<2x16xf32>
    %110 = arith.addf %107, %109 : vector<2x16xf32>
    %cst_41 = arith.constant 1.000000e+00 : f32
    %111 = vector.broadcast %cst_41 : f32 to vector<2x16xf32>
    %112 = arith.divf %110, %111 : vector<2x16xf32>
    %cst_42 = arith.constant dense<0xFF800000> : vector<2xf32>
    %113 = vector.multi_reduction <maximumf>, %112, %cst_42 [1] : vector<2x16xf32> to vector<2xf32>
    %114 = vector.shape_cast %113 : vector<2xf32> to vector<2x1xf32>
    %115 = vector.broadcast %114 : vector<2x1xf32> to vector<2x16xf32>
    %116 = arith.cmpf oeq, %112, %115 : vector<2x16xf32>
    %c16_i32 = arith.constant 16 : i32
    %117 = vector.broadcast %c16_i32 : i32 to vector<2x16xi32>
    %118 = arith.select %116, %20, %117 : vector<2x16xi1>, vector<2x16xi32>
    %cst_43 = arith.constant dense<2147483647> : vector<2xi32>
    %119 = vector.multi_reduction <minsi>, %118, %cst_43 [1] : vector<2x16xi32> to vector<2xi32>
    %120 = vector.shape_cast %119 : vector<2xi32> to vector<2x1xi32>
    %121 = vector.broadcast %120 : vector<2x1xi32> to vector<2x16xi32>
    %122 = arith.cmpi eq, %20, %121 : vector<2x16xi32>
    %123 = arith.extui %122 : vector<2x16xi1> to vector<2x16xi32>
    %124 = arith.sitofp %123 : vector<2x16xi32> to vector<2x16xf32>
    %125 = vector.broadcast %120 : vector<2x1xi32> to vector<2x128xi32>
    %126 = arith.cmpi eq, %21, %125 : vector<2x128xi32>
    %127 = arith.extui %126 : vector<2x128xi1> to vector<2x128xi32>
    %128 = arith.sitofp %127 : vector<2x128xi32> to vector<2x128xf32>
    %129 = vector.shape_cast %124 : vector<2x16xf32> to vector<2x16x1xf32>
    %130 = arith.extf %0 : vector<2x16x32xbf16> to vector<2x16x32xf32>
    %131 = vector.broadcast %129 : vector<2x16x1xf32> to vector<2x16x32xf32>
    %132 = arith.mulf %130, %131 : vector<2x16x32xf32>
    %cst_44 = arith.constant dense<0.000000e+00> : vector<2x32xf32>
    %133 = vector.multi_reduction <add>, %132, %cst_44 [1] : vector<2x16x32xf32> to vector<2x32xf32>
    %c0_i32 = arith.constant 0 : i32
    %134 = vector.broadcast %c0_i32 : i32 to vector<2x5xi32>
    %135 = arith.cmpi slt, %22, %134 : vector<2x5xi32>
    %136 = arith.extui %135 : vector<2x5xi1> to vector<2x5xi32>
    %137 = arith.sitofp %136 : vector<2x5xi32> to vector<2x5xf32>
    %138 = arith.mulf %70, %137 : vector<2x5xf32>
    %139 = tpu.concatenate %133, %138, %59 in 1 : vector<2x32xf32>, vector<2x5xf32>, vector<2x32xf32> -> vector<2x69xf32>
    %140 = arith.truncf %139 : vector<2x69xf32> to vector<2x69xbf16>
    %cst_45 = arith.constant dense<0.000000e+00> : vector<2x192xf32>
    %141 = tpu.matmul %140, %1, %cst_45 {dimension_numbers = #tpu.dot_dimension_numbers<[1], [0], [0], [1], [0, 0, 1, 1], [], []>} : vector<2x69xbf16>, vector<69x192xbf16>, vector<2x192xf32> -> vector<2x192xf32>
    %142 = vector.broadcast %2 : vector<1x192xf32> to vector<2x192xf32>
    %143 = arith.addf %141, %142 : vector<2x192xf32>
    %144 = vector.extract_strided_slice %143 {offsets = [0, 0], sizes = [2, 32], strides = [1, 1]} : vector<2x192xf32> to vector<2x32xf32>
    %145 = vector.extract_strided_slice %143 {offsets = [0, 96], sizes = [2, 32], strides = [1, 1]} : vector<2x192xf32> to vector<2x32xf32>
    %146 = arith.addf %144, %145 : vector<2x32xf32>
    %147 = arith.negf %146 : vector<2x32xf32>
    %148 = math.exp %147 : vector<2x32xf32>
    %cst_46 = arith.constant 1.000000e+00 : f32
    %149 = vector.broadcast %cst_46 : f32 to vector<2x32xf32>
    %150 = arith.addf %149, %148 : vector<2x32xf32>
    %151 = arith.divf %149, %150 : vector<2x32xf32>
    %152 = vector.extract_strided_slice %143 {offsets = [0, 32], sizes = [2, 32], strides = [1, 1]} : vector<2x192xf32> to vector<2x32xf32>
    %153 = vector.extract_strided_slice %143 {offsets = [0, 128], sizes = [2, 32], strides = [1, 1]} : vector<2x192xf32> to vector<2x32xf32>
    %154 = arith.addf %152, %153 : vector<2x32xf32>
    %155 = arith.negf %154 : vector<2x32xf32>
    %156 = math.exp %155 : vector<2x32xf32>
    %cst_47 = arith.constant 1.000000e+00 : f32
    %157 = vector.broadcast %cst_47 : f32 to vector<2x32xf32>
    %158 = arith.addf %157, %156 : vector<2x32xf32>
    %159 = arith.divf %157, %158 : vector<2x32xf32>
    %160 = vector.extract_strided_slice %143 {offsets = [0, 64], sizes = [2, 32], strides = [1, 1]} : vector<2x192xf32> to vector<2x32xf32>
    %161 = vector.extract_strided_slice %143 {offsets = [0, 160], sizes = [2, 32], strides = [1, 1]} : vector<2x192xf32> to vector<2x32xf32>
    %162 = arith.mulf %151, %161 : vector<2x32xf32>
    %163 = arith.addf %160, %162 : vector<2x32xf32>
    %164 = math.tanh %163 : vector<2x32xf32>
    %cst_48 = arith.constant 1.000000e+00 : f32
    %165 = vector.broadcast %cst_48 : f32 to vector<2x32xf32>
    %166 = arith.subf %165, %159 : vector<2x32xf32>
    %167 = arith.mulf %166, %164 : vector<2x32xf32>
    %168 = arith.mulf %159, %59 : vector<2x32xf32>
    %169 = arith.addf %167, %168 : vector<2x32xf32>
    %170 = arith.truncf %169 : vector<2x32xf32> to vector<2x32xbf16>
    %cst_49 = arith.constant dense<0.000000e+00> : vector<2x21xf32>
    %171 = tpu.matmul %170, %3, %cst_49 {dimension_numbers = #tpu.dot_dimension_numbers<[1], [0], [0], [1], [0, 0, 1, 1], [], []>} : vector<2x32xbf16>, vector<32x21xbf16>, vector<2x21xf32> -> vector<2x21xf32>
    %172 = vector.broadcast %4 : vector<1x21xf32> to vector<2x21xf32>
    %173 = arith.addf %171, %172 : vector<2x21xf32>
    %174 = vector.extract_strided_slice %173 {offsets = [0, 0], sizes = [2, 16], strides = [1, 1]} : vector<2x21xf32> to vector<2x16xf32>
    %175 = vector.extract_strided_slice %173 {offsets = [0, 16], sizes = [2, 5], strides = [1, 1]} : vector<2x21xf32> to vector<2x5xf32>
    %176 = arith.negf %175 : vector<2x5xf32>
    %177 = math.exp %176 : vector<2x5xf32>
    %cst_50 = arith.constant 1.000000e+00 : f32
    %178 = vector.broadcast %cst_50 : f32 to vector<2x5xf32>
    %179 = arith.addf %178, %177 : vector<2x5xf32>
    %180 = arith.divf %178, %179 : vector<2x5xf32>
    %181 = vector.shape_cast %174 : vector<2x16xf32> to vector<2x1x16xf32>
    %182 = vector.broadcast %181 : vector<2x1x16xf32> to vector<2x16x16xf32>
    %183 = arith.addf %19, %182 : vector<2x16x16xf32>
    %184 = vector.shape_cast %102 : vector<2x16xf32> to vector<2x16x1xf32>
    %185 = vector.shape_cast %6 : vector<16xf32> to vector<1x1x16xf32>
    %186 = vector.broadcast %184 : vector<2x16x1xf32> to vector<2x16x16xf32>
    %187 = vector.broadcast %185 : vector<1x1x16xf32> to vector<2x16x16xf32>
    %188 = arith.mulf %186, %187 : vector<2x16x16xf32>
    %189 = arith.addf %183, %188 : vector<2x16x16xf32>
    %190 = math.tanh %189 : vector<2x16x16xf32>
    %191 = vector.shape_cast %8 : vector<16xf32> to vector<1x1x16xf32>
    %192 = vector.broadcast %191 : vector<1x1x16xf32> to vector<2x16x16xf32>
    %193 = arith.mulf %190, %192 : vector<2x16x16xf32>
    %cst_51 = arith.constant dense<0.000000e+00> : vector<2x16xf32>
    %194 = vector.multi_reduction <add>, %193, %cst_51 [2] : vector<2x16x16xf32> to vector<2x16xf32>
    %195 = arith.addf %194, %15 : vector<2x16xf32>
    %cst_52 = arith.constant dense<0xFF800000> : vector<2xf32>
    %196 = vector.multi_reduction <maximumf>, %195, %cst_52 [1] : vector<2x16xf32> to vector<2xf32>
    %197 = vector.shape_cast %196 : vector<2xf32> to vector<2x1xf32>
    %198 = vector.broadcast %197 : vector<2x1xf32> to vector<2x16xf32>
    %199 = arith.subf %195, %198 : vector<2x16xf32>
    %200 = math.exp %199 : vector<2x16xf32>
    %cst_53 = arith.constant dense<0.000000e+00> : vector<2xf32>
    %201 = vector.multi_reduction <add>, %200, %cst_53 [1] : vector<2x16xf32> to vector<2xf32>
    %202 = vector.shape_cast %201 : vector<2xf32> to vector<2x1xf32>
    %203 = tpu.reciprocal %202 {approx = true} : vector<2x1xf32> -> vector<2x1xf32>
    %204 = arith.mulf %202, %203 : vector<2x1xf32>
    %cst_54 = arith.constant 2.000000e+00 : f32
    %205 = vector.broadcast %cst_54 : f32 to vector<2x1xf32>
    %206 = arith.subf %205, %204 : vector<2x1xf32>
    %207 = arith.mulf %203, %206 : vector<2x1xf32>
    %208 = vector.broadcast %207 : vector<2x1xf32> to vector<2x16xf32>
    %209 = arith.mulf %200, %208 : vector<2x16xf32>
    %210 = arith.minimumf %209, %102 : vector<2x16xf32>
    %211 = arith.addf %101, %210 : vector<2x16xf32>
    %212 = arith.addf %102, %209 : vector<2x16xf32>
    %213 = vector.broadcast %197 : vector<2x1xf32> to vector<2x16xf32>
    %214 = arith.subf %195, %213 : vector<2x16xf32>
    %215 = math.log %202 : vector<2x1xf32>
    %216 = vector.broadcast %215 : vector<2x1xf32> to vector<2x16xf32>
    %217 = arith.subf %214, %216 : vector<2x16xf32>
    %c0_55 = arith.constant 0 : index
    %c1_56 = arith.constant 1 : index
    %c0_57 = arith.constant 0 : index
    %218 = vector.load %arg1[%c0_55, %c1_56, %c0_57] : memref<2x6x16xf32, #tpu.memory_space<vmem>>, vector<2x1x16xf32>
    %219 = vector.shape_cast %218 : vector<2x1x16xf32> to vector<2x16xf32>
    %220 = arith.addf %217, %219 : vector<2x16xf32>
    %cst_58 = arith.constant 1.000000e+00 : f32
    %221 = vector.broadcast %cst_58 : f32 to vector<2x16xf32>
    %222 = arith.divf %220, %221 : vector<2x16xf32>
    %cst_59 = arith.constant dense<0xFF800000> : vector<2xf32>
    %223 = vector.multi_reduction <maximumf>, %222, %cst_59 [1] : vector<2x16xf32> to vector<2xf32>
    %224 = vector.shape_cast %223 : vector<2xf32> to vector<2x1xf32>
    %225 = vector.broadcast %224 : vector<2x1xf32> to vector<2x16xf32>
    %226 = arith.cmpf oeq, %222, %225 : vector<2x16xf32>
    %c16_i32_60 = arith.constant 16 : i32
    %227 = vector.broadcast %c16_i32_60 : i32 to vector<2x16xi32>
    %228 = arith.select %226, %20, %227 : vector<2x16xi1>, vector<2x16xi32>
    %cst_61 = arith.constant dense<2147483647> : vector<2xi32>
    %229 = vector.multi_reduction <minsi>, %228, %cst_61 [1] : vector<2x16xi32> to vector<2xi32>
    %230 = vector.shape_cast %229 : vector<2xi32> to vector<2x1xi32>
    %231 = vector.broadcast %230 : vector<2x1xi32> to vector<2x16xi32>
    %232 = arith.cmpi eq, %20, %231 : vector<2x16xi32>
    %233 = arith.extui %232 : vector<2x16xi1> to vector<2x16xi32>
    %234 = arith.sitofp %233 : vector<2x16xi32> to vector<2x16xf32>
    %235 = vector.broadcast %230 : vector<2x1xi32> to vector<2x128xi32>
    %236 = arith.cmpi eq, %21, %235 : vector<2x128xi32>
    %237 = arith.extui %236 : vector<2x128xi1> to vector<2x128xi32>
    %238 = arith.sitofp %237 : vector<2x128xi32> to vector<2x128xf32>
    %239 = vector.shape_cast %234 : vector<2x16xf32> to vector<2x16x1xf32>
    %240 = arith.extf %0 : vector<2x16x32xbf16> to vector<2x16x32xf32>
    %241 = vector.broadcast %239 : vector<2x16x1xf32> to vector<2x16x32xf32>
    %242 = arith.mulf %240, %241 : vector<2x16x32xf32>
    %cst_62 = arith.constant dense<0.000000e+00> : vector<2x32xf32>
    %243 = vector.multi_reduction <add>, %242, %cst_62 [1] : vector<2x16x32xf32> to vector<2x32xf32>
    %c1_i32 = arith.constant 1 : i32
    %244 = vector.broadcast %c1_i32 : i32 to vector<2x5xi32>
    %245 = arith.cmpi slt, %22, %244 : vector<2x5xi32>
    %246 = arith.extui %245 : vector<2x5xi1> to vector<2x5xi32>
    %247 = arith.sitofp %246 : vector<2x5xi32> to vector<2x5xf32>
    %248 = arith.mulf %180, %247 : vector<2x5xf32>
    %249 = tpu.concatenate %243, %248, %169 in 1 : vector<2x32xf32>, vector<2x5xf32>, vector<2x32xf32> -> vector<2x69xf32>
    %250 = arith.truncf %249 : vector<2x69xf32> to vector<2x69xbf16>
    %cst_63 = arith.constant dense<0.000000e+00> : vector<2x192xf32>
    %251 = tpu.matmul %250, %1, %cst_63 {dimension_numbers = #tpu.dot_dimension_numbers<[1], [0], [0], [1], [0, 0, 1, 1], [], []>} : vector<2x69xbf16>, vector<69x192xbf16>, vector<2x192xf32> -> vector<2x192xf32>
    %252 = vector.broadcast %2 : vector<1x192xf32> to vector<2x192xf32>
    %253 = arith.addf %251, %252 : vector<2x192xf32>
    %254 = vector.extract_strided_slice %253 {offsets = [0, 0], sizes = [2, 32], strides = [1, 1]} : vector<2x192xf32> to vector<2x32xf32>
    %255 = vector.extract_strided_slice %253 {offsets = [0, 96], sizes = [2, 32], strides = [1, 1]} : vector<2x192xf32> to vector<2x32xf32>
    %256 = arith.addf %254, %255 : vector<2x32xf32>
    %257 = arith.negf %256 : vector<2x32xf32>
    %258 = math.exp %257 : vector<2x32xf32>
    %cst_64 = arith.constant 1.000000e+00 : f32
    %259 = vector.broadcast %cst_64 : f32 to vector<2x32xf32>
    %260 = arith.addf %259, %258 : vector<2x32xf32>
    %261 = arith.divf %259, %260 : vector<2x32xf32>
    %262 = vector.extract_strided_slice %253 {offsets = [0, 32], sizes = [2, 32], strides = [1, 1]} : vector<2x192xf32> to vector<2x32xf32>
    %263 = vector.extract_strided_slice %253 {offsets = [0, 128], sizes = [2, 32], strides = [1, 1]} : vector<2x192xf32> to vector<2x32xf32>
    %264 = arith.addf %262, %263 : vector<2x32xf32>
    %265 = arith.negf %264 : vector<2x32xf32>
    %266 = math.exp %265 : vector<2x32xf32>
    %cst_65 = arith.constant 1.000000e+00 : f32
    %267 = vector.broadcast %cst_65 : f32 to vector<2x32xf32>
    %268 = arith.addf %267, %266 : vector<2x32xf32>
    %269 = arith.divf %267, %268 : vector<2x32xf32>
    %270 = vector.extract_strided_slice %253 {offsets = [0, 64], sizes = [2, 32], strides = [1, 1]} : vector<2x192xf32> to vector<2x32xf32>
    %271 = vector.extract_strided_slice %253 {offsets = [0, 160], sizes = [2, 32], strides = [1, 1]} : vector<2x192xf32> to vector<2x32xf32>
    %272 = arith.mulf %261, %271 : vector<2x32xf32>
    %273 = arith.addf %270, %272 : vector<2x32xf32>
    %274 = math.tanh %273 : vector<2x32xf32>
    %cst_66 = arith.constant 1.000000e+00 : f32
    %275 = vector.broadcast %cst_66 : f32 to vector<2x32xf32>
    %276 = arith.subf %275, %269 : vector<2x32xf32>
    %277 = arith.mulf %276, %274 : vector<2x32xf32>
    %278 = arith.mulf %269, %169 : vector<2x32xf32>
    %279 = arith.addf %277, %278 : vector<2x32xf32>
    %280 = arith.truncf %279 : vector<2x32xf32> to vector<2x32xbf16>
    %cst_67 = arith.constant dense<0.000000e+00> : vector<2x21xf32>
    %281 = tpu.matmul %280, %3, %cst_67 {dimension_numbers = #tpu.dot_dimension_numbers<[1], [0], [0], [1], [0, 0, 1, 1], [], []>} : vector<2x32xbf16>, vector<32x21xbf16>, vector<2x21xf32> -> vector<2x21xf32>
    %282 = vector.broadcast %4 : vector<1x21xf32> to vector<2x21xf32>
    %283 = arith.addf %281, %282 : vector<2x21xf32>
    %284 = vector.extract_strided_slice %283 {offsets = [0, 0], sizes = [2, 16], strides = [1, 1]} : vector<2x21xf32> to vector<2x16xf32>
    %285 = vector.extract_strided_slice %283 {offsets = [0, 16], sizes = [2, 5], strides = [1, 1]} : vector<2x21xf32> to vector<2x5xf32>
    %286 = arith.negf %285 : vector<2x5xf32>
    %287 = math.exp %286 : vector<2x5xf32>
    %cst_68 = arith.constant 1.000000e+00 : f32
    %288 = vector.broadcast %cst_68 : f32 to vector<2x5xf32>
    %289 = arith.addf %288, %287 : vector<2x5xf32>
    %290 = arith.divf %288, %289 : vector<2x5xf32>
    %291 = vector.shape_cast %284 : vector<2x16xf32> to vector<2x1x16xf32>
    %292 = vector.broadcast %291 : vector<2x1x16xf32> to vector<2x16x16xf32>
    %293 = arith.addf %19, %292 : vector<2x16x16xf32>
    %294 = vector.shape_cast %212 : vector<2x16xf32> to vector<2x16x1xf32>
    %295 = vector.shape_cast %6 : vector<16xf32> to vector<1x1x16xf32>
    %296 = vector.broadcast %294 : vector<2x16x1xf32> to vector<2x16x16xf32>
    %297 = vector.broadcast %295 : vector<1x1x16xf32> to vector<2x16x16xf32>
    %298 = arith.mulf %296, %297 : vector<2x16x16xf32>
    %299 = arith.addf %293, %298 : vector<2x16x16xf32>
    %300 = math.tanh %299 : vector<2x16x16xf32>
    %301 = vector.shape_cast %8 : vector<16xf32> to vector<1x1x16xf32>
    %302 = vector.broadcast %301 : vector<1x1x16xf32> to vector<2x16x16xf32>
    %303 = arith.mulf %300, %302 : vector<2x16x16xf32>
    %cst_69 = arith.constant dense<0.000000e+00> : vector<2x16xf32>
    %304 = vector.multi_reduction <add>, %303, %cst_69 [2] : vector<2x16x16xf32> to vector<2x16xf32>
    %305 = arith.addf %304, %15 : vector<2x16xf32>
    %cst_70 = arith.constant dense<0xFF800000> : vector<2xf32>
    %306 = vector.multi_reduction <maximumf>, %305, %cst_70 [1] : vector<2x16xf32> to vector<2xf32>
    %307 = vector.shape_cast %306 : vector<2xf32> to vector<2x1xf32>
    %308 = vector.broadcast %307 : vector<2x1xf32> to vector<2x16xf32>
    %309 = arith.subf %305, %308 : vector<2x16xf32>
    %310 = math.exp %309 : vector<2x16xf32>
    %cst_71 = arith.constant dense<0.000000e+00> : vector<2xf32>
    %311 = vector.multi_reduction <add>, %310, %cst_71 [1] : vector<2x16xf32> to vector<2xf32>
    %312 = vector.shape_cast %311 : vector<2xf32> to vector<2x1xf32>
    %313 = tpu.reciprocal %312 {approx = true} : vector<2x1xf32> -> vector<2x1xf32>
    %314 = arith.mulf %312, %313 : vector<2x1xf32>
    %cst_72 = arith.constant 2.000000e+00 : f32
    %315 = vector.broadcast %cst_72 : f32 to vector<2x1xf32>
    %316 = arith.subf %315, %314 : vector<2x1xf32>
    %317 = arith.mulf %313, %316 : vector<2x1xf32>
    %318 = vector.broadcast %317 : vector<2x1xf32> to vector<2x16xf32>
    %319 = arith.mulf %310, %318 : vector<2x16xf32>
    %320 = arith.minimumf %319, %212 : vector<2x16xf32>
    %321 = arith.addf %211, %320 : vector<2x16xf32>
    %322 = arith.addf %212, %319 : vector<2x16xf32>
    %323 = vector.broadcast %307 : vector<2x1xf32> to vector<2x16xf32>
    %324 = arith.subf %305, %323 : vector<2x16xf32>
    %325 = math.log %312 : vector<2x1xf32>
    %326 = vector.broadcast %325 : vector<2x1xf32> to vector<2x16xf32>
    %327 = arith.subf %324, %326 : vector<2x16xf32>
    %c0_73 = arith.constant 0 : index
    %c2 = arith.constant 2 : index
    %c0_74 = arith.constant 0 : index
    %328 = vector.load %arg1[%c0_73, %c2, %c0_74] : memref<2x6x16xf32, #tpu.memory_space<vmem>>, vector<2x1x16xf32>
    %329 = vector.shape_cast %328 : vector<2x1x16xf32> to vector<2x16xf32>
    %330 = arith.addf %327, %329 : vector<2x16xf32>
    %cst_75 = arith.constant 1.000000e+00 : f32
    %331 = vector.broadcast %cst_75 : f32 to vector<2x16xf32>
    %332 = arith.divf %330, %331 : vector<2x16xf32>
    %cst_76 = arith.constant dense<0xFF800000> : vector<2xf32>
    %333 = vector.multi_reduction <maximumf>, %332, %cst_76 [1] : vector<2x16xf32> to vector<2xf32>
    %334 = vector.shape_cast %333 : vector<2xf32> to vector<2x1xf32>
    %335 = vector.broadcast %334 : vector<2x1xf32> to vector<2x16xf32>
    %336 = arith.cmpf oeq, %332, %335 : vector<2x16xf32>
    %c16_i32_77 = arith.constant 16 : i32
    %337 = vector.broadcast %c16_i32_77 : i32 to vector<2x16xi32>
    %338 = arith.select %336, %20, %337 : vector<2x16xi1>, vector<2x16xi32>
    %cst_78 = arith.constant dense<2147483647> : vector<2xi32>
    %339 = vector.multi_reduction <minsi>, %338, %cst_78 [1] : vector<2x16xi32> to vector<2xi32>
    %340 = vector.shape_cast %339 : vector<2xi32> to vector<2x1xi32>
    %341 = vector.broadcast %340 : vector<2x1xi32> to vector<2x16xi32>
    %342 = arith.cmpi eq, %20, %341 : vector<2x16xi32>
    %343 = arith.extui %342 : vector<2x16xi1> to vector<2x16xi32>
    %344 = arith.sitofp %343 : vector<2x16xi32> to vector<2x16xf32>
    %345 = vector.broadcast %340 : vector<2x1xi32> to vector<2x128xi32>
    %346 = arith.cmpi eq, %21, %345 : vector<2x128xi32>
    %347 = arith.extui %346 : vector<2x128xi1> to vector<2x128xi32>
    %348 = arith.sitofp %347 : vector<2x128xi32> to vector<2x128xf32>
    %349 = vector.shape_cast %344 : vector<2x16xf32> to vector<2x16x1xf32>
    %350 = arith.extf %0 : vector<2x16x32xbf16> to vector<2x16x32xf32>
    %351 = vector.broadcast %349 : vector<2x16x1xf32> to vector<2x16x32xf32>
    %352 = arith.mulf %350, %351 : vector<2x16x32xf32>
    %cst_79 = arith.constant dense<0.000000e+00> : vector<2x32xf32>
    %353 = vector.multi_reduction <add>, %352, %cst_79 [1] : vector<2x16x32xf32> to vector<2x32xf32>
    %c2_i32 = arith.constant 2 : i32
    %354 = vector.broadcast %c2_i32 : i32 to vector<2x5xi32>
    %355 = arith.cmpi slt, %22, %354 : vector<2x5xi32>
    %356 = arith.extui %355 : vector<2x5xi1> to vector<2x5xi32>
    %357 = arith.sitofp %356 : vector<2x5xi32> to vector<2x5xf32>
    %358 = arith.mulf %290, %357 : vector<2x5xf32>
    %359 = tpu.concatenate %353, %358, %279 in 1 : vector<2x32xf32>, vector<2x5xf32>, vector<2x32xf32> -> vector<2x69xf32>
    %360 = arith.truncf %359 : vector<2x69xf32> to vector<2x69xbf16>
    %cst_80 = arith.constant dense<0.000000e+00> : vector<2x192xf32>
    %361 = tpu.matmul %360, %1, %cst_80 {dimension_numbers = #tpu.dot_dimension_numbers<[1], [0], [0], [1], [0, 0, 1, 1], [], []>} : vector<2x69xbf16>, vector<69x192xbf16>, vector<2x192xf32> -> vector<2x192xf32>
    %362 = vector.broadcast %2 : vector<1x192xf32> to vector<2x192xf32>
    %363 = arith.addf %361, %362 : vector<2x192xf32>
    %364 = vector.extract_strided_slice %363 {offsets = [0, 0], sizes = [2, 32], strides = [1, 1]} : vector<2x192xf32> to vector<2x32xf32>
    %365 = vector.extract_strided_slice %363 {offsets = [0, 96], sizes = [2, 32], strides = [1, 1]} : vector<2x192xf32> to vector<2x32xf32>
    %366 = arith.addf %364, %365 : vector<2x32xf32>
    %367 = arith.negf %366 : vector<2x32xf32>
    %368 = math.exp %367 : vector<2x32xf32>
    %cst_81 = arith.constant 1.000000e+00 : f32
    %369 = vector.broadcast %cst_81 : f32 to vector<2x32xf32>
    %370 = arith.addf %369, %368 : vector<2x32xf32>
    %371 = arith.divf %369, %370 : vector<2x32xf32>
    %372 = vector.extract_strided_slice %363 {offsets = [0, 32], sizes = [2, 32], strides = [1, 1]} : vector<2x192xf32> to vector<2x32xf32>
    %373 = vector.extract_strided_slice %363 {offsets = [0, 128], sizes = [2, 32], strides = [1, 1]} : vector<2x192xf32> to vector<2x32xf32>
    %374 = arith.addf %372, %373 : vector<2x32xf32>
    %375 = arith.negf %374 : vector<2x32xf32>
    %376 = math.exp %375 : vector<2x32xf32>
    %cst_82 = arith.constant 1.000000e+00 : f32
    %377 = vector.broadcast %cst_82 : f32 to vector<2x32xf32>
    %378 = arith.addf %377, %376 : vector<2x32xf32>
    %379 = arith.divf %377, %378 : vector<2x32xf32>
    %380 = vector.extract_strided_slice %363 {offsets = [0, 64], sizes = [2, 32], strides = [1, 1]} : vector<2x192xf32> to vector<2x32xf32>
    %381 = vector.extract_strided_slice %363 {offsets = [0, 160], sizes = [2, 32], strides = [1, 1]} : vector<2x192xf32> to vector<2x32xf32>
    %382 = arith.mulf %371, %381 : vector<2x32xf32>
    %383 = arith.addf %380, %382 : vector<2x32xf32>
    %384 = math.tanh %383 : vector<2x32xf32>
    %cst_83 = arith.constant 1.000000e+00 : f32
    %385 = vector.broadcast %cst_83 : f32 to vector<2x32xf32>
    %386 = arith.subf %385, %379 : vector<2x32xf32>
    %387 = arith.mulf %386, %384 : vector<2x32xf32>
    %388 = arith.mulf %379, %279 : vector<2x32xf32>
    %389 = arith.addf %387, %388 : vector<2x32xf32>
    %390 = arith.truncf %389 : vector<2x32xf32> to vector<2x32xbf16>
    %cst_84 = arith.constant dense<0.000000e+00> : vector<2x21xf32>
    %391 = tpu.matmul %390, %3, %cst_84 {dimension_numbers = #tpu.dot_dimension_numbers<[1], [0], [0], [1], [0, 0, 1, 1], [], []>} : vector<2x32xbf16>, vector<32x21xbf16>, vector<2x21xf32> -> vector<2x21xf32>
    %392 = vector.broadcast %4 : vector<1x21xf32> to vector<2x21xf32>
    %393 = arith.addf %391, %392 : vector<2x21xf32>
    %394 = vector.extract_strided_slice %393 {offsets = [0, 0], sizes = [2, 16], strides = [1, 1]} : vector<2x21xf32> to vector<2x16xf32>
    %395 = vector.extract_strided_slice %393 {offsets = [0, 16], sizes = [2, 5], strides = [1, 1]} : vector<2x21xf32> to vector<2x5xf32>
    %396 = arith.negf %395 : vector<2x5xf32>
    %397 = math.exp %396 : vector<2x5xf32>
    %cst_85 = arith.constant 1.000000e+00 : f32
    %398 = vector.broadcast %cst_85 : f32 to vector<2x5xf32>
    %399 = arith.addf %398, %397 : vector<2x5xf32>
    %400 = arith.divf %398, %399 : vector<2x5xf32>
    %401 = vector.shape_cast %394 : vector<2x16xf32> to vector<2x1x16xf32>
    %402 = vector.broadcast %401 : vector<2x1x16xf32> to vector<2x16x16xf32>
    %403 = arith.addf %19, %402 : vector<2x16x16xf32>
    %404 = vector.shape_cast %322 : vector<2x16xf32> to vector<2x16x1xf32>
    %405 = vector.shape_cast %6 : vector<16xf32> to vector<1x1x16xf32>
    %406 = vector.broadcast %404 : vector<2x16x1xf32> to vector<2x16x16xf32>
    %407 = vector.broadcast %405 : vector<1x1x16xf32> to vector<2x16x16xf32>
    %408 = arith.mulf %406, %407 : vector<2x16x16xf32>
    %409 = arith.addf %403, %408 : vector<2x16x16xf32>
    %410 = math.tanh %409 : vector<2x16x16xf32>
    %411 = vector.shape_cast %8 : vector<16xf32> to vector<1x1x16xf32>
    %412 = vector.broadcast %411 : vector<1x1x16xf32> to vector<2x16x16xf32>
    %413 = arith.mulf %410, %412 : vector<2x16x16xf32>
    %cst_86 = arith.constant dense<0.000000e+00> : vector<2x16xf32>
    %414 = vector.multi_reduction <add>, %413, %cst_86 [2] : vector<2x16x16xf32> to vector<2x16xf32>
    %415 = arith.addf %414, %15 : vector<2x16xf32>
    %cst_87 = arith.constant dense<0xFF800000> : vector<2xf32>
    %416 = vector.multi_reduction <maximumf>, %415, %cst_87 [1] : vector<2x16xf32> to vector<2xf32>
    %417 = vector.shape_cast %416 : vector<2xf32> to vector<2x1xf32>
    %418 = vector.broadcast %417 : vector<2x1xf32> to vector<2x16xf32>
    %419 = arith.subf %415, %418 : vector<2x16xf32>
    %420 = math.exp %419 : vector<2x16xf32>
    %cst_88 = arith.constant dense<0.000000e+00> : vector<2xf32>
    %421 = vector.multi_reduction <add>, %420, %cst_88 [1] : vector<2x16xf32> to vector<2xf32>
    %422 = vector.shape_cast %421 : vector<2xf32> to vector<2x1xf32>
    %423 = tpu.reciprocal %422 {approx = true} : vector<2x1xf32> -> vector<2x1xf32>
    %424 = arith.mulf %422, %423 : vector<2x1xf32>
    %cst_89 = arith.constant 2.000000e+00 : f32
    %425 = vector.broadcast %cst_89 : f32 to vector<2x1xf32>
    %426 = arith.subf %425, %424 : vector<2x1xf32>
    %427 = arith.mulf %423, %426 : vector<2x1xf32>
    %428 = vector.broadcast %427 : vector<2x1xf32> to vector<2x16xf32>
    %429 = arith.mulf %420, %428 : vector<2x16xf32>
    %430 = arith.minimumf %429, %322 : vector<2x16xf32>
    %431 = arith.addf %321, %430 : vector<2x16xf32>
    %432 = arith.addf %322, %429 : vector<2x16xf32>
    %433 = vector.broadcast %417 : vector<2x1xf32> to vector<2x16xf32>
    %434 = arith.subf %415, %433 : vector<2x16xf32>
    %435 = math.log %422 : vector<2x1xf32>
    %436 = vector.broadcast %435 : vector<2x1xf32> to vector<2x16xf32>
    %437 = arith.subf %434, %436 : vector<2x16xf32>
    %c0_90 = arith.constant 0 : index
    %c3 = arith.constant 3 : index
    %c0_91 = arith.constant 0 : index
    %438 = vector.load %arg1[%c0_90, %c3, %c0_91] : memref<2x6x16xf32, #tpu.memory_space<vmem>>, vector<2x1x16xf32>
    %439 = vector.shape_cast %438 : vector<2x1x16xf32> to vector<2x16xf32>
    %440 = arith.addf %437, %439 : vector<2x16xf32>
    %cst_92 = arith.constant 1.000000e+00 : f32
    %441 = vector.broadcast %cst_92 : f32 to vector<2x16xf32>
    %442 = arith.divf %440, %441 : vector<2x16xf32>
    %cst_93 = arith.constant dense<0xFF800000> : vector<2xf32>
    %443 = vector.multi_reduction <maximumf>, %442, %cst_93 [1] : vector<2x16xf32> to vector<2xf32>
    %444 = vector.shape_cast %443 : vector<2xf32> to vector<2x1xf32>
    %445 = vector.broadcast %444 : vector<2x1xf32> to vector<2x16xf32>
    %446 = arith.cmpf oeq, %442, %445 : vector<2x16xf32>
    %c16_i32_94 = arith.constant 16 : i32
    %447 = vector.broadcast %c16_i32_94 : i32 to vector<2x16xi32>
    %448 = arith.select %446, %20, %447 : vector<2x16xi1>, vector<2x16xi32>
    %cst_95 = arith.constant dense<2147483647> : vector<2xi32>
    %449 = vector.multi_reduction <minsi>, %448, %cst_95 [1] : vector<2x16xi32> to vector<2xi32>
    %450 = vector.shape_cast %449 : vector<2xi32> to vector<2x1xi32>
    %451 = vector.broadcast %450 : vector<2x1xi32> to vector<2x16xi32>
    %452 = arith.cmpi eq, %20, %451 : vector<2x16xi32>
    %453 = arith.extui %452 : vector<2x16xi1> to vector<2x16xi32>
    %454 = arith.sitofp %453 : vector<2x16xi32> to vector<2x16xf32>
    %455 = vector.broadcast %450 : vector<2x1xi32> to vector<2x128xi32>
    %456 = arith.cmpi eq, %21, %455 : vector<2x128xi32>
    %457 = arith.extui %456 : vector<2x128xi1> to vector<2x128xi32>
    %458 = arith.sitofp %457 : vector<2x128xi32> to vector<2x128xf32>
    %459 = vector.shape_cast %454 : vector<2x16xf32> to vector<2x16x1xf32>
    %460 = arith.extf %0 : vector<2x16x32xbf16> to vector<2x16x32xf32>
    %461 = vector.broadcast %459 : vector<2x16x1xf32> to vector<2x16x32xf32>
    %462 = arith.mulf %460, %461 : vector<2x16x32xf32>
    %cst_96 = arith.constant dense<0.000000e+00> : vector<2x32xf32>
    %463 = vector.multi_reduction <add>, %462, %cst_96 [1] : vector<2x16x32xf32> to vector<2x32xf32>
    %c3_i32 = arith.constant 3 : i32
    %464 = vector.broadcast %c3_i32 : i32 to vector<2x5xi32>
    %465 = arith.cmpi slt, %22, %464 : vector<2x5xi32>
    %466 = arith.extui %465 : vector<2x5xi1> to vector<2x5xi32>
    %467 = arith.sitofp %466 : vector<2x5xi32> to vector<2x5xf32>
    %468 = arith.mulf %400, %467 : vector<2x5xf32>
    %469 = tpu.concatenate %463, %468, %389 in 1 : vector<2x32xf32>, vector<2x5xf32>, vector<2x32xf32> -> vector<2x69xf32>
    %470 = arith.truncf %469 : vector<2x69xf32> to vector<2x69xbf16>
    %cst_97 = arith.constant dense<0.000000e+00> : vector<2x192xf32>
    %471 = tpu.matmul %470, %1, %cst_97 {dimension_numbers = #tpu.dot_dimension_numbers<[1], [0], [0], [1], [0, 0, 1, 1], [], []>} : vector<2x69xbf16>, vector<69x192xbf16>, vector<2x192xf32> -> vector<2x192xf32>
    %472 = vector.broadcast %2 : vector<1x192xf32> to vector<2x192xf32>
    %473 = arith.addf %471, %472 : vector<2x192xf32>
    %474 = vector.extract_strided_slice %473 {offsets = [0, 0], sizes = [2, 32], strides = [1, 1]} : vector<2x192xf32> to vector<2x32xf32>
    %475 = vector.extract_strided_slice %473 {offsets = [0, 96], sizes = [2, 32], strides = [1, 1]} : vector<2x192xf32> to vector<2x32xf32>
    %476 = arith.addf %474, %475 : vector<2x32xf32>
    %477 = arith.negf %476 : vector<2x32xf32>
    %478 = math.exp %477 : vector<2x32xf32>
    %cst_98 = arith.constant 1.000000e+00 : f32
    %479 = vector.broadcast %cst_98 : f32 to vector<2x32xf32>
    %480 = arith.addf %479, %478 : vector<2x32xf32>
    %481 = arith.divf %479, %480 : vector<2x32xf32>
    %482 = vector.extract_strided_slice %473 {offsets = [0, 32], sizes = [2, 32], strides = [1, 1]} : vector<2x192xf32> to vector<2x32xf32>
    %483 = vector.extract_strided_slice %473 {offsets = [0, 128], sizes = [2, 32], strides = [1, 1]} : vector<2x192xf32> to vector<2x32xf32>
    %484 = arith.addf %482, %483 : vector<2x32xf32>
    %485 = arith.negf %484 : vector<2x32xf32>
    %486 = math.exp %485 : vector<2x32xf32>
    %cst_99 = arith.constant 1.000000e+00 : f32
    %487 = vector.broadcast %cst_99 : f32 to vector<2x32xf32>
    %488 = arith.addf %487, %486 : vector<2x32xf32>
    %489 = arith.divf %487, %488 : vector<2x32xf32>
    %490 = vector.extract_strided_slice %473 {offsets = [0, 64], sizes = [2, 32], strides = [1, 1]} : vector<2x192xf32> to vector<2x32xf32>
    %491 = vector.extract_strided_slice %473 {offsets = [0, 160], sizes = [2, 32], strides = [1, 1]} : vector<2x192xf32> to vector<2x32xf32>
    %492 = arith.mulf %481, %491 : vector<2x32xf32>
    %493 = arith.addf %490, %492 : vector<2x32xf32>
    %494 = math.tanh %493 : vector<2x32xf32>
    %cst_100 = arith.constant 1.000000e+00 : f32
    %495 = vector.broadcast %cst_100 : f32 to vector<2x32xf32>
    %496 = arith.subf %495, %489 : vector<2x32xf32>
    %497 = arith.mulf %496, %494 : vector<2x32xf32>
    %498 = arith.mulf %489, %389 : vector<2x32xf32>
    %499 = arith.addf %497, %498 : vector<2x32xf32>
    %500 = arith.truncf %499 : vector<2x32xf32> to vector<2x32xbf16>
    %cst_101 = arith.constant dense<0.000000e+00> : vector<2x21xf32>
    %501 = tpu.matmul %500, %3, %cst_101 {dimension_numbers = #tpu.dot_dimension_numbers<[1], [0], [0], [1], [0, 0, 1, 1], [], []>} : vector<2x32xbf16>, vector<32x21xbf16>, vector<2x21xf32> -> vector<2x21xf32>
    %502 = vector.broadcast %4 : vector<1x21xf32> to vector<2x21xf32>
    %503 = arith.addf %501, %502 : vector<2x21xf32>
    %504 = vector.extract_strided_slice %503 {offsets = [0, 0], sizes = [2, 16], strides = [1, 1]} : vector<2x21xf32> to vector<2x16xf32>
    %505 = vector.extract_strided_slice %503 {offsets = [0, 16], sizes = [2, 5], strides = [1, 1]} : vector<2x21xf32> to vector<2x5xf32>
    %506 = arith.negf %505 : vector<2x5xf32>
    %507 = math.exp %506 : vector<2x5xf32>
    %cst_102 = arith.constant 1.000000e+00 : f32
    %508 = vector.broadcast %cst_102 : f32 to vector<2x5xf32>
    %509 = arith.addf %508, %507 : vector<2x5xf32>
    %510 = arith.divf %508, %509 : vector<2x5xf32>
    %511 = vector.shape_cast %504 : vector<2x16xf32> to vector<2x1x16xf32>
    %512 = vector.broadcast %511 : vector<2x1x16xf32> to vector<2x16x16xf32>
    %513 = arith.addf %19, %512 : vector<2x16x16xf32>
    %514 = vector.shape_cast %432 : vector<2x16xf32> to vector<2x16x1xf32>
    %515 = vector.shape_cast %6 : vector<16xf32> to vector<1x1x16xf32>
    %516 = vector.broadcast %514 : vector<2x16x1xf32> to vector<2x16x16xf32>
    %517 = vector.broadcast %515 : vector<1x1x16xf32> to vector<2x16x16xf32>
    %518 = arith.mulf %516, %517 : vector<2x16x16xf32>
    %519 = arith.addf %513, %518 : vector<2x16x16xf32>
    %520 = math.tanh %519 : vector<2x16x16xf32>
    %521 = vector.shape_cast %8 : vector<16xf32> to vector<1x1x16xf32>
    %522 = vector.broadcast %521 : vector<1x1x16xf32> to vector<2x16x16xf32>
    %523 = arith.mulf %520, %522 : vector<2x16x16xf32>
    %cst_103 = arith.constant dense<0.000000e+00> : vector<2x16xf32>
    %524 = vector.multi_reduction <add>, %523, %cst_103 [2] : vector<2x16x16xf32> to vector<2x16xf32>
    %525 = arith.addf %524, %15 : vector<2x16xf32>
    %cst_104 = arith.constant dense<0xFF800000> : vector<2xf32>
    %526 = vector.multi_reduction <maximumf>, %525, %cst_104 [1] : vector<2x16xf32> to vector<2xf32>
    %527 = vector.shape_cast %526 : vector<2xf32> to vector<2x1xf32>
    %528 = vector.broadcast %527 : vector<2x1xf32> to vector<2x16xf32>
    %529 = arith.subf %525, %528 : vector<2x16xf32>
    %530 = math.exp %529 : vector<2x16xf32>
    %cst_105 = arith.constant dense<0.000000e+00> : vector<2xf32>
    %531 = vector.multi_reduction <add>, %530, %cst_105 [1] : vector<2x16xf32> to vector<2xf32>
    %532 = vector.shape_cast %531 : vector<2xf32> to vector<2x1xf32>
    %533 = tpu.reciprocal %532 {approx = true} : vector<2x1xf32> -> vector<2x1xf32>
    %534 = arith.mulf %532, %533 : vector<2x1xf32>
    %cst_106 = arith.constant 2.000000e+00 : f32
    %535 = vector.broadcast %cst_106 : f32 to vector<2x1xf32>
    %536 = arith.subf %535, %534 : vector<2x1xf32>
    %537 = arith.mulf %533, %536 : vector<2x1xf32>
    %538 = vector.broadcast %537 : vector<2x1xf32> to vector<2x16xf32>
    %539 = arith.mulf %530, %538 : vector<2x16xf32>
    %540 = arith.minimumf %539, %432 : vector<2x16xf32>
    %541 = arith.addf %431, %540 : vector<2x16xf32>
    %542 = arith.addf %432, %539 : vector<2x16xf32>
    %543 = vector.broadcast %527 : vector<2x1xf32> to vector<2x16xf32>
    %544 = arith.subf %525, %543 : vector<2x16xf32>
    %545 = math.log %532 : vector<2x1xf32>
    %546 = vector.broadcast %545 : vector<2x1xf32> to vector<2x16xf32>
    %547 = arith.subf %544, %546 : vector<2x16xf32>
    %c0_107 = arith.constant 0 : index
    %c4 = arith.constant 4 : index
    %c0_108 = arith.constant 0 : index
    %548 = vector.load %arg1[%c0_107, %c4, %c0_108] : memref<2x6x16xf32, #tpu.memory_space<vmem>>, vector<2x1x16xf32>
    %549 = vector.shape_cast %548 : vector<2x1x16xf32> to vector<2x16xf32>
    %550 = arith.addf %547, %549 : vector<2x16xf32>
    %cst_109 = arith.constant 1.000000e+00 : f32
    %551 = vector.broadcast %cst_109 : f32 to vector<2x16xf32>
    %552 = arith.divf %550, %551 : vector<2x16xf32>
    %cst_110 = arith.constant dense<0xFF800000> : vector<2xf32>
    %553 = vector.multi_reduction <maximumf>, %552, %cst_110 [1] : vector<2x16xf32> to vector<2xf32>
    %554 = vector.shape_cast %553 : vector<2xf32> to vector<2x1xf32>
    %555 = vector.broadcast %554 : vector<2x1xf32> to vector<2x16xf32>
    %556 = arith.cmpf oeq, %552, %555 : vector<2x16xf32>
    %c16_i32_111 = arith.constant 16 : i32
    %557 = vector.broadcast %c16_i32_111 : i32 to vector<2x16xi32>
    %558 = arith.select %556, %20, %557 : vector<2x16xi1>, vector<2x16xi32>
    %cst_112 = arith.constant dense<2147483647> : vector<2xi32>
    %559 = vector.multi_reduction <minsi>, %558, %cst_112 [1] : vector<2x16xi32> to vector<2xi32>
    %560 = vector.shape_cast %559 : vector<2xi32> to vector<2x1xi32>
    %561 = vector.broadcast %560 : vector<2x1xi32> to vector<2x16xi32>
    %562 = arith.cmpi eq, %20, %561 : vector<2x16xi32>
    %563 = arith.extui %562 : vector<2x16xi1> to vector<2x16xi32>
    %564 = arith.sitofp %563 : vector<2x16xi32> to vector<2x16xf32>
    %565 = vector.broadcast %560 : vector<2x1xi32> to vector<2x128xi32>
    %566 = arith.cmpi eq, %21, %565 : vector<2x128xi32>
    %567 = arith.extui %566 : vector<2x128xi1> to vector<2x128xi32>
    %568 = arith.sitofp %567 : vector<2x128xi32> to vector<2x128xf32>
    %569 = vector.shape_cast %564 : vector<2x16xf32> to vector<2x16x1xf32>
    %570 = arith.extf %0 : vector<2x16x32xbf16> to vector<2x16x32xf32>
    %571 = vector.broadcast %569 : vector<2x16x1xf32> to vector<2x16x32xf32>
    %572 = arith.mulf %570, %571 : vector<2x16x32xf32>
    %cst_113 = arith.constant dense<0.000000e+00> : vector<2x32xf32>
    %573 = vector.multi_reduction <add>, %572, %cst_113 [1] : vector<2x16x32xf32> to vector<2x32xf32>
    %c4_i32 = arith.constant 4 : i32
    %574 = vector.broadcast %c4_i32 : i32 to vector<2x5xi32>
    %575 = arith.cmpi slt, %22, %574 : vector<2x5xi32>
    %576 = arith.extui %575 : vector<2x5xi1> to vector<2x5xi32>
    %577 = arith.sitofp %576 : vector<2x5xi32> to vector<2x5xf32>
    %578 = arith.mulf %510, %577 : vector<2x5xf32>
    %579 = tpu.concatenate %573, %578, %499 in 1 : vector<2x32xf32>, vector<2x5xf32>, vector<2x32xf32> -> vector<2x69xf32>
    %580 = arith.truncf %579 : vector<2x69xf32> to vector<2x69xbf16>
    %cst_114 = arith.constant dense<0.000000e+00> : vector<2x192xf32>
    %581 = tpu.matmul %580, %1, %cst_114 {dimension_numbers = #tpu.dot_dimension_numbers<[1], [0], [0], [1], [0, 0, 1, 1], [], []>} : vector<2x69xbf16>, vector<69x192xbf16>, vector<2x192xf32> -> vector<2x192xf32>
    %582 = vector.broadcast %2 : vector<1x192xf32> to vector<2x192xf32>
    %583 = arith.addf %581, %582 : vector<2x192xf32>
    %584 = vector.extract_strided_slice %583 {offsets = [0, 0], sizes = [2, 32], strides = [1, 1]} : vector<2x192xf32> to vector<2x32xf32>
    %585 = vector.extract_strided_slice %583 {offsets = [0, 96], sizes = [2, 32], strides = [1, 1]} : vector<2x192xf32> to vector<2x32xf32>
    %586 = arith.addf %584, %585 : vector<2x32xf32>
    %587 = arith.negf %586 : vector<2x32xf32>
    %588 = math.exp %587 : vector<2x32xf32>
    %cst_115 = arith.constant 1.000000e+00 : f32
    %589 = vector.broadcast %cst_115 : f32 to vector<2x32xf32>
    %590 = arith.addf %589, %588 : vector<2x32xf32>
    %591 = arith.divf %589, %590 : vector<2x32xf32>
    %592 = vector.extract_strided_slice %583 {offsets = [0, 32], sizes = [2, 32], strides = [1, 1]} : vector<2x192xf32> to vector<2x32xf32>
    %593 = vector.extract_strided_slice %583 {offsets = [0, 128], sizes = [2, 32], strides = [1, 1]} : vector<2x192xf32> to vector<2x32xf32>
    %594 = arith.addf %592, %593 : vector<2x32xf32>
    %595 = arith.negf %594 : vector<2x32xf32>
    %596 = math.exp %595 : vector<2x32xf32>
    %cst_116 = arith.constant 1.000000e+00 : f32
    %597 = vector.broadcast %cst_116 : f32 to vector<2x32xf32>
    %598 = arith.addf %597, %596 : vector<2x32xf32>
    %599 = arith.divf %597, %598 : vector<2x32xf32>
    %600 = vector.extract_strided_slice %583 {offsets = [0, 64], sizes = [2, 32], strides = [1, 1]} : vector<2x192xf32> to vector<2x32xf32>
    %601 = vector.extract_strided_slice %583 {offsets = [0, 160], sizes = [2, 32], strides = [1, 1]} : vector<2x192xf32> to vector<2x32xf32>
    %602 = arith.mulf %591, %601 : vector<2x32xf32>
    %603 = arith.addf %600, %602 : vector<2x32xf32>
    %604 = math.tanh %603 : vector<2x32xf32>
    %cst_117 = arith.constant 1.000000e+00 : f32
    %605 = vector.broadcast %cst_117 : f32 to vector<2x32xf32>
    %606 = arith.subf %605, %599 : vector<2x32xf32>
    %607 = arith.mulf %606, %604 : vector<2x32xf32>
    %608 = arith.mulf %599, %499 : vector<2x32xf32>
    %609 = arith.addf %607, %608 : vector<2x32xf32>
    %610 = arith.truncf %609 : vector<2x32xf32> to vector<2x32xbf16>
    %cst_118 = arith.constant dense<0.000000e+00> : vector<2x21xf32>
    %611 = tpu.matmul %610, %3, %cst_118 {dimension_numbers = #tpu.dot_dimension_numbers<[1], [0], [0], [1], [0, 0, 1, 1], [], []>} : vector<2x32xbf16>, vector<32x21xbf16>, vector<2x21xf32> -> vector<2x21xf32>
    %612 = vector.broadcast %4 : vector<1x21xf32> to vector<2x21xf32>
    %613 = arith.addf %611, %612 : vector<2x21xf32>
    %614 = vector.extract_strided_slice %613 {offsets = [0, 0], sizes = [2, 16], strides = [1, 1]} : vector<2x21xf32> to vector<2x16xf32>
    %615 = vector.extract_strided_slice %613 {offsets = [0, 16], sizes = [2, 5], strides = [1, 1]} : vector<2x21xf32> to vector<2x5xf32>
    %616 = arith.negf %615 : vector<2x5xf32>
    %617 = math.exp %616 : vector<2x5xf32>
    %cst_119 = arith.constant 1.000000e+00 : f32
    %618 = vector.broadcast %cst_119 : f32 to vector<2x5xf32>
    %619 = arith.addf %618, %617 : vector<2x5xf32>
    %620 = arith.divf %618, %619 : vector<2x5xf32>
    %621 = vector.shape_cast %614 : vector<2x16xf32> to vector<2x1x16xf32>
    %622 = vector.broadcast %621 : vector<2x1x16xf32> to vector<2x16x16xf32>
    %623 = arith.addf %19, %622 : vector<2x16x16xf32>
    %624 = vector.shape_cast %542 : vector<2x16xf32> to vector<2x16x1xf32>
    %625 = vector.shape_cast %6 : vector<16xf32> to vector<1x1x16xf32>
    %626 = vector.broadcast %624 : vector<2x16x1xf32> to vector<2x16x16xf32>
    %627 = vector.broadcast %625 : vector<1x1x16xf32> to vector<2x16x16xf32>
    %628 = arith.mulf %626, %627 : vector<2x16x16xf32>
    %629 = arith.addf %623, %628 : vector<2x16x16xf32>
    %630 = math.tanh %629 : vector<2x16x16xf32>
    %631 = vector.shape_cast %8 : vector<16xf32> to vector<1x1x16xf32>
    %632 = vector.broadcast %631 : vector<1x1x16xf32> to vector<2x16x16xf32>
    %633 = arith.mulf %630, %632 : vector<2x16x16xf32>
    %cst_120 = arith.constant dense<0.000000e+00> : vector<2x16xf32>
    %634 = vector.multi_reduction <add>, %633, %cst_120 [2] : vector<2x16x16xf32> to vector<2x16xf32>
    %635 = arith.addf %634, %15 : vector<2x16xf32>
    %cst_121 = arith.constant dense<0xFF800000> : vector<2xf32>
    %636 = vector.multi_reduction <maximumf>, %635, %cst_121 [1] : vector<2x16xf32> to vector<2xf32>
    %637 = vector.shape_cast %636 : vector<2xf32> to vector<2x1xf32>
    %638 = vector.broadcast %637 : vector<2x1xf32> to vector<2x16xf32>
    %639 = arith.subf %635, %638 : vector<2x16xf32>
    %640 = math.exp %639 : vector<2x16xf32>
    %cst_122 = arith.constant dense<0.000000e+00> : vector<2xf32>
    %641 = vector.multi_reduction <add>, %640, %cst_122 [1] : vector<2x16xf32> to vector<2xf32>
    %642 = vector.shape_cast %641 : vector<2xf32> to vector<2x1xf32>
    %643 = tpu.reciprocal %642 {approx = true} : vector<2x1xf32> -> vector<2x1xf32>
    %644 = arith.mulf %642, %643 : vector<2x1xf32>
    %cst_123 = arith.constant 2.000000e+00 : f32
    %645 = vector.broadcast %cst_123 : f32 to vector<2x1xf32>
    %646 = arith.subf %645, %644 : vector<2x1xf32>
    %647 = arith.mulf %643, %646 : vector<2x1xf32>
    %648 = vector.broadcast %647 : vector<2x1xf32> to vector<2x16xf32>
    %649 = arith.mulf %640, %648 : vector<2x16xf32>
    %650 = arith.minimumf %649, %542 : vector<2x16xf32>
    %651 = arith.addf %541, %650 : vector<2x16xf32>
    %652 = vector.broadcast %637 : vector<2x1xf32> to vector<2x16xf32>
    %653 = arith.subf %635, %652 : vector<2x16xf32>
    %654 = math.log %642 : vector<2x1xf32>
    %655 = vector.broadcast %654 : vector<2x1xf32> to vector<2x16xf32>
    %656 = arith.subf %653, %655 : vector<2x16xf32>
    %c0_124 = arith.constant 0 : index
    %c5 = arith.constant 5 : index
    %c0_125 = arith.constant 0 : index
    %657 = vector.load %arg1[%c0_124, %c5, %c0_125] : memref<2x6x16xf32, #tpu.memory_space<vmem>>, vector<2x1x16xf32>
    %658 = vector.shape_cast %657 : vector<2x1x16xf32> to vector<2x16xf32>
    %659 = arith.addf %656, %658 : vector<2x16xf32>
    %cst_126 = arith.constant 1.000000e+00 : f32
    %660 = vector.broadcast %cst_126 : f32 to vector<2x16xf32>
    %661 = arith.divf %659, %660 : vector<2x16xf32>
    %cst_127 = arith.constant dense<0xFF800000> : vector<2xf32>
    %662 = vector.multi_reduction <maximumf>, %661, %cst_127 [1] : vector<2x16xf32> to vector<2xf32>
    %663 = vector.shape_cast %662 : vector<2xf32> to vector<2x1xf32>
    %664 = vector.broadcast %663 : vector<2x1xf32> to vector<2x16xf32>
    %665 = arith.cmpf oeq, %661, %664 : vector<2x16xf32>
    %c16_i32_128 = arith.constant 16 : i32
    %666 = vector.broadcast %c16_i32_128 : i32 to vector<2x16xi32>
    %667 = arith.select %665, %20, %666 : vector<2x16xi1>, vector<2x16xi32>
    %cst_129 = arith.constant dense<2147483647> : vector<2xi32>
    %668 = vector.multi_reduction <minsi>, %667, %cst_129 [1] : vector<2x16xi32> to vector<2xi32>
    %669 = vector.shape_cast %668 : vector<2xi32> to vector<2x1xi32>
    %670 = vector.broadcast %669 : vector<2x1xi32> to vector<2x128xi32>
    %671 = arith.cmpi eq, %21, %670 : vector<2x128xi32>
    %672 = arith.extui %671 : vector<2x128xi1> to vector<2x128xi32>
    %673 = arith.sitofp %672 : vector<2x128xi32> to vector<2x128xf32>
    %c5_i32 = arith.constant 5 : i32
    %674 = vector.broadcast %c5_i32 : i32 to vector<2x5xi32>
    %675 = arith.cmpi slt, %22, %674 : vector<2x5xi32>
    %676 = arith.extui %675 : vector<2x5xi1> to vector<2x5xi32>
    %677 = arith.sitofp %676 : vector<2x5xi32> to vector<2x5xf32>
    %678 = arith.mulf %620, %677 : vector<2x5xf32>
    %cst_130 = arith.constant 0.000000e+00 : f32
    %679 = vector.broadcast %cst_130 : f32 to vector<4x128xf32>
    %680 = tpu.concatenate %128, %238, %348, %458, %568, %673, %679 in 0 : vector<2x128xf32>, vector<2x128xf32>, vector<2x128xf32>, vector<2x128xf32>, vector<2x128xf32>, vector<2x128xf32>, vector<4x128xf32> -> vector<16x128xf32>
    %c0_131 = arith.constant 0 : index
    %c0_132 = arith.constant 0 : index
    %c0_133 = arith.constant 0 : index
    %681 = vector.load %arg11[%c0_131, %c0_132, %c0_133] : memref<1x16x128xf32, #tpu.memory_space<vmem>>, vector<1x16x128xf32>
    %682 = vector.shape_cast %681 : vector<1x16x128xf32> to vector<16x128xf32>
    %683 = vector.shape_cast %680 : vector<16x128xf32> to vector<1x16x128xf32>
    tpu.vector_store %arg11[%c0_131, %c0_132, %c0_133], %683 {strides = array<i32>} : memref<1x16x128xf32, #tpu.memory_space<vmem>>, vector<1x16x128xf32>,
    %cst_134 = arith.constant 0.000000e+00 : f32
    %684 = vector.broadcast %cst_134 : f32 to vector<4x5xf32>
    %685 = tpu.concatenate %138, %248, %358, %468, %578, %678, %684 in 0 : vector<2x5xf32>, vector<2x5xf32>, vector<2x5xf32>, vector<2x5xf32>, vector<2x5xf32>, vector<2x5xf32>, vector<4x5xf32> -> vector<16x5xf32>
    %cst_135 = arith.constant 0.000000e+00 : f32
    %686 = vector.broadcast %cst_135 : f32 to vector<16x123xf32>
    %687 = tpu.concatenate %685, %686 in 1 : vector<16x5xf32>, vector<16x123xf32> -> vector<16x128xf32>
    %c0_136 = arith.constant 0 : index
    %c0_137 = arith.constant 0 : index
    %c0_138 = arith.constant 0 : index
    %688 = vector.load %arg12[%c0_136, %c0_137, %c0_138] : memref<1x16x128xf32, #tpu.memory_space<vmem>>, vector<1x16x128xf32>
    %689 = vector.shape_cast %688 : vector<1x16x128xf32> to vector<16x128xf32>
    %690 = vector.shape_cast %687 : vector<16x128xf32> to vector<1x16x128xf32>
    tpu.vector_store %arg12[%c0_136, %c0_137, %c0_138], %690 {strides = array<i32>} : memref<1x16x128xf32, #tpu.memory_space<vmem>>, vector<1x16x128xf32>,
    %691 = vector.shape_cast %651 : vector<2x16xf32> to vector<1x2x16xf32>
    %cst_139 = arith.constant dense<0.000000e+00> : vector<1xf32>
    %692 = vector.multi_reduction <add>, %691, %cst_139 [1, 2] : vector<1x2x16xf32> to vector<1xf32>
    %693 = vector.shape_cast %692 : vector<1xf32> to vector<1x1x1xf32>
    %694 = vector.extract %693[0, 0, 0] : f32 from vector<1x1x1xf32>
    %695 = vector.broadcast %694 : f32 to vector<1x1xf32>
    %c0_140 = arith.constant 0 : index
    %c0_141 = arith.constant 0 : index
    %c0_142 = arith.constant 0 : index
    %696 = vector.load %arg13[%c0_140, %c0_141, %c0_142] : memref<1x1x1xf32, #tpu.memory_space<vmem>>, vector<1x1x1xf32>
    %697 = vector.shape_cast %696 : vector<1x1x1xf32> to vector<1x1xf32>
    %698 = vector.shape_cast %695 : vector<1x1xf32> to vector<1x1x1xf32>
    tpu.vector_store %arg13[%c0_140, %c0_141, %c0_142], %698 {strides = array<i32>} : memref<1x1x1xf32, #tpu.memory_space<vmem>>, vector<1x1x1xf32>,
    return
  }
  func.func @transform_0(%arg0: i32) -> (i32, i32, i32) {
    %c0_i32 = arith.constant 0 : i32
    %c0_i32_0 = arith.constant 0 : i32
    %c0_i32_1 = arith.constant 0 : i32
    return %arg0, %c0_i32, %c0_i32_0 : i32, i32, i32
  }
  func.func @transform_1(%arg0: i32) -> (i32, i32, i32) {
    %c0_i32 = arith.constant 0 : i32
    %c0_i32_0 = arith.constant 0 : i32
    %c0_i32_1 = arith.constant 0 : i32
    return %arg0, %c0_i32, %c0_i32_0 : i32, i32, i32
  }
  func.func @transform_2(%arg0: i32) -> (i32, i32, i32) {
    %c0_i32 = arith.constant 0 : i32
    %c0_i32_0 = arith.constant 0 : i32
    %c0_i32_1 = arith.constant 0 : i32
    return %arg0, %c0_i32, %c0_i32_0 : i32, i32, i32
  }
  func.func @transform_3(%arg0: i32) -> (i32, i32, i32) {
    %c0_i32 = arith.constant 0 : i32
    %c0_i32_0 = arith.constant 0 : i32
    %c0_i32_1 = arith.constant 0 : i32
    return %arg0, %c0_i32, %c0_i32_0 : i32, i32, i32
  }
  func.func @transform_4(%arg0: i32) -> (i32, i32) {
    %c0_i32 = arith.constant 0 : i32
    %c0_i32_0 = arith.constant 0 : i32
    %c0_i32_1 = arith.constant 0 : i32
    return %c0_i32, %c0_i32_0 : i32, i32
  }
  func.func @transform_5(%arg0: i32) -> (i32, i32) {
    %c0_i32 = arith.constant 0 : i32
    %c0_i32_0 = arith.constant 0 : i32
    %c0_i32_1 = arith.constant 0 : i32
    return %c0_i32, %c0_i32_0 : i32, i32
  }
  func.func @transform_6(%arg0: i32) -> (i32, i32) {
    %c0_i32 = arith.constant 0 : i32
    %c0_i32_0 = arith.constant 0 : i32
    %c0_i32_1 = arith.constant 0 : i32
    return %c0_i32, %c0_i32_0 : i32, i32
  }
  func.func @transform_7(%arg0: i32) -> (i32, i32) {
    %c0_i32 = arith.constant 0 : i32
    %c0_i32_0 = arith.constant 0 : i32
    %c0_i32_1 = arith.constant 0 : i32
    return %c0_i32, %c0_i32_0 : i32, i32
  }
  func.func @transform_8(%arg0: i32) -> (i32, i32) {
    %c0_i32 = arith.constant 0 : i32
    %c0_i32_0 = arith.constant 0 : i32
    %c0_i32_1 = arith.constant 0 : i32
    return %c0_i32, %c0_i32_0 : i32, i32
  }
  func.func @transform_9(%arg0: i32) -> (i32, i32) {
    %c0_i32 = arith.constant 0 : i32
    %c0_i32_0 = arith.constant 0 : i32
    %c0_i32_1 = arith.constant 0 : i32
    return %c0_i32, %c0_i32_0 : i32, i32
  }
  func.func @transform_10(%arg0: i32) -> (i32, i32, i32) {
    %c0_i32 = arith.constant 0 : i32
    %c0_i32_0 = arith.constant 0 : i32
    %c0_i32_1 = arith.constant 0 : i32
    return %arg0, %c0_i32, %c0_i32_0 : i32, i32, i32
  }
  func.func @transform_11(%arg0: i32) -> (i32, i32, i32) {
    %c0_i32 = arith.constant 0 : i32
    %c0_i32_0 = arith.constant 0 : i32
    %c0_i32_1 = arith.constant 0 : i32
    return %arg0, %c0_i32, %c0_i32_0 : i32, i32, i32
  }
  func.func @transform_12(%arg0: i32) -> (i32, i32, i32) {
    %c0_i32 = arith.constant 0 : i32
    %c0_i32_0 = arith.constant 0 : i32
    %c0_i32_1 = arith.constant 0 : i32
    return %arg0, %c0_i32, %c0_i32_0 : i32, i32, i32
  }
}

</mosaic_0001>

<bundles_post_ra>
// kernel: tpu_custom_call.1
= control target key start
LH: loop header
LB: loop body
LE: loop exit
PB: predicated region body
PF: predicated region fallthrough
CT: control target
= control target key end

     0   :  { %s6819_s0 = inlined_call_operand.vmem [shape: f32[4,6,16], index: 0, kind: input, shape index: {}]   ;;  %s6820_s1 = inlined_call_operand.vmem [shape: bf16[4,16,32], index: 1, kind: input, shape index: {}]   ;;  %s6821_s2 = inlined_call_operand.vmem [shape: f32[4,1,16], index: 2, kind: input, shape index: {}]   ;;  %s6822_s3 = inlined_call_operand.hbm [shape: f32[4,1,32], index: 3, kind: input, shape index: {}]   ;;  %s6823_s4 = inlined_call_operand.vmem [shape: bf16[69,192], index: 4, kind: input, shape index: {}]   ;;  %s6824_s5 = inlined_call_operand.vmem [shape: f32[1,192], index: 5, kind: input, shape index: {}]   ;;  %s6825_s6 = inlined_call_operand.vmem [shape: bf16[32,16], index: 6, kind: input, shape index: {}]   ;;  %s6826_s7 = inlined_call_operand.vmem [shape: bf16[32,21], index: 7, kind: input, shape index: {}]   ;;  %s6827_s8 = inlined_call_operand.vmem [shape: f32[1,21], index: 8, kind: input, shape index: {}]   ;;  %s6828_s9 = inlined_call_operand.vmem [shape: f32[2,16], index: 9, kind: input, shape index: {}]   ;;  %s6829_s10 = inlined_call_operand.hbm [shape: f32[2,16,128], index: 10, kind: output, shape index: {0}]   ;;  %s6830_s11 = inlined_call_operand.hbm [shape: f32[2,16,128], index: 11, kind: output, shape index: {1}]   ;;  %s6831_s12 = inlined_call_operand.vmem [shape: f32[2,1,1], index: 12, kind: output, shape index: {2}]  }
   0x1   :  { %6885 = sst [smem:[#allocation35_spill]] %s6819_s0 }
   0x2   :  { %6886 = sst [smem:[#allocation36_spill]] %s6820_s1 }
   0x3   :  { %6887 = sst [smem:[#allocation37_spill]] %s6821_s2 }
   0x4   :  { %18 = vsyncpa [#allocation3], 0 }
   0x5   :  { %20 = vsyncpa [#allocation3 + $0x1], 0 }
   0x6   :  { %21 = vsyncpa [#allocation4], 0 }
   0x7   :  { %23 = vsyncpa [#allocation4 + $0x1], 0 }
   0x8   :  { %24 = vsyncpa [#allocation7], 0 }
   0x9   :  { %26 = vsyncpa [#allocation7 + $0x1], 0  ;;  %s5220_s21 = smov 0   ;;  %s5222_s22 = smov 0  }
   0xa   :  { %s5224_s23 = smov 0   ;;  %s5226_s24 = smov 0  }
   0xb LB: > { %6888 = sst [smem:[#allocation11_spill]] %s5129_s23  ;;  %s5241_s25 = sadd.s32 4294967295, %s5133_s24   ;;  %s5133_s24 = sphi %s5226_s24, %s6956_s24   ;;  %s5129_s23 = sphi %s5224_s23, %s6958_s23   ;;  %s5125_s22 = sphi %s5222_s22, %s6960_s22   ;;  %s5121_s21 = sphi %s5220_s21, %s6959_s21  }
   0xc   : > { %s4502_s26 = sadd.s32 4294967294, %s5133_s24   ;;  %s5245_s27 = sadd.s32 1, %s5133_s24  }
   0xd   : > { %6889 = sst [smem:[#allocation12_spill]] %s5245_s27  ;;  %s117_s28 = sadd.s32 1, %s5129_s23 }
   0xe   : > { %s114_s29 = ssub.s32 %s5133_s24, %s5245_s27  ;;  %p124_p0 = scmp.ne.s32.totalorder %s5129_s23, %s5125_s22 }
   0xf   : > { %p115_p1 = scmp.eq.s32.totalorder %s114_s29, 0  ;;  %p125_p2 = scmp.eq.s32.totalorder %s5133_s24, 0 }
  0x10   : > { %p130_p3 = scmp.ne.s32.totalorder %s5125_s22, %s5121_s21  ;;  %p131_p4 = scmp.eq.s32.totalorder %s5241_s25, 0 }
  0x11   : > { %s5257_s30 = scalar_select %p115_p1, %s5129_s23, %s117_s28  }
  0x12   : > { %p5259_p5 = por %p125_p2, %p124_p0  ;;  %p5263_p6 = por %p131_p4, %p130_p3 }
  0x13   : > { %6890 = sst [smem:[#allocation13_spill]] %s5257_s30  ;;  %p280_p7 = scmp.eq.s32.totalorder %s5241_s25, 1 }
  0x14   : > { %p286_p8 = scmp.eq.s32.totalorder %s4502_s26, 1  ;;  %p4701_p10 = scmp.lt.s32.totalorder %s5133_s24, 2 }
  0x15   : > { %p5270_p11 = por %p280_p7, %p124_p0  ;;  %s403_s17 = sand.u32 1, %s5129_s23  }
  0x16   : > { %p5274_p12 = por %p286_p8, %p130_p3  ;;  %s4600_s18 = sshll.u32 %s5133_s24, 5 }
  0x17   : > { %s6893_s15 = scalar_select %p5270_p11, 1, 0 }
  0x18   : > { %s6894_s16 = scalar_select %p5274_p12, 1, 0 }
  0x19   : > { %s4505_s19 = sshll.u32 %s403_s17, 1  ;;  %s5283_s29 = scalar_lea.hbm %s6822_s3, %s4600_s18 }
  0x1a   : > { %s407_s26 = scalar_lea.vmem [#allocation2], %s4505_s19  ;;  %p5287_p13 = pnand %p4701_p10, %p5259_p5 }
  0x1b   : > { %s414_s30 = sshll.u32 %s407_s26, 4  ;;  %s5293_s23 = scalar_lea.sflag [#allocation3], %s403_s17  ;;  %s5291_s30 = int_to_ptr.vmem [resolvable:$true] %s414_s30 }
  0x1c   : > { %s5005_s20 = scalar_lea.hbm %s5283_s29, 32  ;;  %p5007_p1 = pneg %p5287_p13 }
  0x1d   : > { %p5006_p0 = scmp.ne.s32.totalorder %s5283_s29, %s5005_s20  ;;  %s5010_s19 = scalar_lea.hbm %s6822_s3, 64 }
  0x1e   : > { %p5011_p4 = scmp.lt.u32.totalorder %s5283_s29, %s6822_s3  ;;  %p5012_p5 = scmp.lt.u32.totalorder %s5010_s19, %s5005_s20 }
  0x1f   : > { %p5008_p2 = pnand %p5007_p1, %p5006_p0  ;;  %p5014_p8 = scmp.lt.u32.totalorder %s5005_s20, %s5283_s29 }
  0x20   : > { %p5013_p7 = por %p5012_p5, %p5011_p4 }
  0x21   : > { %p5009_p3 = pneg %p5008_p2 }
  0x22   : > { %p5015_p10 = por %p5014_p8, %p5013_p7 }
  0x24   : > { %p5016_p9 = pnand %p5015_p10, %p5009_p3 }
  0x26   : > { %5019 = shalt.err (!%p5016_p9)
}
  0x27   : > { %s5020_s17 = scalar_lea.vmem %s5291_s30, 32  ;;  %s5135_s18 = smov [#allocation2]  }
  0x28   : > { %p5021_p0 = scmp.ne.s32.totalorder %s5291_s30, %s5020_s17  ;;  %s5025_s13 = sshll.u32 %s5135_s18, 4  ;;  %s5026_s13 = int_to_ptr.vmem [resolvable:$false] %s5025_s13 }
  0x29   : > { %s5027_s28 = scalar_lea.vmem %s5026_s13, 64  ;;  %p5028_p11 = scmp.lt.s32.totalorder %s5291_s30, %s5026_s13 }
  0x2a   : > { %p5023_p2 = pnand %p5021_p0, %p5007_p1  ;;  %p5029_p4 = scmp.lt.s32.totalorder %s5027_s28, %s5020_s17 }
  0x2c   : > { %p5024_p12 = pneg %p5023_p2  ;;  %p5030_p5 = por %p5029_p4, %p5028_p11 }
  0x2e   : > { %p5031_p7 = pnand %p5030_p5, %p5024_p12 }
  0x30   : > { %5034 = shalt.err (!%p5031_p7)
}
  0x31   : > { %s5136_s20 = smov 16   ;;  %s5137_s19 = smov 1  }
  0x32   : > { %4693 = dma.hbm_to_vmem [thread:$0]  (!%p5287_p13), %s5283_s29, 32, %s5291_s30, %s5293_s23, %s5136_s20, %s5136_s20, %s5137_s19  }
  0x33   : > { %p4508_p9 = scmp.ge.s32.totalorder %s5133_s24, 1  ;;  %p422_p1 = scmp.lt.s32.totalorder %s5133_s24, 3 }
  0x35   : > { %p423_p3 = pnand %p4508_p9, %p422_p1 }
  0x37   : > { %426 = sbr.rel (%p423_p3) target bundleno = 15588 (0x3ce4), region = 60 }
  0x3e   : > { %s5324_s26 = sand.u32 1, %s5125_s22  }
  0x3f   : > { %s4509_s17 = sshll.u32 %s5324_s26, 1  ;;  %s429_s18 = scalar_lea.sflag [#allocation3], %s5324_s26 }
  0x40   : > { %s432_s13 = scalar_lea.vmem [#allocation2], %s4509_s17 }
  0x41   : > { %5108 = dma.done.wait (%p5263_p6), %s429_s18, 32  }
  0x42   : > { %5110 = vsyncadd (%p5263_p6), %s429_s18, 4294967264  ;;  %v628_v0 = vlaneseq  ;;  %v5138_v1 = vmov 1966171168   ;;  %v6836_v5 = vmov 0   ;;  %v630_v7 = vld [vmem:[%s432_s13] sm:$0x1] }
  0x43   : > { %v636_v2 = vunpack.c.l.s4 %v5138_v1  ;;  %757 = vmatprep.mubr.bf16.mxu1 %v6836_v5  ;;  %4752 = vset.pattern.permute.xlu0 %v6836_v5  ;;  %v631_v8 = vld [vmem:[%s432_s13 + $0x1] sm:$0x1]  ;;  %v5344_v10 = vld [vmem:[%s6823_s4 + $0x4] ss:$8 sps:$4 sm:$0xff]   ;;  %v5354_v12 = vld [vmem:[%s6823_s4 + $0x14] ss:$8 sps:$4 sm:$0xff]  }
  0x44   : > { %v5333_v3 = vshrl.u32 %v628_v0, 7  ;;  %4753 = vset.pattern.permute.xlu1 %v6836_v5  ;;  %v634_v9 = vcombine.low %v630_v7, %v631_v8  ;;  %v5349_v11 = vld [vmem:[%s6823_s4] ss:$8 sps:$4 sm:$0xff]   ;;  %vm715_vm0 = vcmask 1041408   ;;  %725 = vmatprep.subr.bf16.mxu1 %v5344_v10  ;;  %v5362_v14 = vld [vmem:[%s6823_s4 + $0x10] ss:$8 sps:$4 sm:$0xff]  }
  0x45   : > { %v637_v4 = vunpack.c.0.s8 %v636_v2  ;;  %726 = vmatpush1.bf16.msra.mxu1 %v5349_v11  ;;  %v5369_v16 = vld [vmem:[%s6823_s4 + $0x24] ss:$8 sps:$4 sm:$0xff]   ;;  %vm716_vm1 = vcmask 1042432   ;;  %v5140_v17 = vmov 65535   ;;  %v5375_v19 = vld [vmem:[%s6823_s4 + $0x20] ss:$8 sps:$4 sm:$0xff]  }
  0x46   : > { %727 = vmatprep.subr.bf16.mxu1 %v5354_v12  ;;  %v717_v18 = vsel %vm715_vm0, 4294967295, %v5140_v17  ;;  %v531_v20 = vld [vmem:[%s6823_s4 + $0x40] sm:$0x77]  ;;  %s5141_s14 = smov 37   ;;  %v5385_v21 = vld [vmem:[%s6823_s4 + $0x34] ss:$8 sps:$4 sm:$0xff]  }
  0x47   : > { %v5339_v6 = vsub.s32 %v637_v4, %v5333_v3  ;;  %v4533_v22 = vcombine.high %v531_v20, %v531_v20  ;;  %v718_v23 = vsel %vm716_vm1, %v717_v18, 0  ;;  %v5391_v24 = vld [vmem:[%s6823_s4 + $0x30] ss:$8 sps:$4 sm:$0xff]   ;;  %v4532_v25 = vcombine.low %v531_v20, %v531_v20  ;;  %v532_v33 = vld [vmem:[%s6824_s5] sm:$0x3]  ;;  %s6881_s13 = smov 32  }
  0x48   : > { %vm652_vm2 = vcmask 302080   ;;  %vm711_vm3 = vcmask 564224   ;;  %v5404_v31 = vsub.s32 0, %v5333_v3  ;;  %v5407_v32 = vsub.s32 1, %v5333_v3  ;;  %s6879_s23 = smov 96   ;;  %s6843_s27 = smov 64  }
  0x49   : > { %6896 = vst [vmem:[#allocation14_spill] sm:$0xff] %v5339_v6  ;;  %v641_v13 = vrot.slane %v634_v9, %v5339_v6  ;;  %728 = vmatpush1.bf16.msra.mxu1 %v5362_v14  ;;  %v5394_v26 = vand.u32 %v4533_v22, %v718_v23  ;;  %v5397_v27 = vand.u32 %v4532_v25, %v718_v23  ;;  %v4768_v52 = vld [vmem:[%s6825_s6] sm:$0xff]   ;;  %v4769_v53 = vld [vmem:[%s6825_s6 + $0x8] sm:$0xff]   ;;  %s4512_s20 = sshll.u32 %s5241_s25, 1  ;;  %v6838_v55 = vmov 0.0   ;;  %s6899_s1 = sld [smem:[#allocation36_spill]] }
  0x4a   : > { %729 = vmatprep.subr.bf16.mxu1 %v5369_v16  ;;  %v5413_v34 = vrot.slane %v532_v33, %v5404_v31  ;;  %v5416_v35 = vrot.slane %v532_v33, %v5407_v32  ;;  %v5435_v54 = vld [vmem:[%s6826_s7] sm:$0xff]   ;;  %p497_p6 = scmp.lt.s32.totalorder %s4512_s20, 3  ;;  %4626 = vmatprep.subr.bf16.mxu0 %v4768_v52  ;;  %v5445_v56 = vld [vmem:[%s6826_s7 + $0x8] sm:$0xff]   ;;  %vm572_vm4 = vcmask 261120   ;;  %vm5146_vm5 = vmmov 0   ;;  %s6900_s2 = sld [smem:[#allocation37_spill]] }
  0x4b   : > { %v648_v15 = vrot.slane %v641_v13, %v5339_v6  ;;  %6897 = vst [vmem:[#allocation15_spill] sm:$0xff] %v5394_v26  ;;  %6898 = vst [vmem:[#allocation16_spill] sm:$0xff] %v5397_v27  ;;  %4627 = vmatpush3.bf16.msra.mxu0 %v4768_v52  ;;  %v5147_v18 = vmov -1e+30   ;;  %vm938_vm7 = vcmask 130048   ;;  %vm1008_vm9 = vcmask 130112  }
  0x4c   : > { %s6962_s20 = smov (!%p497_p6, %s4512_s20), 3  ;;  %4628 = vmatprep.subr.bf16.mxu0 %v4769_v53  ;;  %vm1019_vm10 = vcmask 1041409   ;;  %vm1022_vm11 = vcmask 123904   ;;  %s6909_s0 = sld [smem:[#allocation35_spill]] }
  0x4d   : > { %649 = vrot.lane.b32.xlu0 %v648_v15, %s5141_s14  ;;  %730 = vmatpush1.bf16.msra.mxu1 %v5375_v19  ;;  %s4513_s14 = sshll.u32 %s6962_s20, 3  ;;  %s6878_s17 = sshll.u32 %s5324_s26, 4 }
  0x4e   : > { %731 = vmatprep.subr.bf16.mxu1 %v5385_v21  ;;  %s6322_s18 = scalar_lea.vmem [#allocation5], %s6878_s17  ;;  %s6948_s17 = smov 16  }
  0x4f   : > { %s507_s19 = scalar_lea.vmem %s6899_s1, %s4513_s14  ;;  %4629 = vmatpush3.bf16.msra.mxu0 %v4769_v53  ;;  %s6950_s29 = smov 96  }
  0x50   : > { %v5455_v58 = vld [vmem:[%s507_s19] sm:$0xff]   ;;  %v5457_v59 = vld [vmem:[%s507_s19 + $0x8] sm:$0xff]   ;;  %4634 = vmatprep.subr.bf16.mxu0 %v6838_v55  ;;  %s5477_s30 = scalar_lea.vmem %s6900_s2, %s6962_s20  ;;  %s6883_s20 = smov 16  }
  0x51   : > { %732 = vmatpush1.bf16.msra.mxu1 %v5391_v24  ;;  %4630 = vmatprep.mubr.msk.bf16.mxu0 %vm572_vm4, %v5455_v58  ;;  %v540_v7 = vld [vmem:[%s5477_s30] sm:$0x1]  ;;  %p515_p11 = scmp.lt.s32.totalorder %s5241_s25, 1  ;;  %p6953_p13 = scmp.ne.s32.totalorder %s6893_s15, 0 }
  0x52   : > { %733 = vmatprep.subr.bf16.mxu1 %v5394_v26  ;;  %4631 = vmatmul.mubr.msk.bf16.vlgmr.msra.gmra.mrb[0].mxu0 %vm572_vm4, %v5457_v59  ;;  %vm542_vm6 = vcmp.gt.f32.partialorder %v540_v7, 0.5  ;;  %s5601_s19 = scalar_lea.vmem %s6909_s0, %s4513_s14  ;;  %s6841_s14 = smov 5  }
  0x53   : > { %4635 = vmatpush3.bf16.msra.mxu0 %v5435_v54  ;;  %4638 = vmatprep.mubr.msk.bf16.mxu0 %vm5146_vm5, %v6838_v55  ;;  %v544_v20 = vsel %vm542_vm6, 0.0, %v5147_v18  ;;  %s516_s28 = scalar_select %p515_p11, %s5241_s25, 1 }
  0x54   : > { %4636 = vmatprep.subr.bf16.mxu0 %v6838_v55  ;;  %v5487_v23 = vrot.slane %v544_v20, %v5404_v31 }
  0x55   : > { %734 = vmatpush1.bf16.msra.mxu1 %v5397_v27  ;;  %s517_s1 = scalar_lea.vmem %s6831_s12, %s516_s28  ;;  %s5151_s28 = smov [#allocation6]  }
  0x56   : > { %4642 = vmatprep.subr.bf16.mxu1 %v6838_v55  ;;  %s5039_s0 = sshll.u32 %s5151_s28, 4  ;;  %s5040_s0 = int_to_ptr.vmem [resolvable:$false] %s5039_s0 }
  0x57   : > { %4637 = vmatpush3.bf16.msra.mxu0 %v5445_v56 }
  0x58   : > { %1358 = vmatprep.subr.bf16.mxu0 %v5344_v10 }
  0xbf   : > { %v650_v28 = vpop.permute.xlu0 %649 }
  0xc0   : > { %v653_v29 = vsel %vm652_vm2, 0.0, %v650_v28 }
  0xc1   : > { %v654_v30 = vpack.c.bf16 %v653_v29, %v653_v29 }
  0xc3   : > { %4534 = vmatmul.mubr.msk.bf16.vlgmr.msra.gmra.mrb[0].mxu1 %vm711_vm3, %v654_v30 }
  0xc4   : > { %4643 = vmatpush3.bf16.msra.mxu1 %v5435_v54  ;;  %4646 = vmatprep.mubr.msk.bf16.mxu1 %vm5146_vm5, %v6838_v55 }
  0xc5   : > { %4644 = vmatprep.subr.bf16.mxu1 %v6838_v55 }
  0xc8   : > { %4645 = vmatpush3.bf16.msra.mxu1 %v5445_v56 }
  0xc9   : > { %1941 = vmatprep.subr.bf16.mxu1 %v5344_v10 }
 0x125   : > { %v5490_v25 = vpop.f32.mrb[0].mxu0 }
 0x126   : > { %6901 = vst [vmem:[#allocation17_spill] sm:$0xff] %v5490_v25  ;;  %v5492_v28 = vpop.f32.mrb[1].mxu0 }
 0x127   : > { %6902 = vst [vmem:[#allocation18_spill] sm:$0xff] %v5492_v28  ;;  %v5494_v29 = vpop.f32.mrb[2].mxu0 }
 0x128   : > { %6903 = vst [vmem:[#allocation19_spill] sm:$0xff] %v5494_v29  ;;  %v5496_v30 = vpop.f32.mrb[3].mxu0 }
 0x129   : > { %6904 = vst [vmem:[#allocation20_spill] sm:$0xff] %v5496_v30 }
 0x196   : > { %v759_v36 = vpop.f32.mrb[0].mxu1 }
 0x197   : > { %v760_v37 = vadd.f32 %v759_v36, %v5413_v34  ;;  %v761_v38 = vpop.f32.mrb[1].mxu1  ;;  %v5513_v36 = vld [vmem:[%s6827_s8] ss:$0 sm:$0xff] }
 0x198   : > { %v762_v39 = vadd.f32 %v761_v38, %v5416_v35  ;;  %v763_v40 = vpop.f32.mrb[2].mxu1 }
 0x199   : > { %v764_v41 = vpop.f32.mrb[3].mxu1  ;;  %767 = vrot.lane.b32.xlu0 %v760_v37, %s6881_s13 }
 0x19a   : > { %788 = vrot.lane.b32.xlu1 %v762_v39, %s6879_s23 }
 0x19d   : > { %778 = vrot.lane.b32.xlu0 %v762_v39, %s6881_s13 }
 0x1a1   : > { %804 = vrot.lane.b32.xlu0 %v648_v15, %s6881_s13 }
 0x20b   : > { %v768_v42 = vpop.permute.xlu0 %767 }
 0x20c   : > { %v770_v43 = vadd.f32 %v768_v42, %v760_v37  ;;  %v789_v48 = vpop.permute.xlu1 %788 }
 0x20e   : > { %v4535_v44 = vmul.f32 -1.442695, %v770_v43  ;;  %v5523_v43 = vld [vmem:[%s6828_s9] ss:$0 sm:$0xff] }
 0x20f   : > { %v779_v60 = vpop.permute.xlu0 %778 }
 0x210   : > { %4776 = vpow2.f32 %v4535_v44  ;;  %v781_v61 = vadd.f32 %v779_v60, %v760_v37 }
 0x212   : > { %v4536_v62 = vmul.f32 -1.442695, %v781_v61 }
 0x213   : > { %v805_v4 = vpop.permute.xlu0 %804 }
 0x21a   : > { %v4777_v45 = vpop.eup %4776 }
 0x21b   : > { %v774_v46 = vadd.f32 1.0, %v4777_v45 }
 0x21d   : > { %4778 = vrcp.f32 %v774_v46 }
 0x227   : > { %v4779_v47 = vpop.eup %4778 }
 0x228   : > { %v791_v49 = vmul.f32 %v4779_v47, %v789_v48  ;;  %v921_v48 = vmul.f32 0.0, %v5523_v43 }
 0x22a   : > { %793 = vrot.lane.b32.xlu1 %v791_v49, %s6843_s27 }
 0x29c   : > { %v794_v50 = vpop.permute.xlu1 %793 }
 0x29d   : > { %v796_v51 = vadd.f32 %v794_v50, %v760_v37 }
 0x29f   : > { %4780 = vtanh.f32 %v796_v51 }
 0x2a0   : > { %4782 = vpow2.f32 %v4536_v62 }
 0x2a9   : > { %v4781_v57 = vpop.eup %4780 }
 0x2aa   : > { %800 = vrot.lane.b32.xlu1 %v4781_v57, %s6879_s23  ;;  %v4783_v63 = vpop.eup %4782 }
 0x2ab   : > { %v785_v1 = vadd.f32 1.0, %v4783_v63  ;;  %v5537_v63 = vld [vmem:[%s6828_s9 + $0x1] ss:$0 sm:$0xff] }
 0x2ad   : > { %4784 = vrcp.f32 %v785_v1 }
 0x2b7   : > { %v4785_v2 = vpop.eup %4784 }
 0x2b8   : > { %v798_v8 = vsub.f32 1.0, %v4785_v2  ;;  %v807_v13 = vmul.f32 %v4785_v2, %v805_v4 }
 0x31c   : > { %v801_v9 = vpop.permute.xlu1 %800 }
 0x31d   : > { %v803_v15 = vmul.f32 %v801_v9, %v798_v8 }
 0x31f   : > { %v5480_v17 = vadd.f32 %v807_v13, %v803_v15 }
 0x321   : > { %v809_v22 = vpack.c.bf16 %v5480_v17, %v5480_v17 }
 0x323   : > { %817 = vrot.lane.b32.xlu1 %v809_v22, %s6879_s23 }
 0x327   : > { %962 = vbcast.lane.b32.xlu1 %v5487_v23, 256 }
 0x395   : > { %v818_v33 = vpop.permute.xlu1 %817 }
 0x396   : > { %4639 = vmatmul.mubr.msk.bf16.vlgmr.msra.gmra.mrb[4].mxu0 %vm572_vm4, %v818_v33 }
 0x397   : > { %1359 = vmatpush1.bf16.msra.mxu0 %v5349_v11  ;;  %1390 = vmatprep.mubr.bf16.mxu0 %v6836_v5 }
 0x398   : > { %1360 = vmatprep.subr.bf16.mxu0 %v5354_v12 }
 0x39b   : > { %1361 = vmatpush1.bf16.msra.mxu0 %v5362_v14 }
 0x39c   : > { %1362 = vmatprep.subr.bf16.mxu0 %v5369_v16 }
 0x39f   : > { %1363 = vmatpush1.bf16.msra.mxu0 %v5375_v19 }
 0x3a0   : > { %1364 = vmatprep.subr.bf16.mxu0 %v5385_v21 }
 0x3a3   : > { %1365 = vmatpush1.bf16.msra.mxu0 %v5391_v24 }
 0x3a4   : > { %1366 = vmatprep.subr.bf16.mxu0 %v5394_v26 }
 0x3a7   : > { %1367 = vmatpush1.bf16.msra.mxu0 %v5397_v27 }
 0x3a8   : > { %4650 = vmatprep.subr.bf16.mxu0 %v6838_v55 }
 0x469   : > { %v868_v37 = vpop.f32.mrb[4].mxu0 }
 0x46a   : > { %v5516_v38 = vadd.f32 %v5513_v36, %v868_v37  ;;  %v4640_v39 = vpop.f32.mrb[5].mxu0  ;;  %v541_v37 = vld [vmem:[%s5477_s30 + $0x1] sm:$0x1] }
 0x46b   : > { %v871_v40 = vpop.f32.mrb[6].mxu0  ;;  %vm543_vm8 = vcmp.gt.f32.partialorder %v541_v37, 0.5 }
 0x46c   : > { %v887_v41 = vrot.slane %v5516_v38, %v5339_v6  ;;  %v4641_v42 = vpop.f32.mrb[7].mxu0  ;;  %v545_v40 = vsel %vm543_vm8, 0.0, %v5147_v18 }
 0x46d   : > { %v5551_v42 = vpop.permute.xlu1 %962 }
 0x46e   : > { %v888_v44 = vcombine.high %v887_v41, %v887_v41  ;;  %v895_v45 = vrot.slane %v887_v41, %v5339_v6  ;;  %v960_v41 = vrot.slane %v545_v40, %v5404_v31  ;;  %6905 = vst [vmem:[#allocation21_spill] sm:$0xff] %v5551_v42 }
 0x470   : > { %v902_v46 = vrot.slane %v888_v44, %v5339_v6  ;;  %v906_v47 = vrot.slane %v895_v45, %v5404_v31 }
 0x472   : > { %v910_v49 = vrot.slane %v902_v46, %v5404_v31  ;;  %v913_v50 = vadd.f32 %v906_v47, %v5492_v28  ;;  %v914_v51 = vadd.f32 %v906_v47, %v5496_v30 }
 0x474   : > { %v915_v52 = vadd.f32 %v5490_v25, %v910_v49  ;;  %v916_v53 = vadd.f32 %v5494_v29, %v910_v49  ;;  %v922_v57 = vadd.f32 %v921_v48, %v913_v50  ;;  %v923_v60 = vadd.f32 %v921_v48, %v914_v51 }
 0x476   : > { %v924_v61 = vadd.f32 %v921_v48, %v915_v52  ;;  %v925_v62 = vadd.f32 %v921_v48, %v916_v53  ;;  %4786 = vtanh.f32 %v922_v57  ;;  %v5564_v53 = vand.u32 127, %v628_v0 }
 0x477   : > { %4788 = vtanh.f32 %v923_v60 }
 0x478   : > { %4790 = vtanh.f32 %v924_v61  ;;  %v1003_v57 = vadd.s32 4294967288, %v5564_v53 }
 0x479   : > { %4792 = vtanh.f32 %v925_v62  ;;  %v5569_v62 = vsub.s32 %v5564_v53, %v5333_v3 }
 0x480   : > { %v4787_v1 = vpop.eup %4786 }
 0x481   : > { %v4789_v2 = vpop.eup %4788  ;;  %v934_v4 = vmul.f32 %v4787_v1, %v5537_v63  ;;  %v5572_v1 = vsub.s32 %v1003_v57, %v5333_v3 }
 0x482   : > { %v4791_v7 = vpop.eup %4790  ;;  %v935_v8 = vmul.f32 %v4789_v2, %v5537_v63 }
 0x483   : > { %v939_v9 = vsel %vm938_vm7, %v934_v4, 0.0  ;;  %v936_v13 = vmul.f32 %v4791_v7, %v5537_v63  ;;  %v4793_v15 = vpop.eup %4792 }
 0x484   : > { %v942_v20 = vsel %vm938_vm7, %v935_v8, 0.0  ;;  %940 = vadd.xlane.f32.xlu0 %v939_v9  ;;  %v937_v33 = vmul.f32 %v4793_v15, %v5537_v63 }
 0x485   : > { %943 = vadd.xlane.f32.xlu1 %v942_v20  ;;  %v945_v22 = vsel %vm938_vm7, %v936_v13, 0.0 }
 0x486   : > { %v948_v39 = vsel %vm938_vm7, %v937_v33, 0.0 }
 0x488   : > { %946 = vadd.xlane.f32.xlu0 %v945_v22 }
 0x48c   : > { %949 = vadd.xlane.f32.xlu0 %v948_v39 }
 0x496   : > { %969 = vbcast.lane.b32.xlu1 %v960_v41, 256 }
 0x49a   : > { %973 = vbcast.lane.b32.xlu1 %v960_v41, 264 }
 0x4a2   : > { %966 = vbcast.lane.b32.xlu0 %v5487_v23, 264 }
 0x511   : > { %v941_v44 = vpop.xlane.xlu0 %940 }
 0x512   : > { %v944_v45 = vpop.xlane.xlu1 %943  ;;  %v979_v46 = vadd.f32 %v5551_v42, %v941_v44 }
 0x514   : > { %988 = vperm.xlu0 %4752, %v979_v46  }
 0x515   : > { %v947_v47 = vpop.xlane.xlu0 %946 }
 0x516   : > { %v5554_v48 = vpop.permute.xlu1 %969 }
 0x517   : > { %6906 = vst [vmem:[#allocation22_spill] sm:$0xff] %v5554_v48  ;;  %v981_v52 = vadd.f32 %v5554_v48, %v947_v47 }
 0x519   : > { %v950_v49 = vpop.xlane.xlu0 %949 }
 0x51a   : > { %v5556_v50 = vpop.permute.xlu1 %973 }
 0x51b   : > { %6907 = vst [vmem:[#allocation23_spill] sm:$0xff] %v5556_v50  ;;  %v982_v18 = vadd.f32 %v5556_v50, %v950_v49 }
 0x51d   : > { %997 = vperm.xlu0 %4752, %v982_v18   ;;  %v5559_v51 = vpop.permute.xlu0 %966 }
 0x51e   : > { %6908 = vst [vmem:[#allocation24_spill] sm:$0xff] %v5559_v51  ;;  %v980_v23 = vadd.f32 %v5559_v51, %v944_v45 }
 0x520   : > { %991 = vperm.xlu1 %4753, %v980_v23  }
 0x524   : > { %994 = vperm.xlu1 %4753, %v981_v52  }
 0x593   : > { %v989_v60 = vpop.permute.xlu0 %988 }
 0x594   : > { %v1002_v8 = vrot.slane %v989_v60, %v5569_v62 }
 0x59c   : > { %v998_v2 = vpop.permute.xlu0 %997 }
 0x59d   : > { %v1017_v0 = vrot.slane %v998_v2, %v5572_v1 }
 0x59f   : > { %v992_v61 = vpop.permute.xlu1 %991 }
 0x5a0   : > { %v1007_v4 = vrot.slane %v992_v61, %v5572_v1 }
 0x5a2   : > { %v1009_v13 = vsel %vm1008_vm9, %v1007_v4, %v1002_v8 }
 0x5a3   : > { %v995_v7 = vpop.permute.xlu1 %994 }
 0x5a4   : > { %v1013_v9 = vrot.slane %v995_v7, %v5569_v62 }
 0x5a6   : > { %v1018_v15 = vsel %vm1008_vm9, %v1017_v0, %v1013_v9 }
 0x5a7   : > { %v1020_v3 = vsel %vm1019_vm10, %v1018_v15, %v1009_v13 }
 0x5a8   : > { %v1023_v20 = vsel %vm1022_vm11, %v1020_v3, -inf }
 0x5a9   : > { %1024 = vmax.xlane.f32.xlu1 %v1023_v20 }
 0x636   : > { %v1025_v22 = vpop.xlane.xlu1 %1024 }
 0x637   : > { %v1030_v33 = vrot.slane %v1025_v22, %v5404_v31  ;;  %v1034_v37 = vrot.slane %v1025_v22, %v5407_v32 }
 0x639   : > { %v1037_v39 = vsub.f32 %v979_v46, %v1030_v33  ;;  %v1038_v40 = vsub.f32 %v980_v23, %v1030_v33  ;;  %v1039_v44 = vsub.f32 %v981_v52, %v1034_v37  ;;  %v1040_v47 = vsub.f32 %v982_v18, %v1034_v37  ;;  %v4544_v18 = vld [vmem:[%s5601_s19] ss:$0 sm:$0xff]  ;;  %v4545_v52 = vld [vmem:[%s5601_s19 + $0x8] ss:$0 sm:$0xff] }
 0x63a   : > { %1145 = vbcast.lane.b32.xlu1 %v4544_v18, 256 }
 0x63b   : > { %v1041_v41 = vmul.f32 1.442695, %v1037_v39  ;;  %v1043_v45 = vmul.f32 1.442695, %v1038_v40  ;;  %v1045_v49 = vmul.f32 1.442695, %v1039_v44 }
 0x63c   : > { %v1047_v57 = vmul.f32 1.442695, %v1040_v47 }
 0x63d   : > { %4794 = vpow2.f32 %v1041_v41 }
 0x63e   : > { %4796 = vpow2.f32 %v1043_v45  ;;  %1156 = vbcast.lane.b32.xlu1 %v4545_v52, 256 }
 0x63f   : > { %4798 = vpow2.f32 %v1045_v49 }
 0x640   : > { %4800 = vpow2.f32 %v1047_v57 }
 0x642   : > { %1160 = vbcast.lane.b32.xlu1 %v4545_v52, 264 }
 0x647   : > { %v5584_v60 = vpop.eup %4794 }
 0x648   : > { %1054 = vperm.xlu0 %4752, %v5584_v60   ;;  %v5587_v61 = vpop.eup %4796 }
 0x649   : > { %v5590_v46 = vpop.eup %4798 }
 0x64a   : > { %v5593_v23 = vpop.eup %4800 }
 0x64c   : > { %1057 = vperm.xlu0 %4752, %v5587_v61  }
 0x650   : > { %1060 = vperm.xlu0 %4752, %v5590_v46  }
 0x654   : > { %1063 = vperm.xlu0 %4752, %v5593_v23  }
 0x6ac   : > { %v1146_v41 = vpop.permute.xlu1 %1145 }
 0x6b0   : > { %v1157_v45 = vpop.permute.xlu1 %1156 }
 0x6c7   : > { %v1055_v2 = vpop.permute.xlu0 %1054 }
 0x6c8   : > { %v1068_v9 = vrot.slane %v1055_v2, %v5569_v62 }
 0x6cb   : > { %v1058_v4 = vpop.permute.xlu0 %1057 }
 0x6cc   : > { %v1072_v8 = vrot.slane %v1058_v4, %v5572_v1  ;;  %v1161_v4 = vpop.permute.xlu1 %1160 }
 0x6ce   : > { %v1073_v3 = vsel %vm1008_vm9, %v1072_v8, %v1068_v9 }
 0x6cf   : > { %v1061_v7 = vpop.permute.xlu0 %1060 }
 0x6d0   : > { %v1077_v13 = vrot.slane %v1061_v7, %v5569_v62 }
 0x6d3   : > { %v1064_v0 = vpop.permute.xlu0 %1063 }
 0x6d4   : > { %v1081_v15 = vrot.slane %v1064_v0, %v5572_v1 }
 0x6d6   : > { %v1082_v20 = vsel %vm1008_vm9, %v1081_v15, %v1077_v13 }
 0x6d7   : > { %v1083_v22 = vsel %vm1019_vm10, %v1082_v20, %v1073_v3 }
 0x6d8   : > { %v1085_v33 = vsel %vm1022_vm11, %v1083_v22, 0.0 }
 0x6d9   : > { %1086 = vadd.xlane.f32.xlu0 %v1085_v33 }
 0x6ef   : > { %1149 = vbcast.lane.b32.xlu0 %v4544_v18, 264 }
 0x766   : > { %v5613_v37 = vpop.xlane.xlu0 %1086 }
 0x767   : > { %4802 = vlog2.f32 %v5613_v37 }
 0x76a   : > { %v1150_v15 = vpop.permute.xlu0 %1149 }
 0x771   : > { %v4803_v49 = vpop.eup %4802 }
 0x772   : > { %v1120_v57 = vmul.f32 0.6931472, %v4803_v49 }
 0x774   : > { %v1125_v52 = vrot.slane %v1120_v57, %v5404_v31  ;;  %v1129_v2 = vrot.slane %v1120_v57, %v5407_v32 }
 0x776   : > { %v1132_v7 = vsub.f32 %v1037_v39, %v1125_v52  ;;  %v1135_v8 = vsub.f32 %v1040_v47, %v1129_v2  ;;  %v1133_v9 = vsub.f32 %v1038_v40, %v1125_v52  ;;  %v1134_v18 = vsub.f32 %v1039_v44, %v1129_v2 }
 0x778   : > { %v1166_v0 = vadd.f32 %v1146_v41, %v1132_v7  ;;  %v1169_v13 = vadd.f32 %v1161_v4, %v1135_v8  ;;  %v1167_v3 = vadd.f32 %v1150_v15, %v1133_v9  ;;  %v1168_v20 = vadd.f32 %v1157_v45, %v1134_v18 }
 0x77a   : > { %1175 = vperm.xlu1 %4753, %v1166_v0   ;;  %1184 = vperm.xlu0 %4752, %v1169_v13  }
 0x77e   : > { %1178 = vperm.xlu1 %4753, %v1167_v3   ;;  %1225 = vbcast.lane.b32.xlu0 %v5564_v53, 256 }
 0x782   : > { %1181 = vperm.xlu1 %4753, %v1168_v20   ;;  %1229 = vbcast.lane.b32.xlu0 %v5564_v53, 264 }
 0x7f9   : > { %v1176_v22 = vpop.permute.xlu1 %1175  ;;  %v1185_v49 = vpop.permute.xlu0 %1184 }
 0x7fa   : > { %v1202_v40 = vrot.slane %v1185_v49, %v5572_v1  ;;  %v1189_v41 = vrot.slane %v1176_v22, %v5569_v62 }
 0x7fd   : > { %v1179_v33 = vpop.permute.xlu1 %1178  ;;  %v5628_v4 = vpop.permute.xlu0 %1225 }
 0x7fe   : > { %v1193_v39 = vrot.slane %v1179_v33, %v5572_v1 }
 0x800   : > { %v1194_v57 = vsel %vm1008_vm9, %v1193_v39, %v1189_v41 }
 0x801   : > { %v1182_v47 = vpop.permute.xlu1 %1181  ;;  %v5633_v18 = vpop.permute.xlu0 %1229 }
 0x802   : > { %v1198_v44 = vrot.slane %v1182_v47, %v5569_v62 }
 0x804   : > { %v1203_v52 = vsel %vm1008_vm9, %v1202_v40, %v1198_v44 }
 0x805   : > { %v1204_v45 = vsel %vm1019_vm10, %v1203_v52, %v1194_v57 }
 0x806   : > { %v1206_v2 = vsel %vm1022_vm11, %v1204_v45, -inf }
 0x807   : > { %1207 = vmax.xlane.f32.xlu1 %v1206_v2 }
 0x894   : > { %v1208_v7 = vpop.xlane.xlu1 %1207 }
 0x895   : > { %v1213_v8 = vrot.slane %v1208_v7, %v5404_v31  ;;  %v1217_v15 = vrot.slane %v1208_v7, %v5407_v32 }
 0x897   : > { %vm1220_vm12 = vcmp.eq.f32.partialorder %v1166_v0, %v1213_v8  ;;  %vm1221_vm13 = vcmp.eq.f32.partialorder %v1167_v3, %v1213_v8  ;;  %vm1222_vm14 = vcmp.eq.f32.partialorder %v1168_v20, %v1217_v15  ;;  %vm1223_vm15 = vcmp.eq.f32.partialorder %v1169_v13, %v1217_v15 }
 0x898   : > { %v1231_v9 = vsel %vm1220_vm12, %v5628_v4, 16  ;;  %v1232_v22 = vsel %vm1221_vm13, %v5633_v18, 16  ;;  %v1233_v33 = vsel %vm1222_vm14, %v5628_v4, 16  ;;  %v1234_v49 = vsel %vm1223_vm15, %v5633_v18, 16 }
 0x899   : > { %1236 = vperm.xlu0 %4752, %v1231_v9  }
 0x89d   : > { %1239 = vperm.xlu0 %4752, %v1232_v22  }
 0x8a1   : > { %1242 = vperm.xlu0 %4752, %v1233_v33   ;;  %v4541_v33 = vmul.f32 -1.442695, %v5516_v38 }
 0x8a3   : > { %4804 = vpow2.f32 %v4541_v33 }
 0x8a5   : > { %1245 = vperm.xlu0 %4752, %v1234_v49  }
 0x918   : > { %v1237_v0 = vpop.permute.xlu0 %1236 }
 0x919   : > { %v1250_v44 = vrot.slane %v1237_v0, %v5569_v62 }
 0x91c   : > { %v1240_v39 = vpop.permute.xlu0 %1239 }
 0x91d   : > { %v1254_v40 = vrot.slane %v1240_v39, %v5572_v1  ;;  %v4805_v39 = vpop.eup %4804 }
 0x91f   : > { %v1255_v20 = vsel %vm1008_vm9, %v1254_v40, %v1250_v44  ;;  %v877_v44 = vadd.f32 1.0, %v4805_v39 }
 0x920   : > { %v1243_v47 = vpop.permute.xlu0 %1242 }
 0x921   : > { %v1259_v3 = vrot.slane %v1243_v47, %v5569_v62  ;;  %4806 = vrcp.f32 %v877_v44 }
 0x924   : > { %v1246_v41 = vpop.permute.xlu0 %1245 }
 0x925   : > { %v1263_v57 = vrot.slane %v1246_v41, %v5572_v1 }
 0x927   : > { %v1264_v52 = vsel %vm1008_vm9, %v1263_v57, %v1259_v3 }
 0x928   : > { %v1265_v13 = vsel %vm1019_vm10, %v1264_v52, %v1255_v20 }
 0x929   : > { %v1266_v45 = vsel %vm1022_vm11, %v1265_v13, 2147483647 }
 0x92a   : > { %v1268_v2 = vshra.s32 %v1266_v45, 16  ;;  %v1267_v8 = vand.u32 65535, %v1266_v45  ;;  %v5664_v45 = vunpack.c.l.bf16 %v5455_v58 }
 0x92b   : > { %v4807_v52 = vpop.eup %4806 }
 0x92c   : > { %v1270_v7 = vcvt.s32.f32 %v1268_v2  ;;  %v1269_v15 = vcvt.s32.f32 %v1267_v8  ;;  %v5667_v2 = vunpack.c.h.bf16 %v5455_v58 }
 0x92e   : > { %1271 = vmin.xlane.f32.xlu0 %v1270_v7 }
 0x9bb   : > { %v1272_v9 = vpop.xlane.xlu0 %1271 }
 0x9bc   : > { %vm1273_vm1 = vcmp.eq.f32.partialorder %v1270_v7, %v1272_v9  ;;  %v1278_v49 = vcvt.f32.s32 %v1272_v9 }
 0x9bd   : > { %v1274_v22 = vsel %vm1273_vm1, %v1269_v15, inf  ;;  %vm1915_vm1 = vcmp.lt.s32.totalorder %v5564_v53, 1 }
 0x9be   : > { %1275 = vmin.xlane.f32.xlu1 %v1274_v22  ;;  %v1279_v47 = vshll.u32 %v1278_v49, 16  ;;  %v5672_v22 = vunpack.c.l.bf16 %v5457_v59 }
 0x9cf   : > { %1336 = vrot.lane.b32.xlu1 %v6838_v55, %s6883_s20 }
 0xa4b   : > { %v1276_v0 = vpop.xlane.xlu1 %1275 }
 0xa4c   : > { %v1277_v40 = vcvt.f32.s32 %v1276_v0 }
 0xa4e   : > { %v1280_v41 = vadd.s32 %v1279_v47, %v1277_v40  ;;  %v5677_v47 = vunpack.c.h.bf16 %v5457_v59 }
 0xa4f   : > { %v1337_v20 = vpop.permute.xlu1 %1336 }
 0xa50   : > { %vm1281_vm6 = vcmp.eq.s32.totalorder %v5564_v53, %v1280_v41  ;;  %v5657_v13 = vmul.f32 %v4807_v52, %v1337_v20 }
 0xa51   : > { %v5651_v3 = vsel %vm1281_vm6, 1.0, %v6838_v55 }
 0xa52   : > { %v1287_v57 = vrot.slane %v5651_v3, %v5404_v31  ;;  %v1298_v38 = vrot.slane %v5651_v3, %v5407_v32  ;;  %6910 = vst [vmem:[#allocation25_spill] sm:$0xff] %v5657_v13 }
 0xa54   : > { %1293 = vbcast.lane.b32.xlu0 %v1287_v57, 264  ;;  %1289 = vbcast.lane.b32.xlu1 %v1287_v57, 256 }
 0xa58   : > { %1300 = vbcast.lane.b32.xlu1 %v1298_v38, 256 }
 0xa5c   : > { %1304 = vbcast.lane.b32.xlu1 %v1298_v38, 264 }
 0xa60   : > { %1345 = vrot.lane.b32.xlu1 %v5657_v13, %s6883_s20 }
 0xa64   : > { %1349 = vrot.lane.b32.xlu1 %v5480_v17, %s6841_s14 }
 0xac6   : > { %v1294_v7 = vpop.permute.xlu0 %1293  ;;  %v1290_v8 = vpop.permute.xlu1 %1289 }
 0xac7   : > { %v1311_v9 = vmul.f32 %v5667_v2, %v1294_v7  ;;  %v1310_v15 = vmul.f32 %v5664_v45, %v1290_v8 }
 0xac9   : > { %v1315_v33 = vsel %vm572_vm4, %v1311_v9, 0.0  ;;  %v1314_v49 = vsel %vm572_vm4, %v1310_v15, 0.0 }
 0xaca   : > { %v1316_v0 = vadd.f32 %v1315_v33, %v1314_v49  ;;  %v1301_v39 = vpop.permute.xlu1 %1300 }
 0xacb   : > { %v1312_v40 = vmul.f32 %v5672_v22, %v1301_v39 }
 0xacc   : > { %v1317_v58 = vrot.slane %v1316_v0, 4 }
 0xacd   : > { %v1323_v38 = vsel %vm572_vm4, %v1312_v40, 0.0 }
 0xace   : > { %v1318_v41 = vadd.f32 %v1317_v58, %v1316_v0  ;;  %v1305_v44 = vpop.permute.xlu1 %1304 }
 0xacf   : > { %v1313_v57 = vmul.f32 %v5677_v47, %v1305_v44 }
 0xad0   : > { %v1319_v52 = vrot.slane %v1318_v41, 2 }
 0xad1   : > { %v1324_v20 = vsel %vm572_vm4, %v1313_v57, 0.0 }
 0xad2   : > { %v1325_v7 = vadd.f32 %v1324_v20, %v1323_v38  ;;  %v1320_v9 = vadd.f32 %v1319_v52, %v1318_v41  ;;  %v1346_v5 = vpop.permute.xlu1 %1345  ;;  %v6911_v41 = vmov 0.0  }
 0xad4   : > { %v1326_v8 = vrot.slane %v1325_v7, 4  ;;  %v1321_v59 = vrot.slane %v1320_v9, 1 }
 0xad6   : > { %v1327_v15 = vadd.f32 %v1326_v8, %v1325_v7  ;;  %v1322_v13 = vadd.f32 %v1321_v59, %v1320_v9  ;;  %v1350_v44 = vpop.permute.xlu1 %1349 }
 0xad8   : > { %v1328_v33 = vrot.slane %v1327_v15, 2 }
 0xada   : > { %v1329_v49 = vadd.f32 %v1328_v33, %v1327_v15 }
 0xadc   : > { %v1330_v55 = vrot.slane %v1329_v49, 1 }
 0xade   : > { %v1331_v39 = vadd.f32 %v1330_v55, %v1329_v49 }
 0xae0   : > { %v1342_v0 = vsel %vm1019_vm10, %v1331_v39, %v1322_v13 }
 0xae1   : > { %v1352_v58 = vsel %vm572_vm4, %v1342_v0, %v1346_v5 }
 0xae2   : > { %v1353_v40 = vsel %vm652_vm2, %v1352_v58, %v1350_v44 }
 0xae3   : > { %v1354_v57 = vpack.c.bf16 %v1353_v40, %v1353_v40 }
 0xae5   : > { %4547 = vmatmul.mubr.msk.bf16.vlgmr.msra.gmra.mrb[8].mxu0 %vm711_vm3, %v1354_v57 }
 0xae6   : > { %4651 = vmatpush3.bf16.msra.mxu0 %v5435_v54  ;;  %4654 = vmatprep.mubr.msk.bf16.mxu0 %vm5146_vm5, %v6911_v41 }
 0xae7   : > { %4652 = vmatprep.subr.bf16.mxu0 %v6911_v41 }
 0xaea   : > { %4653 = vmatpush3.bf16.msra.mxu0 %v5445_v56 }
 0xaeb   : > { %2524 = vmatprep.subr.bf16.mxu0 %v5344_v10 }
 0xbb8   : > { %v1392_v55 = vpop.f32.mrb[8].mxu0 }
 0xbb9   : > { %v1393_v5 = vadd.f32 %v1392_v55, %v5413_v34  ;;  %v1394_v13 = vpop.f32.mrb[9].mxu0 }
 0xbba   : > { %v1395_v38 = vadd.f32 %v1394_v13, %v5416_v35  ;;  %v1396_v20 = vpop.f32.mrb[10].mxu0 }
 0xbbb   : > { %v1397_v52 = vpop.f32.mrb[11].mxu0  ;;  %1400 = vrot.lane.b32.xlu1 %v1393_v5, %s6881_s13 }
 0xbbc   : > { %1421 = vrot.lane.b32.xlu0 %v1395_v38, %s6879_s23 }
 0xbc0   : > { %1411 = vrot.lane.b32.xlu0 %v1395_v38, %s6881_s13 }
 0xc2d   : > { %v1401_v54 = vpop.permute.xlu1 %1400 }
 0xc2e   : > { %v1403_v7 = vadd.f32 %v1401_v54, %v1393_v5  ;;  %v1422_v15 = vpop.permute.xlu0 %1421 }
 0xc30   : > { %v4548_v8 = vmul.f32 -1.442695, %v1403_v7 }
 0xc32   : > { %4808 = vpow2.f32 %v4548_v8 }
 0xc3c   : > { %v4809_v56 = vpop.eup %4808 }
 0xc3d   : > { %v1407_v10 = vadd.f32 1.0, %v4809_v56 }
 0xc3f   : > { %4810 = vrcp.f32 %v1407_v10 }
 0xc40   : > { %4812 = vrcp.f32 %v5613_v37 }
 0xc49   : > { %v4811_v9 = vpop.eup %4810 }
 0xc4a   : > { %v1424_v33 = vmul.f32 %v4811_v9, %v1422_v15  ;;  %v4813_v49 = vpop.eup %4812 }
 0xc4b   : > { %v1089_v59 = vmul.f32 %v4813_v49, %v5613_v37  ;;  %v1412_v37 = vpop.permute.xlu0 %1411 }
 0xc4c   : > { %1426 = vrot.lane.b32.xlu1 %v1424_v33, %s6843_s27  ;;  %v1414_v20 = vadd.f32 %v1412_v37, %v1393_v5 }
 0xc4d   : > { %v1090_v58 = vsub.f32 2.0, %v1089_v59 }
 0xc4e   : > { %v4549_v52 = vmul.f32 -1.442695, %v1414_v20 }
 0xc4f   : > { %v1091_v44 = vmul.f32 %v4813_v49, %v1090_v58 }
 0xc51   : > { %v1096_v40 = vrot.slane %v1091_v44, %v5404_v31  ;;  %v1100_v13 = vrot.slane %v1091_v44, %v5407_v32 }
 0xc53   : > { %v5704_v55 = vmul.f32 %v5584_v60, %v1096_v40  ;;  %v5709_v38 = vmul.f32 %v5590_v46, %v1100_v13  ;;  %v5723_v33 = vmul.f32 %v5593_v23, %v1100_v13 }
 0xcbe   : > { %v1427_v39 = vpop.permute.xlu1 %1426 }
 0xcbf   : > { %v1429_v0 = vadd.f32 %v1427_v39, %v1393_v5  ;;  %v5719_v5 = vmul.f32 %v5587_v61, %v1096_v40 }
 0xcc1   : > { %4814 = vtanh.f32 %v1429_v0 }
 0xcc2   : > { %4816 = vpow2.f32 %v4549_v52 }
 0xccb   : > { %v4815_v57 = vpop.eup %4814 }
 0xccc   : > { %1433 = vrot.lane.b32.xlu1 %v4815_v57, %s6879_s23  ;;  %v4817_v54 = vpop.eup %4816 }
 0xccd   : > { %v1418_v7 = vadd.f32 1.0, %v4817_v54 }
 0xccf   : > { %4818 = vrcp.f32 %v1418_v7 }
 0xcd0   : > { %1531 = vperm.xlu1 %4753, %v5704_v55  }
 0xcd4   : > { %1541 = vperm.xlu1 %4753, %v5709_v38  }
 0xcd9   : > { %v4819_v8 = vpop.eup %4818 }
 0xcda   : > { %v1431_v56 = vsub.f32 1.0, %v4819_v8  ;;  %v1437_v9 = vmul.f32 %v4819_v8, %v5480_v17  ;;  %v6912_v17 = vmov 0  }
 0xd3e   : > { %v1434_v60 = vpop.permute.xlu1 %1433 }
 0xd3f   : > { %v1436_v10 = vmul.f32 %v1434_v60, %v1431_v56 }
 0xd41   : > { %v5713_v15 = vadd.f32 %v1437_v9, %v1436_v10 }
 0xd43   : > { %v1439_v46 = vpack.c.bf16 %v5713_v15, %v5713_v15 }
 0xd45   : > { %1441 = vrot.lane.b32.xlu0 %v1439_v46, %s6879_s23 }
 0xd49   : > { %1536 = vperm.xlu0 %4752, %v5719_v5  }
 0xd4d   : > { %1546 = vperm.xlu0 %4752, %v5723_v33  }
 0xdb7   : > { %v1442_v49 = vpop.permute.xlu0 %1441 }
 0xdb8   : > { %4647 = vmatmul.mubr.msk.bf16.vlgmr.msra.gmra.mrb[4].mxu1 %vm572_vm4, %v1442_v49 }
 0xdb9   : > { %1942 = vmatpush1.bf16.msra.mxu1 %v5349_v11  ;;  %1973 = vmatprep.mubr.bf16.mxu1 %v6912_v17  ;;  %v1532_v11 = vpop.permute.xlu1 %1531 }
 0xdba   : > { %1943 = vmatprep.subr.bf16.mxu1 %v5354_v12  ;;  %v1549_v40 = vmul.f32 %v5523_v43, %v1532_v11 }
 0xdbd   : > { %1944 = vmatpush1.bf16.msra.mxu1 %v5362_v14  ;;  %v1542_v39 = vpop.permute.xlu1 %1541 }
 0xdbe   : > { %1945 = vmatprep.subr.bf16.mxu1 %v5369_v16  ;;  %v1551_v20 = vmul.f32 %v5523_v43, %v1542_v39 }
 0xdc1   : > { %1946 = vmatpush1.bf16.msra.mxu1 %v5375_v19 }
 0xdc2   : > { %1947 = vmatprep.subr.bf16.mxu1 %v5385_v21 }
 0xdc5   : > { %1948 = vmatpush1.bf16.msra.mxu1 %v5391_v24 }
 0xdc6   : > { %1949 = vmatprep.subr.bf16.mxu1 %v5394_v26 }
 0xdc8   : > { %v1537_v23 = vpop.permute.xlu0 %1536 }
 0xdc9   : > { %1950 = vmatpush1.bf16.msra.mxu1 %v5397_v27 }
 0xdca   : > { %4658 = vmatprep.subr.bf16.mxu1 %v6911_v41 }
 0xdcc   : > { %v1547_v0 = vpop.permute.xlu0 %1546 }
 0xdcd   : > { %v1552_v52 = vmul.f32 %v5523_v43, %v1547_v0 }
 0xe8b   : > { %v1480_v61 = vpop.f32.mrb[4].mxu1 }
 0xe8c   : > { %v5739_v12 = vadd.f32 %v5513_v36, %v1480_v61  ;;  %v4648_v14 = vpop.f32.mrb[5].mxu1  ;;  %v1550_v36 = vmul.f32 %v5523_v43, %v1537_v23 }
 0xe8d   : > { %v1483_v16 = vpop.f32.mrb[6].mxu1 }
 0xe8e   : > { %v1499_v19 = vrot.slane %v5739_v12, %v5339_v6  ;;  %v4649_v21 = vpop.f32.mrb[7].mxu1 }
 0xe90   : > { %v1500_v59 = vcombine.high %v1499_v19, %v1499_v19  ;;  %v1507_v24 = vrot.slane %v1499_v19, %v5339_v6 }
 0xe92   : > { %v1514_v58 = vrot.slane %v1500_v59, %v5339_v6  ;;  %v1518_v44 = vrot.slane %v1507_v24, %v5404_v31 }
 0xe94   : > { %v1522_v57 = vrot.slane %v1514_v58, %v5404_v31  ;;  %v1525_v13 = vadd.f32 %v1518_v44, %v5492_v28  ;;  %v1526_v37 = vadd.f32 %v1518_v44, %v5496_v30 }
 0xe96   : > { %v1527_v54 = vadd.f32 %v5490_v25, %v1522_v57  ;;  %v1528_v7 = vadd.f32 %v5494_v29, %v1522_v57  ;;  %v1553_v8 = vadd.f32 %v1549_v40, %v1525_v13  ;;  %v1554_v56 = vadd.f32 %v1550_v36, %v1526_v37 }
 0xe98   : > { %v1555_v60 = vadd.f32 %v1551_v20, %v1527_v54  ;;  %v1556_v10 = vadd.f32 %v1552_v52, %v1528_v7  ;;  %4820 = vtanh.f32 %v1553_v8 }
 0xe99   : > { %4822 = vtanh.f32 %v1554_v56 }
 0xe9a   : > { %4824 = vtanh.f32 %v1555_v60 }
 0xe9b   : > { %4826 = vtanh.f32 %v1556_v10 }
 0xea2   : > { %v4821_v9 = vpop.eup %4820 }
 0xea3   : > { %v4823_v46 = vpop.eup %4822  ;;  %v1561_v49 = vmul.f32 %v4821_v9, %v5537_v63 }
 0xea4   : > { %v4825_v11 = vpop.eup %4824  ;;  %v1562_v61 = vmul.f32 %v4823_v46, %v5537_v63 }
 0xea5   : > { %v4827_v43 = vpop.eup %4826  ;;  %v1565_v23 = vsel %vm938_vm7, %v1561_v49, 0.0  ;;  %v1563_v16 = vmul.f32 %v4825_v11, %v5537_v63 }
 0xea6   : > { %1566 = vadd.xlane.f32.xlu1 %v1565_v23  ;;  %v1568_v14 = vsel %vm938_vm7, %v1562_v61, 0.0  ;;  %v1564_v19 = vmul.f32 %v4827_v43, %v5537_v63 }
 0xea7   : > { %1569 = vadd.xlane.f32.xlu0 %v1568_v14  ;;  %v1571_v59 = vsel %vm938_vm7, %v1563_v16, 0.0 }
 0xea8   : > { %v1574_v21 = vsel %vm938_vm7, %v1564_v19, 0.0 }
 0xeaa   : > { %1575 = vadd.xlane.f32.xlu1 %v1574_v21 }
 0xeab   : > { %1572 = vadd.xlane.f32.xlu0 %v1571_v59 }
 0xf33   : > { %v1567_v24 = vpop.xlane.xlu1 %1566 }
 0xf34   : > { %v1577_v39 = vadd.f32 %v1567_v24, %v5551_v42  ;;  %v1570_v0 = vpop.xlane.xlu0 %1569 }
 0xf35   : > { %v1578_v58 = vadd.f32 %v1570_v0, %v5559_v51 }
 0xf36   : > { %1586 = vperm.xlu0 %4752, %v1577_v39  }
 0xf37   : > { %1589 = vperm.xlu1 %4753, %v1578_v58   ;;  %v1576_v44 = vpop.xlane.xlu1 %1575 }
 0xf38   : > { %v1580_v40 = vadd.f32 %v1576_v44, %v5556_v50  ;;  %v1573_v36 = vpop.xlane.xlu0 %1572  ;;  %v4552_v44 = vld [vmem:[%s5601_s19 + $0x1] ss:$0 sm:$0xff] }
 0xf39   : > { %v1579_v63 = vadd.f32 %v1573_v36, %v5554_v48 }
 0xf3a   : > { %1595 = vperm.xlu0 %4752, %v1580_v40  }
 0xf3b   : > { %1592 = vperm.xlu1 %4753, %v1579_v63  }
 0xfb5   : > { %v1587_v57 = vpop.permute.xlu0 %1586 }
 0xfb6   : > { %v1590_v13 = vpop.permute.xlu1 %1589  ;;  %v1600_v20 = vrot.slane %v1587_v57, %v5569_v62 }
 0xfb7   : > { %v1604_v37 = vrot.slane %v1590_v13, %v5572_v1 }
 0xfb9   : > { %v1596_v52 = vpop.permute.xlu0 %1595  ;;  %v1605_v56 = vsel %vm1008_vm9, %v1604_v37, %v1600_v20 }
 0xfba   : > { %v1593_v54 = vpop.permute.xlu1 %1592  ;;  %v1613_v7 = vrot.slane %v1596_v52, %v5572_v1 }
 0xfbb   : > { %v1609_v8 = vrot.slane %v1593_v54, %v5569_v62 }
 0xfbd   : > { %v1614_v60 = vsel %vm1008_vm9, %v1613_v7, %v1609_v8 }
 0xfbe   : > { %v1615_v10 = vsel %vm1019_vm10, %v1614_v60, %v1605_v56 }
 0xfbf   : > { %v1617_v9 = vsel %vm1022_vm11, %v1615_v10, -inf }
 0xfc0   : > { %1618 = vmax.xlane.f32.xlu1 %v1617_v9 }
 0xfd1   : > { %1739 = vbcast.lane.b32.xlu1 %v4552_v44, 256 }
0x104d   : > { %v1619_v46 = vpop.xlane.xlu1 %1618 }
0x104e   : > { %v1624_v49 = vrot.slane %v1619_v46, %v5404_v31  ;;  %v1628_v11 = vrot.slane %v1619_v46, %v5407_v32 }
0x1050   : > { %v1631_v61 = vsub.f32 %v1577_v39, %v1624_v49  ;;  %v1632_v43 = vsub.f32 %v1578_v58, %v1624_v49  ;;  %v1633_v14 = vsub.f32 %v1579_v63, %v1628_v11  ;;  %v1634_v19 = vsub.f32 %v1580_v40, %v1628_v11  ;;  %v4553_v40 = vld [vmem:[%s5601_s19 + $0x9] ss:$0 sm:$0xff] }
0x1051   : > { %1750 = vbcast.lane.b32.xlu1 %v4553_v40, 256  ;;  %v1740_v9 = vpop.permute.xlu1 %1739 }
0x1052   : > { %v1635_v23 = vmul.f32 1.442695, %v1631_v61  ;;  %v1637_v16 = vmul.f32 1.442695, %v1632_v43  ;;  %v1639_v21 = vmul.f32 1.442695, %v1633_v14 }
0x1053   : > { %v1641_v59 = vmul.f32 1.442695, %v1634_v19 }
0x1054   : > { %4828 = vpow2.f32 %v1635_v23 }
0x1055   : > { %4830 = vpow2.f32 %v1637_v16  ;;  %1754 = vbcast.lane.b32.xlu1 %v4553_v40, 264 }
0x1056   : > { %4832 = vpow2.f32 %v1639_v21 }
0x1057   : > { %4834 = vpow2.f32 %v1641_v59 }
0x105e   : > { %v5777_v24 = vpop.eup %4828 }
0x105f   : > { %1648 = vperm.xlu0 %4752, %v5777_v24   ;;  %v5780_v0 = vpop.eup %4830 }
0x1060   : > { %v5783_v39 = vpop.eup %4832 }
0x1061   : > { %v5786_v58 = vpop.eup %4834 }
0x1063   : > { %1651 = vperm.xlu0 %4752, %v5780_v0  }
0x1067   : > { %1654 = vperm.xlu0 %4752, %v5783_v39  }
0x106b   : > { %1657 = vperm.xlu0 %4752, %v5786_v58  }
0x10c3   : > { %v1751_v46 = vpop.permute.xlu1 %1750 }
0x10c7   : > { %v1755_v21 = vpop.permute.xlu1 %1754 }
0x10de   : > { %v1649_v36 = vpop.permute.xlu0 %1648 }
0x10df   : > { %v1662_v20 = vrot.slane %v1649_v36, %v5569_v62 }
0x10e2   : > { %v1652_v63 = vpop.permute.xlu0 %1651 }
0x10e3   : > { %v1666_v13 = vrot.slane %v1652_v63, %v5572_v1 }
0x10e5   : > { %v1667_v7 = vsel %vm1008_vm9, %v1666_v13, %v1662_v20 }
0x10e6   : > { %v1655_v57 = vpop.permute.xlu0 %1654 }
0x10e7   : > { %v1671_v52 = vrot.slane %v1655_v57, %v5569_v62 }
0x10ea   : > { %v1658_v37 = vpop.permute.xlu0 %1657 }
0x10eb   : > { %v1675_v54 = vrot.slane %v1658_v37, %v5572_v1 }
0x10ed   : > { %v1676_v8 = vsel %vm1008_vm9, %v1675_v54, %v1671_v52 }
0x10ee   : > { %v1677_v56 = vsel %vm1019_vm10, %v1676_v8, %v1667_v7 }
0x10ef   : > { %v1679_v60 = vsel %vm1022_vm11, %v1677_v56, 0.0 }
0x10f0   : > { %1680 = vadd.xlane.f32.xlu0 %v1679_v60 }
0x1106   : > { %1743 = vbcast.lane.b32.xlu0 %v4552_v44, 264 }
0x117d   : > { %v5799_v10 = vpop.xlane.xlu0 %1680 }
0x117e   : > { %4836 = vlog2.f32 %v5799_v10 }
0x1181   : > { %v1744_v13 = vpop.permute.xlu0 %1743 }
0x1188   : > { %v4837_v49 = vpop.eup %4836 }
0x1189   : > { %v1714_v11 = vmul.f32 0.6931472, %v4837_v49 }
0x118b   : > { %v1719_v23 = vrot.slane %v1714_v11, %v5404_v31  ;;  %v1723_v16 = vrot.slane %v1714_v11, %v5407_v32 }
0x118d   : > { %v1726_v59 = vsub.f32 %v1631_v61, %v1719_v23  ;;  %v1729_v40 = vsub.f32 %v1634_v19, %v1723_v16  ;;  %v1727_v63 = vsub.f32 %v1632_v43, %v1719_v23  ;;  %v1728_v44 = vsub.f32 %v1633_v14, %v1723_v16 }
0x118f   : > { %v1760_v36 = vadd.f32 %v1740_v9, %v1726_v59  ;;  %v1763_v57 = vadd.f32 %v1755_v21, %v1729_v40  ;;  %v1761_v37 = vadd.f32 %v1744_v13, %v1727_v63  ;;  %v1762_v20 = vadd.f32 %v1751_v46, %v1728_v44 }
0x1191   : > { %1769 = vperm.xlu1 %4753, %v1760_v36   ;;  %1778 = vperm.xlu0 %4752, %v1763_v57  }
0x1195   : > { %1772 = vperm.xlu1 %4753, %v1761_v37  }
0x1199   : > { %1775 = vperm.xlu1 %4753, %v1762_v20  }
0x1210   : > { %v1770_v52 = vpop.permute.xlu1 %1769  ;;  %v1779_v7 = vpop.permute.xlu0 %1778 }
0x1211   : > { %v1796_v61 = vrot.slane %v1779_v7, %v5572_v1  ;;  %v1783_v19 = vrot.slane %v1770_v52, %v5569_v62 }
0x1214   : > { %v1773_v54 = vpop.permute.xlu1 %1772 }
0x1215   : > { %v1787_v8 = vrot.slane %v1773_v54, %v5572_v1 }
0x1217   : > { %v1788_v60 = vsel %vm1008_vm9, %v1787_v8, %v1783_v19 }
0x1218   : > { %v1776_v56 = vpop.permute.xlu1 %1775 }
0x1219   : > { %v1792_v43 = vrot.slane %v1776_v56, %v5569_v62 }
0x121b   : > { %v1797_v14 = vsel %vm1008_vm9, %v1796_v61, %v1792_v43 }
0x121c   : > { %v1798_v9 = vsel %vm1019_vm10, %v1797_v14, %v1788_v60 }
0x121d   : > { %v1800_v46 = vsel %vm1022_vm11, %v1798_v9, -inf }
0x121e   : > { %1801 = vmax.xlane.f32.xlu1 %v1800_v46  ;;  %v4555_v46 = vsel %vm1915_vm1, 1.0, %v6911_v41  ;;  %vm2498_vm1 = vcmp.lt.s32.totalorder %v5564_v53, 2 }
0x12ab   : > { %v1802_v49 = vpop.xlane.xlu1 %1801 }
0x12ac   : > { %v1807_v11 = vrot.slane %v1802_v49, %v5404_v31  ;;  %v1811_v16 = vrot.slane %v1802_v49, %v5407_v32  ;;  %v4551_v49 = vmul.f32 -1.442695, %v5739_v12 }
0x12ae   : > { %vm1814_vm8 = vcmp.eq.f32.partialorder %v1760_v36, %v1807_v11  ;;  %vm1815_vm12 = vcmp.eq.f32.partialorder %v1761_v37, %v1807_v11  ;;  %vm1816_vm13 = vcmp.eq.f32.partialorder %v1762_v20, %v1811_v16  ;;  %vm1817_vm14 = vcmp.eq.f32.partialorder %v1763_v57, %v1811_v16 }
0x12af   : > { %v1818_v23 = vsel %vm1814_vm8, %v5628_v4, 16  ;;  %v1819_v21 = vsel %vm1815_vm12, %v5633_v18, 16  ;;  %v1820_v59 = vsel %vm1816_vm13, %v5628_v4, 16  ;;  %v1821_v40 = vsel %vm1817_vm14, %v5633_v18, 16 }
0x12b0   : > { %1823 = vperm.xlu0 %4752, %v1818_v23   ;;  %4838 = vpow2.f32 %v4551_v49 }
0x12b4   : > { %1826 = vperm.xlu0 %4752, %v1819_v21  }
0x12b8   : > { %1829 = vperm.xlu0 %4752, %v1820_v59  }
0x12ba   : > { %v4839_v16 = vpop.eup %4838 }
0x12bc   : > { %1832 = vperm.xlu0 %4752, %v1821_v40  }
0x132f   : > { %v1824_v63 = vpop.permute.xlu0 %1823 }
0x1330   : > { %v1837_v54 = vrot.slane %v1824_v63, %v5569_v62  ;;  %v1489_v63 = vadd.f32 1.0, %v4839_v16 }
0x1332   : > { %4840 = vrcp.f32 %v1489_v63 }
0x1333   : > { %v1827_v13 = vpop.permute.xlu0 %1826 }
0x1334   : > { %v1841_v44 = vrot.slane %v1827_v13, %v5572_v1 }
0x1336   : > { %v1842_v20 = vsel %vm1008_vm9, %v1841_v44, %v1837_v54 }
0x1337   : > { %v1830_v36 = vpop.permute.xlu0 %1829 }
0x1338   : > { %v1846_v37 = vrot.slane %v1830_v36, %v5569_v62 }
0x133b   : > { %v1833_v52 = vpop.permute.xlu0 %1832 }
0x133c   : > { %v1850_v7 = vrot.slane %v1833_v52, %v5572_v1  ;;  %v4841_v52 = vpop.eup %4840 }
0x133e   : > { %v1851_v8 = vsel %vm1008_vm9, %v1850_v7, %v1846_v37 }
0x133f   : > { %v1852_v57 = vsel %vm1019_vm10, %v1851_v8, %v1842_v20 }
0x1340   : > { %v1853_v56 = vsel %vm1022_vm11, %v1852_v57, 2147483647 }
0x1341   : > { %v1855_v61 = vshra.s32 %v1853_v56, 16  ;;  %v1854_v43 = vand.u32 65535, %v1853_v56 }
0x1343   : > { %v1857_v19 = vcvt.s32.f32 %v1855_v61  ;;  %v1856_v14 = vcvt.s32.f32 %v1854_v43 }
0x1345   : > { %1858 = vmin.xlane.f32.xlu0 %v1857_v19 }
0x13d2   : > { %v1859_v60 = vpop.xlane.xlu0 %1858 }
0x13d3   : > { %vm1860_vm15 = vcmp.eq.f32.partialorder %v1857_v19, %v1859_v60  ;;  %v1865_v11 = vcvt.f32.s32 %v1859_v60 }
0x13d4   : > { %v1861_v9 = vsel %vm1860_vm15, %v1856_v14, inf }
0x13d5   : > { %1862 = vmin.xlane.f32.xlu1 %v1861_v9  ;;  %v1866_v21 = vshll.u32 %v1865_v11, 16 }
0x13e6   : > { %1919 = vrot.lane.b32.xlu1 %v4555_v46, %s6883_s20 }
0x1462   : > { %v1863_v23 = vpop.xlane.xlu1 %1862 }
0x1463   : > { %v1864_v59 = vcvt.f32.s32 %v1863_v23 }
0x1465   : > { %v1867_v40 = vadd.s32 %v1866_v21, %v1864_v59 }
0x1466   : > { %v1920_v44 = vpop.permute.xlu1 %1919 }
0x1467   : > { %vm1868_vm6 = vcmp.eq.s32.totalorder %v5564_v53, %v1867_v40  ;;  %v5840_v54 = vmul.f32 %v4841_v52, %v1920_v44 }
0x1468   : > { %v5832_v13 = vsel %vm1868_vm6, 1.0, %v6911_v41 }
0x1469   : > { %v1874_v36 = vrot.slane %v5832_v13, %v5404_v31  ;;  %v1885_v12 = vrot.slane %v5832_v13, %v5407_v32 }
0x146b   : > { %1880 = vbcast.lane.b32.xlu1 %v1874_v36, 264  ;;  %1876 = vbcast.lane.b32.xlu0 %v1874_v36, 256 }
0x146f   : > { %1887 = vbcast.lane.b32.xlu1 %v1885_v12, 256  ;;  %1932 = vrot.lane.b32.xlu0 %v5713_v15, %s6841_s14  ;;  %s6923_s14 = smov 5  }
0x1473   : > { %1891 = vbcast.lane.b32.xlu1 %v1885_v12, 264 }
0x1477   : > { %1928 = vrot.lane.b32.xlu1 %v5840_v54, %s6883_s20 }
0x14dd   : > { %v1877_v37 = vpop.permute.xlu0 %1876  ;;  %v1881_v7 = vpop.permute.xlu1 %1880 }
0x14de   : > { %v1893_v20 = vmul.f32 %v1877_v37, %v5664_v45  ;;  %v1894_v8 = vmul.f32 %v1881_v7, %v5667_v2 }
0x14e0   : > { %v1897_v57 = vsel %vm572_vm4, %v1893_v20, 0.0  ;;  %v1898_v56 = vsel %vm572_vm4, %v1894_v8, 0.0 }
0x14e1   : > { %v1899_v61 = vadd.f32 %v1898_v56, %v1897_v57  ;;  %v1888_v19 = vpop.permute.xlu1 %1887  ;;  %v1933_v8 = vpop.permute.xlu0 %1932 }
0x14e2   : > { %v1895_v60 = vmul.f32 %v1888_v19, %v5672_v22  ;;  %v5859_v19 = vld [vmem:[%s6826_s7] sm:$0xff]  }
0x14e3   : > { %v1900_v43 = vrot.slane %v1899_v61, 4 }
0x14e4   : > { %v1906_v49 = vsel %vm572_vm4, %v1895_v60, 0.0  ;;  %v5874_v60 = vld [vmem:[%s6823_s4 + $0x4] ss:$8 sps:$4 sm:$0xff]  }
0x14e5   : > { %v1901_v14 = vadd.f32 %v1900_v43, %v1899_v61  ;;  %v1892_v9 = vpop.permute.xlu1 %1891  ;;  %v5868_v43 = vld [vmem:[%s6826_s7 + $0x8] sm:$0xff]  }
0x14e6   : > { %v1896_v46 = vmul.f32 %v1892_v9, %v5677_v47 }
0x14e7   : > { %v1902_v23 = vrot.slane %v1901_v14, 2 }
0x14e8   : > { %v1907_v11 = vsel %vm572_vm4, %v1896_v46, 0.0 }
0x14e9   : > { %v1908_v16 = vadd.f32 %v1907_v11, %v1906_v49  ;;  %v1903_v59 = vadd.f32 %v1902_v23, %v1901_v14  ;;  %v1929_v20 = vpop.permute.xlu1 %1928 }
0x14eb   : > { %v1909_v21 = vrot.slane %v1908_v16, 4  ;;  %v1904_v12 = vrot.slane %v1903_v59, 1 }
0x14ed   : > { %v1910_v40 = vadd.f32 %v1909_v21, %v1908_v16  ;;  %v1905_v52 = vadd.f32 %v1904_v12, %v1903_v59 }
0x14ef   : > { %v1911_v63 = vrot.slane %v1910_v40, 2 }
0x14f1   : > { %v1912_v36 = vadd.f32 %v1911_v63, %v1910_v40 }
0x14f3   : > { %v1913_v44 = vrot.slane %v1912_v36, 1 }
0x14f5   : > { %v1914_v37 = vadd.f32 %v1913_v44, %v1912_v36 }
0x14f7   : > { %v1925_v7 = vsel %vm1019_vm10, %v1914_v37, %v1905_v52 }
0x14f8   : > { %v1935_v57 = vsel %vm572_vm4, %v1925_v7, %v1929_v20 }
0x14f9   : > { %v1936_v56 = vsel %vm652_vm2, %v1935_v57, %v1933_v8 }
0x14fa   : > { %v1937_v61 = vpack.c.bf16 %v1936_v56, %v1936_v56 }
0x14fc   : > { %4556 = vmatmul.mubr.msk.bf16.vlgmr.msra.gmra.mrb[8].mxu1 %vm711_vm3, %v1937_v61 }
0x14fd   : > { %4659 = vmatpush3.bf16.msra.mxu1 %v5859_v19  ;;  %4662 = vmatprep.mubr.msk.bf16.mxu1 %vm5146_vm5, %v6911_v41 }
0x14fe   : > { %4660 = vmatprep.subr.bf16.mxu1 %v6911_v41 }
0x1501   : > { %4661 = vmatpush3.bf16.msra.mxu1 %v5868_v43 }
0x1502   : > { %3107 = vmatprep.subr.bf16.mxu1 %v5874_v60 }
0x15cf   : > { %v1975_v14 = vpop.f32.mrb[8].mxu1 }
0x15d0   : > { %v1976_v9 = vadd.f32 %v1975_v14, %v5413_v34  ;;  %v1977_v46 = vpop.f32.mrb[9].mxu1 }
0x15d1   : > { %v1978_v49 = vadd.f32 %v1977_v46, %v5416_v35  ;;  %v1979_v11 = vpop.f32.mrb[10].mxu1 }
0x15d2   : > { %v1980_v23 = vpop.f32.mrb[11].mxu1  ;;  %1983 = vrot.lane.b32.xlu1 %v1976_v9, %s6881_s13 }
0x15d3   : > { %2004 = vrot.lane.b32.xlu0 %v1978_v49, %s6879_s23 }
0x15d7   : > { %1994 = vrot.lane.b32.xlu0 %v1978_v49, %s6881_s13 }
0x1644   : > { %v1984_v16 = vpop.permute.xlu1 %1983 }
0x1645   : > { %v1986_v21 = vadd.f32 %v1984_v16, %v1976_v9  ;;  %v2005_v12 = vpop.permute.xlu0 %2004 }
0x1647   : > { %v4557_v59 = vmul.f32 -1.442695, %v1986_v21 }
0x1649   : > { %4842 = vpow2.f32 %v4557_v59 }
0x1653   : > { %v4843_v40 = vpop.eup %4842 }
0x1654   : > { %v1990_v63 = vadd.f32 1.0, %v4843_v40 }
0x1656   : > { %4844 = vrcp.f32 %v1990_v63 }
0x1657   : > { %4846 = vrcp.f32 %v5799_v10 }
0x1660   : > { %v4845_v36 = vpop.eup %4844 }
0x1661   : > { %v2007_v44 = vmul.f32 %v4845_v36, %v2005_v12  ;;  %v4847_v52 = vpop.eup %4846 }
0x1662   : > { %v1683_v37 = vmul.f32 %v4847_v52, %v5799_v10 }
0x1663   : > { %2009 = vrot.lane.b32.xlu1 %v2007_v44, %s6843_s27  ;;  %s6924_s27 = smov 64  }
0x1664   : > { %v1684_v7 = vsub.f32 2.0, %v1683_v37 }
0x1666   : > { %v1685_v57 = vmul.f32 %v4847_v52, %v1684_v7 }
0x1668   : > { %v1690_v56 = vrot.slane %v1685_v57, %v5404_v31  ;;  %v1694_v61 = vrot.slane %v1685_v57, %v5407_v32  ;;  %v5949_v57 = vld [vmem:[%s6823_s4 + $0x24] ss:$8 sps:$4 sm:$0xff]  }
0x1669   : > { %6915 = vst [vmem:[#allocation28_spill] sm:$0xff] %v5949_v57 }
0x166a   : > { %v5888_v14 = vmul.f32 %v5777_v24, %v1690_v56  ;;  %v5896_v10 = vmul.f32 %v5783_v39, %v1694_v61  ;;  %v1995_v24 = vpop.permute.xlu0 %1994  ;;  %v5910_v37 = vmul.f32 %v5780_v0, %v1690_v56  ;;  %v5918_v7 = vmul.f32 %v5786_v58, %v1694_v61  ;;  %v5930_v0 = vld [vmem:[%s6823_s4] ss:$8 sps:$4 sm:$0xff]   ;;  %v5937_v58 = vld [vmem:[%s6823_s4 + $0x14] ss:$8 sps:$4 sm:$0xff]  }
0x166b   : > { %v1997_v23 = vadd.f32 %v1995_v24, %v1976_v9  ;;  %6913 = vst [vmem:[#allocation26_spill] sm:$0xff] %v5937_v58  ;;  %v5955_v56 = vld [vmem:[%s6823_s4 + $0x20] ss:$8 sps:$4 sm:$0xff]   ;;  %v5961_v61 = vld [vmem:[%s6823_s4 + $0x34] ss:$8 sps:$4 sm:$0xff]  }
0x166c   : > { %v5893_v49 = vadd.f32 %v5888_v14, %v5704_v55  ;;  %v5901_v11 = vadd.f32 %v5896_v10, %v5709_v38  ;;  %6916 = vst [vmem:[#allocation29_spill] sm:$0xff] %v5955_v56  ;;  %6917 = vst [vmem:[#allocation30_spill] sm:$0xff] %v5961_v61 }
0x166d   : > { %v4558_v16 = vmul.f32 -1.442695, %v1997_v23 }
0x16d5   : > { %v2010_v20 = vpop.permute.xlu1 %2009 }
0x16d6   : > { %v2012_v8 = vadd.f32 %v2010_v20, %v1976_v9  ;;  %v5915_v9 = vadd.f32 %v5910_v37, %v5719_v5 }
0x16d8   : > { %4848 = vtanh.f32 %v2012_v8  ;;  %v5943_v8 = vld [vmem:[%s6823_s4 + $0x10] ss:$8 sps:$4 sm:$0xff]  }
0x16d9   : > { %4850 = vpow2.f32 %v4558_v16  ;;  %6914 = vst [vmem:[#allocation27_spill] sm:$0xff] %v5943_v8 }
0x16e2   : > { %v4849_v46 = vpop.eup %4848 }
0x16e3   : > { %2016 = vrot.lane.b32.xlu1 %v4849_v46, %s6879_s23  ;;  %v4851_v21 = vpop.eup %4850  ;;  %v5967_v46 = vld [vmem:[%s6823_s4 + $0x30] ss:$8 sps:$4 sm:$0xff]  }
0x16e4   : > { %v2001_v59 = vadd.f32 1.0, %v4851_v21  ;;  %6918 = vst [vmem:[#allocation31_spill] sm:$0xff] %v5967_v46  ;;  %v5976_v21 = vld [vmem:[%s6827_s8] ss:$0 sm:$0xff] }
0x16e5   : > { %6919 = vst [vmem:[#allocation32_spill] sm:$0xff] %v5976_v21 }
0x16e6   : > { %4852 = vrcp.f32 %v2001_v59 }
0x16e7   : > { %2114 = vperm.xlu1 %4753, %v5893_v49  }
0x16eb   : > { %2124 = vperm.xlu1 %4753, %v5901_v11  }
0x16f0   : > { %v4853_v40 = vpop.eup %4852 }
0x16f1   : > { %v2014_v63 = vsub.f32 1.0, %v4853_v40  ;;  %v2020_v12 = vmul.f32 %v4853_v40, %v5713_v15  ;;  %v5923_v15 = vadd.f32 %v5918_v7, %v5723_v33 }
0x1755   : > { %v2017_v36 = vpop.permute.xlu1 %2016 }
0x1756   : > { %v2019_v39 = vmul.f32 %v2017_v36, %v2014_v63 }
0x1758   : > { %v5905_v44 = vadd.f32 %v2020_v12, %v2019_v39 }
0x175a   : > { %v2022_v52 = vpack.c.bf16 %v5905_v44, %v5905_v44 }
0x175c   : > { %2024 = vrot.lane.b32.xlu0 %v2022_v52, %s6879_s23 }
0x1760   : > { %2119 = vperm.xlu0 %4752, %v5915_v9  }
0x1764   : > { %2129 = vperm.xlu0 %4752, %v5923_v15  }
0x1766   : > { %v2115_v24 = vpop.permute.xlu1 %2114 }
0x17ce   : > { %v2025_v20 = vpop.permute.xlu0 %2024 }
0x17cf   : > { %4655 = vmatmul.mubr.msk.bf16.vlgmr.msra.gmra.mrb[12].mxu0 %vm572_vm4, %v2025_v20  ;;  %v2125_v20 = vpop.permute.xlu1 %2124 }
0x17d0   : > { %2525 = vmatpush1.bf16.msra.mxu0 %v5930_v0  ;;  %2556 = vmatprep.mubr.bf16.mxu0 %v6912_v17 }
0x17d1   : > { %2526 = vmatprep.subr.bf16.mxu0 %v5937_v58 }
0x17d4   : > { %2527 = vmatpush1.bf16.msra.mxu0 %v5943_v8 }
0x17d5   : > { %2528 = vmatprep.subr.bf16.mxu0 %v5949_v57 }
0x17d8   : > { %2529 = vmatpush1.bf16.msra.mxu0 %v5955_v56 }
0x17d9   : > { %2530 = vmatprep.subr.bf16.mxu0 %v5961_v61 }
0x17dc   : > { %2531 = vmatpush1.bf16.msra.mxu0 %v5967_v46 }
0x17dd   : > { %2532 = vmatprep.subr.bf16.mxu0 %v5394_v26 }
0x17df   : > { %v2120_v16 = vpop.permute.xlu0 %2119 }
0x17e0   : > { %2533 = vmatpush1.bf16.msra.mxu0 %v5397_v27 }
0x17e1   : > { %4666 = vmatprep.subr.bf16.mxu0 %v6911_v41 }
0x17e3   : > { %v2130_v27 = vpop.permute.xlu0 %2129 }
0x18a2   : > { %v2063_v23 = vpop.f32.mrb[12].mxu0 }
0x18a3   : > { %v5979_v59 = vadd.f32 %v5976_v21, %v2063_v23  ;;  %v4656_v40 = vpop.f32.mrb[13].mxu0  ;;  %v5989_v23 = vld [vmem:[%s6828_s9] ss:$0 sm:$0xff] }
0x18a4   : > { %v2066_v63 = vpop.f32.mrb[14].mxu0  ;;  %6920 = vst [vmem:[#allocation33_spill] sm:$0xff] %v5989_v23  ;;  %v2132_v40 = vmul.f32 %v5989_v23, %v2115_v24  ;;  %v2134_v61 = vmul.f32 %v5989_v23, %v2125_v20 }
0x18a5   : > { %v2082_v36 = vrot.slane %v5979_v59, %v5339_v6  ;;  %v4657_v39 = vpop.f32.mrb[15].mxu0  ;;  %v2133_v63 = vmul.f32 %v5989_v23, %v2120_v16 }
0x18a7   : > { %v2083_v12 = vcombine.high %v2082_v36, %v2082_v36  ;;  %v2090_v52 = vrot.slane %v2082_v36, %v5339_v6 }
0x18a9   : > { %v2097_v26 = vrot.slane %v2083_v12, %v5339_v6  ;;  %v2101_v46 = vrot.slane %v2090_v52, %v5404_v31  ;;  %v2135_v12 = vmul.f32 %v5989_v23, %v2130_v27 }
0x18ab   : > { %v2105_v39 = vrot.slane %v2097_v26, %v5404_v31  ;;  %v2108_v21 = vadd.f32 %v2101_v46, %v5492_v28  ;;  %v2109_v36 = vadd.f32 %v2101_v46, %v5496_v30  ;;  %v6003_v46 = vld [vmem:[%s6828_s9 + $0x1] ss:$0 sm:$0xff] }
0x18ac   : > { %6921 = vst [vmem:[#allocation34_spill] sm:$0xff] %v6003_v46 }
0x18ad   : > { %v2110_v52 = vadd.f32 %v5490_v25, %v2105_v39  ;;  %v2111_v6 = vadd.f32 %v5494_v29, %v2105_v39  ;;  %v2136_v56 = vadd.f32 %v2132_v40, %v2108_v21  ;;  %v2137_v57 = vadd.f32 %v2133_v63, %v2109_v36 }
0x18af   : > { %v2138_v8 = vadd.f32 %v2134_v61, %v2110_v52  ;;  %v2139_v24 = vadd.f32 %v2135_v12, %v2111_v6  ;;  %4854 = vtanh.f32 %v2136_v56 }
0x18b0   : > { %4856 = vtanh.f32 %v2137_v57 }
0x18b1   : > { %4858 = vtanh.f32 %v2138_v8 }
0x18b2   : > { %4860 = vtanh.f32 %v2139_v24 }
0x18b9   : > { %v4855_v26 = vpop.eup %4854 }
0x18ba   : > { %v4857_v16 = vpop.eup %4856  ;;  %v2144_v27 = vmul.f32 %v6003_v46, %v4855_v26 }
0x18bb   : > { %v4859_v20 = vpop.eup %4858  ;;  %v2145_v39 = vmul.f32 %v6003_v46, %v4857_v16 }
0x18bc   : > { %v4861_v21 = vpop.eup %4860  ;;  %v2148_v61 = vsel %vm938_vm7, %v2144_v27, 0.0  ;;  %v2146_v8 = vmul.f32 %v6003_v46, %v4859_v20 }
0x18bd   : > { %2149 = vadd.xlane.f32.xlu1 %v2148_v61  ;;  %v2151_v6 = vsel %vm938_vm7, %v2145_v39, 0.0  ;;  %v2147_v57 = vmul.f32 %v6003_v46, %v4861_v21 }
0x18be   : > { %2152 = vadd.xlane.f32.xlu0 %v2151_v6  ;;  %v2154_v40 = vsel %vm938_vm7, %v2146_v8, 0.0 }
0x18bf   : > { %v2157_v56 = vsel %vm938_vm7, %v2147_v57, 0.0 }
0x18c1   : > { %2158 = vadd.xlane.f32.xlu1 %v2157_v56 }
0x18c2   : > { %2155 = vadd.xlane.f32.xlu0 %v2154_v40 }
0x194a   : > { %v2150_v63 = vpop.xlane.xlu1 %2149 }
0x194b   : > { %v2160_v36 = vadd.f32 %v2150_v63, %v5551_v42  ;;  %v2153_v12 = vpop.xlane.xlu0 %2152 }
0x194c   : > { %v2161_v52 = vadd.f32 %v2153_v12, %v5559_v51 }
0x194d   : > { %2169 = vperm.xlu0 %4752, %v2160_v36  }
0x194e   : > { %2172 = vperm.xlu1 %4753, %v2161_v52   ;;  %v2159_v24 = vpop.xlane.xlu1 %2158 }
0x194f   : > { %v2163_v26 = vadd.f32 %v2159_v24, %v5556_v50  ;;  %v2156_v16 = vpop.xlane.xlu0 %2155 }
0x1950   : > { %v2162_v27 = vadd.f32 %v2156_v16, %v5554_v48 }
0x1951   : > { %2178 = vperm.xlu0 %4752, %v2163_v26  }
0x1952   : > { %2175 = vperm.xlu1 %4753, %v2162_v27  }
0x19cc   : > { %v2170_v20 = vpop.permute.xlu0 %2169 }
0x19cd   : > { %v2173_v39 = vpop.permute.xlu1 %2172  ;;  %v2183_v61 = vrot.slane %v2170_v20, %v5569_v62 }
0x19ce   : > { %v2187_v21 = vrot.slane %v2173_v39, %v5572_v1 }
0x19d0   : > { %v2179_v6 = vpop.permute.xlu0 %2178  ;;  %v2188_v40 = vsel %vm1008_vm9, %v2187_v21, %v2183_v61 }
0x19d1   : > { %v2176_v8 = vpop.permute.xlu1 %2175  ;;  %v2196_v57 = vrot.slane %v2179_v6, %v5572_v1 }
0x19d2   : > { %v2192_v56 = vrot.slane %v2176_v8, %v5569_v62 }
0x19d4   : > { %v2197_v63 = vsel %vm1008_vm9, %v2196_v57, %v2192_v56 }
0x19d5   : > { %v2198_v12 = vsel %vm1019_vm10, %v2197_v63, %v2188_v40  ;;  %v4561_v63 = vld [vmem:[%s5601_s19 + $0x2] ss:$0 sm:$0xff] }
0x19d6   : > { %v2200_v24 = vsel %vm1022_vm11, %v2198_v12, -inf  ;;  %v4562_v12 = vld [vmem:[%s5601_s19 + $0xa] ss:$0 sm:$0xff] }
0x19d7   : > { %2201 = vmax.xlane.f32.xlu1 %v2200_v24 }
0x19e8   : > { %2322 = vbcast.lane.b32.xlu1 %v4561_v63, 256 }
0x19ec   : > { %2333 = vbcast.lane.b32.xlu1 %v4562_v12, 256 }
0x19f0   : > { %2337 = vbcast.lane.b32.xlu1 %v4562_v12, 264 }
0x1a64   : > { %v2202_v16 = vpop.xlane.xlu1 %2201 }
0x1a65   : > { %v2207_v39 = vrot.slane %v2202_v16, %v5404_v31  ;;  %v2211_v20 = vrot.slane %v2202_v16, %v5407_v32 }
0x1a67   : > { %v6027_v48 = vsub.f32 %v2160_v36, %v2207_v39  ;;  %v6029_v50 = vsub.f32 %v2161_v52, %v2207_v39  ;;  %v6032_v8 = vsub.f32 %v2162_v27, %v2211_v20  ;;  %v2217_v61 = vsub.f32 %v2163_v26, %v2211_v20 }
0x1a69   : > { %v2218_v6 = vmul.f32 1.442695, %v6027_v48  ;;  %v2220_v21 = vmul.f32 1.442695, %v6029_v50  ;;  %v2222_v57 = vmul.f32 1.442695, %v6032_v8 }
0x1a6a   : > { %v2224_v56 = vmul.f32 1.442695, %v2217_v61 }
0x1a6b   : > { %4862 = vpow2.f32 %v2218_v6 }
0x1a6c   : > { %4864 = vpow2.f32 %v2220_v21 }
0x1a6d   : > { %4866 = vpow2.f32 %v2222_v57 }
0x1a6e   : > { %4868 = vpow2.f32 %v2224_v56 }
0x1a75   : > { %v4863_v40 = vpop.eup %4862 }
0x1a76   : > { %2231 = vperm.xlu0 %4752, %v4863_v40   ;;  %v4865_v36 = vpop.eup %4864 }
0x1a77   : > { %v4867_v52 = vpop.eup %4866 }
0x1a78   : > { %v4869_v27 = vpop.eup %4868 }
0x1a7a   : > { %2234 = vperm.xlu0 %4752, %v4865_v36  }
0x1a7e   : > { %2237 = vperm.xlu0 %4752, %v4867_v52  }
0x1a82   : > { %2240 = vperm.xlu0 %4752, %v4869_v27  }
0x1af5   : > { %v2232_v26 = vpop.permute.xlu0 %2231 }
0x1af6   : > { %v2245_v6 = vrot.slane %v2232_v26, %v5569_v62 }
0x1af9   : > { %v2235_v24 = vpop.permute.xlu0 %2234 }
0x1afa   : > { %v2249_v39 = vrot.slane %v2235_v24, %v5572_v1  ;;  %v2323_v24 = vpop.permute.xlu1 %2322 }
0x1afc   : > { %v2250_v56 = vsel %vm1008_vm9, %v2249_v39, %v2245_v6 }
0x1afd   : > { %v2238_v16 = vpop.permute.xlu0 %2237 }
0x1afe   : > { %v2254_v21 = vrot.slane %v2238_v16, %v5569_v62  ;;  %v2334_v29 = vpop.permute.xlu1 %2333 }
0x1b01   : > { %v2241_v20 = vpop.permute.xlu0 %2240 }
0x1b02   : > { %v2258_v57 = vrot.slane %v2241_v20, %v5572_v1 }
0x1b04   : > { %v2259_v51 = vsel %vm1008_vm9, %v2258_v57, %v2254_v21  ;;  %v2338_v57 = vpop.permute.xlu1 %2337 }
0x1b05   : > { %v2260_v42 = vsel %vm1019_vm10, %v2259_v51, %v2250_v56  ;;  %v1107_v51 = vmin.f32 %v5704_v55, 0.0  ;;  %v1701_v56 = vmin.f32 %v5888_v14, %v5704_v55 }
0x1b06   : > { %v2262_v12 = vsel %vm1022_vm11, %v2260_v42, 0.0  ;;  %v1109_v42 = vmin.f32 %v5709_v38, 0.0 }
0x1b07   : > { %2263 = vadd.xlane.f32.xlu0 %v2262_v12 }
0x1b1d   : > { %2326 = vbcast.lane.b32.xlu0 %v4561_v63, 264  ;;  %v1108_v63 = vmin.f32 %v5719_v5, 0.0 }
0x1b94   : > { %v2264_v46 = vpop.xlane.xlu0 %2263 }
0x1b95   : > { %4870 = vrcp.f32 %v2264_v46 }
0x1b96   : > { %4872 = vlog2.f32 %v2264_v46 }
0x1b9f   : > { %v4871_v26 = vpop.eup %4870 }
0x1ba0   : > { %v4873_v25 = vpop.eup %4872  ;;  %v2266_v16 = vmul.f32 %v4871_v26, %v2264_v46  ;;  %v1703_v46 = vmin.f32 %v5896_v10, %v5709_v38  ;;  %v2327_v38 = vpop.permute.xlu0 %2326 }
0x1ba1   : > { %v2297_v30 = vmul.f32 0.6931472, %v4873_v25 }
0x1ba2   : > { %v2267_v20 = vsub.f32 2.0, %v2266_v16  ;;  %v1704_v16 = vmin.f32 %v5918_v7, %v5723_v33  ;;  %v1707_v7 = vadd.f32 %v1703_v46, %v1109_v42 }
0x1ba3   : > { %v2302_v39 = vrot.slane %v2297_v30, %v5404_v31  ;;  %v2306_v6 = vrot.slane %v2297_v30, %v5407_v32  ;;  %v1702_v30 = vmin.f32 %v5910_v37, %v5719_v5  ;;  %v1705_v37 = vadd.f32 %v1701_v56, %v1107_v51 }
0x1ba4   : > { %v2268_v21 = vmul.f32 %v4871_v26, %v2267_v20  ;;  %v1110_v20 = vmin.f32 %v5723_v33, 0.0 }
0x1ba5   : > { %v2309_v25 = vsub.f32 %v6027_v48, %v2302_v39  ;;  %v2312_v12 = vsub.f32 %v2217_v61, %v2306_v6  ;;  %v2310_v55 = vsub.f32 %v6029_v50, %v2302_v39 }
0x1ba6   : > { %v2273_v28 = vrot.slane %v2268_v21, %v5404_v31  ;;  %v2277_v26 = vrot.slane %v2268_v21, %v5407_v32  ;;  %v1706_v21 = vadd.f32 %v1702_v30, %v1108_v63  ;;  %v1708_v58 = vadd.f32 %v1704_v16, %v1110_v20 }
0x1ba7   : > { %v2343_v23 = vadd.f32 %v2323_v24, %v2309_v25  ;;  %v2346_v14 = vadd.f32 %v2338_v57, %v2312_v12 }
0x1ba8   : > { %v6064_v10 = vmul.f32 %v4863_v40, %v2273_v28  ;;  %v6066_v48 = vmul.f32 %v4867_v52, %v2277_v26  ;;  %v6068_v61 = vmul.f32 %v4865_v36, %v2273_v28  ;;  %v6070_v5 = vmul.f32 %v4869_v27, %v2277_v26 }
0x1ba9   : > { %2352 = vperm.xlu1 %4753, %v2343_v23   ;;  %2361 = vperm.xlu0 %4752, %v2346_v14   ;;  %v2311_v40 = vsub.f32 %v6032_v8, %v2306_v6  ;;  %v2344_v52 = vadd.f32 %v2327_v38, %v2310_v55 }
0x1baa   : > { %v2284_v33 = vmin.f32 %v6064_v10, %v5893_v49  ;;  %v2286_v50 = vmin.f32 %v6066_v48, %v5901_v11  ;;  %v2285_v28 = vmin.f32 %v6068_v61, %v5915_v9  ;;  %v2287_v36 = vmin.f32 %v6070_v5, %v5923_v15 }
0x1bab   : > { %v2345_v42 = vadd.f32 %v2334_v29, %v2311_v40 }
0x1bac   : > { %v6081_v27 = vadd.f32 %v2284_v33, %v1705_v37  ;;  %v6083_v24 = vadd.f32 %v2286_v50, %v1707_v7  ;;  %v6085_v39 = vadd.f32 %v2285_v28, %v1706_v21  ;;  %v6087_v51 = vadd.f32 %v2287_v36, %v1708_v58 }
0x1bad   : > { %2355 = vperm.xlu1 %4753, %v2344_v52  }
0x1bb1   : > { %2358 = vperm.xlu1 %4753, %v2345_v42  }
0x1c28   : > { %v2353_v63 = vpop.permute.xlu1 %2352  ;;  %v2362_v6 = vpop.permute.xlu0 %2361 }
0x1c29   : > { %v2379_v46 = vrot.slane %v2362_v6, %v5572_v1  ;;  %v2366_v25 = vrot.slane %v2353_v63, %v5569_v62 }
0x1c2c   : > { %v2356_v8 = vpop.permute.xlu1 %2355 }
0x1c2d   : > { %v2370_v57 = vrot.slane %v2356_v8, %v5572_v1 }
0x1c2f   : > { %v2371_v30 = vsel %vm1008_vm9, %v2370_v57, %v2366_v25 }
0x1c30   : > { %v2359_v56 = vpop.permute.xlu1 %2358 }
0x1c31   : > { %v2375_v12 = vrot.slane %v2359_v56, %v5569_v62 }
0x1c33   : > { %v2380_v16 = vsel %vm1008_vm9, %v2379_v46, %v2375_v12 }
0x1c34   : > { %v2381_v58 = vsel %vm1019_vm10, %v2380_v16, %v2371_v30  ;;  %v4564_v16 = vsel %vm2498_vm1, 1.0, %v6911_v41 }
0x1c35   : > { %v2383_v29 = vsel %vm1022_vm11, %v2381_v58, -inf  ;;  %v4560_v58 = vmul.f32 -1.442695, %v5979_v59 }
0x1c36   : > { %2384 = vmax.xlane.f32.xlu1 %v2383_v29 }
0x1c37   : > { %4874 = vpow2.f32 %v4560_v58 }
0x1c41   : > { %v4875_v29 = vpop.eup %4874 }
0x1cc3   : > { %v2385_v26 = vpop.xlane.xlu1 %2384 }
0x1cc4   : > { %v2390_v20 = vrot.slane %v2385_v26, %v5404_v31  ;;  %v2394_v38 = vrot.slane %v2385_v26, %v5407_v32  ;;  %v2072_v26 = vadd.f32 1.0, %v4875_v29 }
0x1cc6   : > { %vm2397_vm8 = vcmp.eq.f32.partialorder %v2343_v23, %v2390_v20  ;;  %vm2398_vm12 = vcmp.eq.f32.partialorder %v2344_v52, %v2390_v20  ;;  %vm2399_vm13 = vcmp.eq.f32.partialorder %v2345_v42, %v2394_v38  ;;  %vm2400_vm14 = vcmp.eq.f32.partialorder %v2346_v14, %v2394_v38 }
0x1cc7   : > { %v2401_v55 = vsel %vm2397_vm8, %v5628_v4, 16  ;;  %v2402_v37 = vsel %vm2398_vm12, %v5633_v18, 16  ;;  %v2403_v7 = vsel %vm2399_vm13, %v5628_v4, 16  ;;  %v2404_v21 = vsel %vm2400_vm14, %v5633_v18, 16 }
0x1cc8   : > { %2406 = vperm.xlu0 %4752, %v2401_v55   ;;  %4876 = vrcp.f32 %v2072_v26  ;;  %vm4220_vm8 = vcmask 1043456  }
0x1ccc   : > { %2409 = vperm.xlu0 %4752, %v2402_v37  }
0x1cd0   : > { %2412 = vperm.xlu0 %4752, %v2403_v7  }
0x1cd4   : > { %2415 = vperm.xlu0 %4752, %v2404_v21   ;;  %v4877_v21 = vpop.eup %4876 }
0x1d47   : > { %v2407_v33 = vpop.permute.xlu0 %2406 }
0x1d48   : > { %v2420_v36 = vrot.slane %v2407_v33, %v5569_v62  ;;  %v4228_v33 = vrot.slane %v5840_v54, 6 }
0x1d4b   : > { %v2410_v50 = vpop.permute.xlu0 %2409 }
0x1d4c   : > { %v2424_v40 = vrot.slane %v2410_v50, %v5572_v1  ;;  %v4208_v50 = vrot.slane %v5832_v13, 6 }
0x1d4e   : > { %v2425_v42 = vsel %vm1008_vm9, %v2424_v40, %v2420_v36 }
0x1d4f   : > { %v2413_v23 = vpop.permute.xlu0 %2412 }
0x1d50   : > { %v2429_v52 = vrot.slane %v2413_v23, %v5569_v62 }
0x1d53   : > { %v2416_v28 = vpop.permute.xlu0 %2415 }
0x1d54   : > { %v2433_v63 = vrot.slane %v2416_v28, %v5572_v1 }
0x1d56   : > { %v2434_v8 = vsel %vm1008_vm9, %v2433_v63, %v2429_v52  ;;  %v4219_v63 = vsel %vm715_vm0, %v5651_v3, %v4208_v50 }
0x1d57   : > { %v2435_v14 = vsel %vm1019_vm10, %v2434_v8, %v2425_v42  ;;  %v6922_v42 = vld [vmem:[#allocation25_spill] sm:$0xff] }
0x1d58   : > { %v2436_v6 = vsel %vm1022_vm11, %v2435_v14, 2147483647  ;;  %v4237_v8 = vsel %vm715_vm0, %v6922_v42, %v4228_v33 }
0x1d59   : > { %v2438_v57 = vshra.s32 %v2436_v6, 16  ;;  %v2437_v46 = vand.u32 65535, %v2436_v6 }
0x1d5b   : > { %v2440_v56 = vcvt.s32.f32 %v2438_v57  ;;  %v2439_v12 = vcvt.s32.f32 %v2437_v46 }
0x1d5d   : > { %2441 = vmin.xlane.f32.xlu0 %v2440_v56 }
0x1dea   : > { %v2442_v25 = vpop.xlane.xlu0 %2441 }
0x1deb   : > { %vm2443_vm15 = vcmp.eq.f32.partialorder %v2440_v56, %v2442_v25  ;;  %v2448_v20 = vcvt.f32.s32 %v2442_v25 }
0x1dec   : > { %v2444_v30 = vsel %vm2443_vm15, %v2439_v12, inf }
0x1ded   : > { %2445 = vmin.xlane.f32.xlu1 %v2444_v30  ;;  %v2449_v38 = vshll.u32 %v2448_v20, 16 }
0x1dfe   : > { %2502 = vrot.lane.b32.xlu1 %v4564_v16, %s6883_s20 }
0x1e7a   : > { %v2446_v55 = vpop.xlane.xlu1 %2445 }
0x1e7b   : > { %v2447_v37 = vcvt.f32.s32 %v2446_v55 }
0x1e7d   : > { %v2450_v7 = vadd.s32 %v2449_v38, %v2447_v37 }
0x1e7e   : > { %v2503_v23 = vpop.permute.xlu1 %2502 }
0x1e7f   : > { %vm2451_vm6 = vcmp.eq.s32.totalorder %v5564_v53, %v2450_v7  ;;  %v2505_v40 = vmul.f32 %v4877_v21, %v2503_v23 }
0x1e80   : > { %v4563_v59 = vsel %vm2451_vm6, 1.0, %v6911_v41  ;;  %vm3081_vm6 = vcmp.lt.s32.totalorder %v5564_v53, 3 }
0x1e81   : > { %v4230_v28 = vrot.slane %v2505_v40, 4  ;;  %v2457_v36 = vrot.slane %v4563_v59, %v5404_v31  ;;  %v4211_v52 = vrot.slane %v4563_v59, 4  ;;  %v2468_v14 = vrot.slane %v4563_v59, %v5407_v32 }
0x1e83   : > { %2463 = vbcast.lane.b32.xlu1 %v2457_v36, 264  ;;  %2459 = vbcast.lane.b32.xlu0 %v2457_v36, 256  ;;  %v6125_v13 = vsel %vm4220_vm8, %v4219_v63, %v4211_v52  ;;  %v6128_v54 = vsel %vm4220_vm8, %v4237_v8, %v4230_v28 }
0x1e87   : > { %2470 = vbcast.lane.b32.xlu1 %v2468_v14, 256  ;;  %2515 = vrot.lane.b32.xlu0 %v5905_v44, %s6923_s14 }
0x1e8b   : > { %2474 = vbcast.lane.b32.xlu1 %v2468_v14, 264 }
0x1e8f   : > { %2511 = vrot.lane.b32.xlu1 %v2505_v40, %s6883_s20 }
0x1ef5   : > { %v2460_v3 = vpop.permute.xlu0 %2459  ;;  %v2464_v6 = vpop.permute.xlu1 %2463 }
0x1ef6   : > { %v2476_v57 = vmul.f32 %v2460_v3, %v5664_v45  ;;  %v2477_v56 = vmul.f32 %v2464_v6, %v5667_v2 }
0x1ef8   : > { %v2480_v46 = vsel %vm572_vm4, %v2476_v57, 0.0  ;;  %v2481_v25 = vsel %vm572_vm4, %v2477_v56, 0.0 }
0x1ef9   : > { %v2482_v12 = vadd.f32 %v2481_v25, %v2480_v46  ;;  %v2471_v30 = vpop.permute.xlu1 %2470  ;;  %v2516_v8 = vpop.permute.xlu0 %2515 }
0x1efa   : > { %v2478_v58 = vmul.f32 %v2471_v30, %v5672_v22 }
0x1efb   : > { %v2483_v16 = vrot.slane %v2482_v12, 4 }
0x1efc   : > { %v2489_v55 = vsel %vm572_vm4, %v2478_v58, 0.0 }
0x1efd   : > { %v2484_v29 = vadd.f32 %v2483_v16, %v2482_v12  ;;  %v2475_v26 = vpop.permute.xlu1 %2474 }
0x1efe   : > { %v2479_v20 = vmul.f32 %v2475_v26, %v5677_v47 }
0x1eff   : > { %v2485_v37 = vrot.slane %v2484_v29, 2 }
0x1f00   : > { %v2490_v38 = vsel %vm572_vm4, %v2479_v20, 0.0 }
0x1f01   : > { %v2491_v7 = vadd.f32 %v2490_v38, %v2489_v55  ;;  %v2486_v33 = vadd.f32 %v2485_v37, %v2484_v29  ;;  %v2512_v42 = vpop.permute.xlu1 %2511 }
0x1f03   : > { %v2492_v21 = vrot.slane %v2491_v7, 4  ;;  %v2487_v59 = vrot.slane %v2486_v33, 1 }
0x1f05   : > { %v2493_v50 = vadd.f32 %v2492_v21, %v2491_v7  ;;  %v2488_v36 = vadd.f32 %v2487_v59, %v2486_v33  ;;  %v6161_v7 = vadd.f32 %v6064_v10, %v5893_v49  ;;  %v6166_v21 = vadd.f32 %v6066_v48, %v5901_v11 }
0x1f06   : > { %v6177_v48 = vadd.f32 %v6068_v61, %v5915_v9  ;;  %v6927_v9 = vld [vmem:[#allocation28_spill] sm:$0xff]  ;;  %v6928_v61 = vld [vmem:[#allocation29_spill] sm:$0xff] }
0x1f07   : > { %v2494_v23 = vrot.slane %v2493_v50, 2 }
0x1f09   : > { %v2495_v40 = vadd.f32 %v2494_v23, %v2493_v50 }
0x1f0b   : > { %v2496_v28 = vrot.slane %v2495_v40, 1 }
0x1f0d   : > { %v2497_v52 = vadd.f32 %v2496_v28, %v2495_v40 }
0x1f0f   : > { %v2508_v63 = vsel %vm1019_vm10, %v2497_v52, %v2488_v36 }
0x1f10   : > { %v2518_v14 = vsel %vm572_vm4, %v2508_v63, %v2512_v42  ;;  %v6182_v42 = vadd.f32 %v6070_v5, %v5923_v15  ;;  %v6930_v15 = vld [vmem:[#allocation31_spill] sm:$0xff] }
0x1f11   : > { %v2519_v3 = vsel %vm652_vm2, %v2518_v14, %v2516_v8  ;;  %v6925_v8 = vld [vmem:[#allocation26_spill] sm:$0xff]  ;;  %v6926_v14 = vld [vmem:[#allocation27_spill] sm:$0xff] }
0x1f12   : > { %v2520_v6 = vpack.c.bf16 %v2519_v3, %v2519_v3  ;;  %v6929_v3 = vld [vmem:[#allocation30_spill] sm:$0xff]  ;;  %v6931_v5 = vld [vmem:[#allocation15_spill] sm:$0xff] }
0x1f14   : > { %4565 = vmatmul.mubr.msk.bf16.vlgmr.msra.gmra.mrb[16].mxu0 %vm711_vm3, %v2520_v6  ;;  %v6932_v6 = vld [vmem:[#allocation16_spill] sm:$0xff] }
0x1f15   : > { %4667 = vmatpush3.bf16.msra.mxu0 %v5859_v19  ;;  %4670 = vmatprep.mubr.msk.bf16.mxu0 %vm5146_vm5, %v6911_v41 }
0x1f16   : > { %4668 = vmatprep.subr.bf16.mxu0 %v6911_v41 }
0x1f19   : > { %4669 = vmatpush3.bf16.msra.mxu0 %v5868_v43 }
0x1f1a   : > { %3690 = vmatprep.subr.bf16.mxu0 %v5874_v60 }
0x1fe7   : > { %v2558_v57 = vpop.f32.mrb[16].mxu0 }
0x1fe8   : > { %v2559_v56 = vadd.f32 %v2558_v57, %v5413_v34  ;;  %v2560_v46 = vpop.f32.mrb[17].mxu0 }
0x1fe9   : > { %v2561_v25 = vadd.f32 %v2560_v46, %v5416_v35  ;;  %v2562_v12 = vpop.f32.mrb[18].mxu0  ;;  %v6933_v46 = vld [vmem:[#allocation32_spill] sm:$0xff] }
0x1fea   : > { %v2563_v30 = vpop.f32.mrb[19].mxu0  ;;  %2566 = vrot.lane.b32.xlu1 %v2559_v56, %s6881_s13 }
0x1feb   : > { %2587 = vrot.lane.b32.xlu0 %v2561_v25, %s6879_s23 }
0x1fef   : > { %2577 = vrot.lane.b32.xlu0 %v2561_v25, %s6881_s13 }
0x205c   : > { %v2567_v19 = vpop.permute.xlu1 %2566 }
0x205d   : > { %v2569_v16 = vadd.f32 %v2567_v19, %v2559_v56  ;;  %v2588_v26 = vpop.permute.xlu0 %2587  ;;  %v6934_v19 = vld [vmem:[#allocation14_spill] sm:$0xff] }
0x205f   : > { %v4566_v58 = vmul.f32 -1.442695, %v2569_v16 }
0x2061   : > { %4878 = vpow2.f32 %v4566_v58  ;;  %v2578_v33 = vpop.permute.xlu0 %2577 }
0x2062   : > { %v2580_v50 = vadd.f32 %v2578_v33, %v2559_v56 }
0x2064   : > { %v4567_v23 = vmul.f32 -1.442695, %v2580_v50 }
0x206b   : > { %v4879_v43 = vpop.eup %4878 }
0x206c   : > { %v2573_v60 = vadd.f32 1.0, %v4879_v43 }
0x206e   : > { %4880 = vrcp.f32 %v2573_v60 }
0x2078   : > { %v4881_v29 = vpop.eup %4880 }
0x2079   : > { %v2590_v20 = vmul.f32 %v4881_v29, %v2588_v26 }
0x207b   : > { %2592 = vrot.lane.b32.xlu1 %v2590_v20, %s6924_s27 }
0x20ed   : > { %v2593_v55 = vpop.permute.xlu1 %2592 }
0x20ee   : > { %v2595_v38 = vadd.f32 %v2593_v55, %v2559_v56 }
0x20f0   : > { %4882 = vtanh.f32 %v2595_v38  ;;  %v6935_v38 = vld [vmem:[#allocation33_spill] sm:$0xff] }
0x20f1   : > { %4884 = vpow2.f32 %v4567_v23  ;;  %v6936_v23 = vld [vmem:[#allocation18_spill] sm:$0xff] }
0x20fa   : > { %v4883_v37 = vpop.eup %4882 }
0x20fb   : > { %2599 = vrot.lane.b32.xlu1 %v4883_v37, %s6879_s23  ;;  %v4885_v40 = vpop.eup %4884 }
0x20fc   : > { %v2584_v59 = vadd.f32 1.0, %v4885_v40 }
0x20fe   : > { %4886 = vrcp.f32 %v2584_v59  ;;  %v6937_v59 = vld [vmem:[#allocation20_spill] sm:$0xff] }
0x20ff   : > { %2697 = vperm.xlu1 %4753, %v6161_v7  }
0x2103   : > { %2707 = vperm.xlu1 %4753, %v6166_v21  }
0x2108   : > { %v4887_v28 = vpop.eup %4886 }
0x2109   : > { %v2597_v36 = vsub.f32 1.0, %v4887_v28  ;;  %v2603_v10 = vmul.f32 %v4887_v28, %v5905_v44 }
0x216d   : > { %v2600_v52 = vpop.permute.xlu1 %2599 }
0x216e   : > { %v2602_v49 = vmul.f32 %v2600_v52, %v2597_v36 }
0x2170   : > { %v6170_v63 = vadd.f32 %v2603_v10, %v2602_v49  ;;  %v6938_v49 = vld [vmem:[#allocation17_spill] sm:$0xff] }
0x2172   : > { %v2605_v11 = vpack.c.bf16 %v6170_v63, %v6170_v63 }
0x2174   : > { %2607 = vrot.lane.b32.xlu0 %v2605_v11, %s6879_s23  ;;  %v6939_v11 = vld [vmem:[#allocation19_spill] sm:$0xff] }
0x2178   : > { %2702 = vperm.xlu0 %4752, %v6177_v48  }
0x217c   : > { %2712 = vperm.xlu0 %4752, %v6182_v42  }
0x21e6   : > { %v2608_v44 = vpop.permute.xlu0 %2607 }
0x21e7   : > { %4663 = vmatmul.mubr.msk.bf16.vlgmr.msra.gmra.mrb[12].mxu1 %vm572_vm4, %v2608_v44 }
0x21e8   : > { %3108 = vmatpush1.bf16.msra.mxu1 %v5930_v0  ;;  %3139 = vmatprep.mubr.bf16.mxu1 %v6912_v17  ;;  %v2698_v0 = vpop.permute.xlu1 %2697 }
0x21e9   : > { %3109 = vmatprep.subr.bf16.mxu1 %v6925_v8  ;;  %v2715_v37 = vmul.f32 %v6935_v38, %v2698_v0  ;;  %v6940_v0 = vld [vmem:[#allocation34_spill] sm:$0xff] }
0x21ec   : > { %3110 = vmatpush1.bf16.msra.mxu1 %v6926_v14  ;;  %v2708_v29 = vpop.permute.xlu1 %2707 }
0x21ed   : > { %3111 = vmatprep.subr.bf16.mxu1 %v6927_v9  ;;  %v2717_v36 = vmul.f32 %v6935_v38, %v2708_v29 }
0x21f0   : > { %3112 = vmatpush1.bf16.msra.mxu1 %v6928_v61 }
0x21f1   : > { %3113 = vmatprep.subr.bf16.mxu1 %v6929_v3 }
0x21f4   : > { %3114 = vmatpush1.bf16.msra.mxu1 %v6930_v15 }
0x21f5   : > { %3115 = vmatprep.subr.bf16.mxu1 %v6931_v5 }
0x21f7   : > { %v2703_v56 = vpop.permute.xlu0 %2702 }
0x21f8   : > { %3116 = vmatpush1.bf16.msra.mxu1 %v6932_v6  ;;  %v2716_v33 = vmul.f32 %v6935_v38, %v2703_v56 }
0x21f9   : > { %4674 = vmatprep.subr.bf16.mxu1 %v6911_v41 }
0x21fb   : > { %v2713_v26 = vpop.permute.xlu0 %2712 }
0x21fc   : > { %v2718_v52 = vmul.f32 %v6935_v38, %v2713_v26 }
0x22ba   : > { %v2646_v57 = vpop.f32.mrb[12].mxu1 }
0x22bb   : > { %v6198_v25 = vadd.f32 %v6933_v46, %v2646_v57  ;;  %v4664_v12 = vpop.f32.mrb[13].mxu1 }
0x22bc   : > { %v2649_v30 = vpop.f32.mrb[14].mxu1 }
0x22bd   : > { %v2665_v16 = vrot.slane %v6198_v25, %v6934_v19  ;;  %v4665_v58 = vpop.f32.mrb[15].mxu1 }
0x22bf   : > { %v2666_v43 = vcombine.high %v2665_v16, %v2665_v16  ;;  %v2673_v60 = vrot.slane %v2665_v16, %v6934_v19 }
0x22c1   : > { %v2680_v20 = vrot.slane %v2666_v43, %v6934_v19  ;;  %v2684_v55 = vrot.slane %v2673_v60, %v5404_v31 }
0x22c3   : > { %v2688_v50 = vrot.slane %v2680_v20, %v5404_v31  ;;  %v2691_v40 = vadd.f32 %v2684_v55, %v6936_v23  ;;  %v2692_v28 = vadd.f32 %v2684_v55, %v6937_v59  ;;  %v6941_v20 = vld [vmem:[#allocation21_spill] sm:$0xff] }
0x22c5   : > { %v2693_v10 = vadd.f32 %v6938_v49, %v2688_v50  ;;  %v2694_v44 = vadd.f32 %v6939_v11, %v2688_v50  ;;  %v2719_v8 = vadd.f32 %v2715_v37, %v2691_v40  ;;  %v2720_v14 = vadd.f32 %v2716_v33, %v2692_v28  ;;  %v6942_v37 = vld [vmem:[#allocation24_spill] sm:$0xff]  ;;  %v6943_v40 = vld [vmem:[#allocation23_spill] sm:$0xff] }
0x22c7   : > { %v2721_v9 = vadd.f32 %v2717_v36, %v2693_v10  ;;  %v2722_v61 = vadd.f32 %v2718_v52, %v2694_v44  ;;  %4888 = vtanh.f32 %v2719_v8  ;;  %v6944_v52 = vld [vmem:[#allocation22_spill] sm:$0xff] }
0x22c8   : > { %4890 = vtanh.f32 %v2720_v14 }
0x22c9   : > { %4892 = vtanh.f32 %v2721_v9 }
0x22ca   : > { %4894 = vtanh.f32 %v2722_v61 }
0x22d1   : > { %v4889_v3 = vpop.eup %4888 }
0x22d2   : > { %v4891_v15 = vpop.eup %4890  ;;  %v2727_v57 = vmul.f32 %v6940_v0, %v4889_v3 }
0x22d3   : > { %v4893_v56 = vpop.eup %4892  ;;  %v2728_v46 = vmul.f32 %v6940_v0, %v4891_v15 }
0x22d4   : > { %v4895_v12 = vpop.eup %4894  ;;  %v2731_v30 = vsel %vm938_vm7, %v2727_v57, 0.0  ;;  %v2729_v58 = vmul.f32 %v6940_v0, %v4893_v56 }
0x22d5   : > { %2732 = vadd.xlane.f32.xlu1 %v2731_v30  ;;  %v2734_v16 = vsel %vm938_vm7, %v2728_v46, 0.0  ;;  %v2730_v43 = vmul.f32 %v6940_v0, %v4895_v12 }
0x22d6   : > { %2735 = vadd.xlane.f32.xlu0 %v2734_v16  ;;  %v2737_v29 = vsel %vm938_vm7, %v2729_v58, 0.0 }
0x22d7   : > { %v2740_v60 = vsel %vm938_vm7, %v2730_v43, 0.0 }
0x22d9   : > { %2741 = vadd.xlane.f32.xlu1 %v2740_v60 }
0x22da   : > { %2738 = vadd.xlane.f32.xlu0 %v2737_v29 }
0x2362   : > { %v2733_v26 = vpop.xlane.xlu1 %2732 }
0x2363   : > { %v2743_v55 = vadd.f32 %v2733_v26, %v6941_v20  ;;  %v2736_v38 = vpop.xlane.xlu0 %2735 }
0x2364   : > { %v2744_v33 = vadd.f32 %v2736_v38, %v6942_v37 }
0x2365   : > { %2752 = vperm.xlu0 %4752, %v2743_v55  }
0x2366   : > { %2755 = vperm.xlu1 %4753, %v2744_v33   ;;  %v2742_v50 = vpop.xlane.xlu1 %2741 }
0x2367   : > { %v2746_v28 = vadd.f32 %v2742_v50, %v6943_v40  ;;  %v2739_v36 = vpop.xlane.xlu0 %2738 }
0x2368   : > { %v2745_v10 = vadd.f32 %v2739_v36, %v6944_v52 }
0x2369   : > { %2761 = vperm.xlu0 %4752, %v2746_v28  }
0x236a   : > { %2758 = vperm.xlu1 %4753, %v2745_v10  }
0x23e4   : > { %v2753_v44 = vpop.permute.xlu0 %2752 }
0x23e5   : > { %v2756_v8 = vpop.permute.xlu1 %2755  ;;  %v2766_v9 = vrot.slane %v2753_v44, %v5569_v62 }
0x23e6   : > { %v2770_v14 = vrot.slane %v2756_v8, %v5572_v1 }
0x23e8   : > { %v2762_v61 = vpop.permute.xlu0 %2761  ;;  %v2771_v57 = vsel %vm1008_vm9, %v2770_v14, %v2766_v9  ;;  %v4570_v14 = vld [vmem:[%s5601_s19 + $0x3] ss:$0 sm:$0xff]  ;;  %v4571_v9 = vld [vmem:[%s5601_s19 + $0xb] ss:$0 sm:$0xff] }
0x23e9   : > { %v2759_v3 = vpop.permute.xlu1 %2758  ;;  %v2779_v15 = vrot.slane %v2762_v61, %v5572_v1 }
0x23ea   : > { %v2775_v0 = vrot.slane %v2759_v3, %v5569_v62 }
0x23ec   : > { %v2780_v56 = vsel %vm1008_vm9, %v2779_v15, %v2775_v0 }
0x23ed   : > { %v2781_v46 = vsel %vm1019_vm10, %v2780_v56, %v2771_v57 }
0x23ee   : > { %v2783_v12 = vsel %vm1022_vm11, %v2781_v46, -inf }
0x23ef   : > { %2784 = vmax.xlane.f32.xlu1 %v2783_v12 }
0x2400   : > { %2905 = vbcast.lane.b32.xlu1 %v4570_v14, 256 }
0x2404   : > { %2916 = vbcast.lane.b32.xlu1 %v4571_v9, 256 }
0x2408   : > { %2920 = vbcast.lane.b32.xlu1 %v4571_v9, 264 }
0x247c   : > { %v2785_v30 = vpop.xlane.xlu1 %2784 }
0x247d   : > { %v2790_v16 = vrot.slane %v2785_v30, %v5404_v31  ;;  %v2794_v58 = vrot.slane %v2785_v30, %v5407_v32 }
0x247f   : > { %v2797_v43 = vsub.f32 %v2743_v55, %v2790_v16  ;;  %v6236_v60 = vsub.f32 %v2744_v33, %v2790_v16  ;;  %v6238_v26 = vsub.f32 %v2745_v10, %v2794_v58  ;;  %v2800_v50 = vsub.f32 %v2746_v28, %v2794_v58 }
0x2481   : > { %v2801_v29 = vmul.f32 1.442695, %v2797_v43  ;;  %v2803_v38 = vmul.f32 1.442695, %v6236_v60  ;;  %v2805_v36 = vmul.f32 1.442695, %v6238_v26 }
0x2482   : > { %v2807_v44 = vmul.f32 1.442695, %v2800_v50 }
0x2483   : > { %4896 = vpow2.f32 %v2801_v29 }
0x2484   : > { %4898 = vpow2.f32 %v2803_v38  ;;  %v2906_v38 = vpop.permute.xlu1 %2905 }
0x2485   : > { %4900 = vpow2.f32 %v2805_v36 }
0x2486   : > { %4902 = vpow2.f32 %v2807_v44 }
0x2488   : > { %v2917_v36 = vpop.permute.xlu1 %2916 }
0x248d   : > { %v4897_v8 = vpop.eup %4896 }
0x248e   : > { %2814 = vperm.xlu0 %4752, %v4897_v8   ;;  %v4899_v55 = vpop.eup %4898 }
0x248f   : > { %v4901_v33 = vpop.eup %4900 }
0x2490   : > { %v4903_v10 = vpop.eup %4902 }
0x2492   : > { %2817 = vperm.xlu0 %4752, %v4899_v55  }
0x2496   : > { %2820 = vperm.xlu0 %4752, %v4901_v33  }
0x249a   : > { %2823 = vperm.xlu0 %4752, %v4903_v10  }
0x250d   : > { %v2815_v28 = vpop.permute.xlu0 %2814 }
0x250e   : > { %v2828_v57 = vrot.slane %v2815_v28, %v5569_v62 }
0x2511   : > { %v2818_v61 = vpop.permute.xlu0 %2817 }
0x2512   : > { %v2832_v15 = vrot.slane %v2818_v61, %v5572_v1 }
0x2514   : > { %v2833_v12 = vsel %vm1008_vm9, %v2832_v15, %v2828_v57 }
0x2515   : > { %v2821_v3 = vpop.permute.xlu0 %2820 }
0x2516   : > { %v2837_v56 = vrot.slane %v2821_v3, %v5569_v62 }
0x2519   : > { %v2824_v0 = vpop.permute.xlu0 %2823 }
0x251a   : > { %v2841_v46 = vrot.slane %v2824_v0, %v5572_v1 }
0x251c   : > { %v2842_v30 = vsel %vm1008_vm9, %v2841_v46, %v2837_v56  ;;  %v2921_v56 = vpop.permute.xlu1 %2920 }
0x251d   : > { %v2843_v16 = vsel %vm1019_vm10, %v2842_v30, %v2833_v12 }
0x251e   : > { %v2845_v58 = vsel %vm1022_vm11, %v2843_v16, 0.0 }
0x251f   : > { %2846 = vadd.xlane.f32.xlu0 %v2845_v58 }
0x2535   : > { %2909 = vbcast.lane.b32.xlu0 %v4570_v14, 264 }
0x25ac   : > { %v2847_v29 = vpop.xlane.xlu0 %2846 }
0x25ad   : > { %4904 = vrcp.f32 %v2847_v29 }
0x25ae   : > { %4906 = vlog2.f32 %v2847_v29 }
0x25b0   : > { %v2910_v40 = vpop.permute.xlu0 %2909 }
0x25b7   : > { %v4905_v44 = vpop.eup %4904 }
0x25b8   : > { %v4907_v9 = vpop.eup %4906  ;;  %v2849_v28 = vmul.f32 %v4905_v44, %v2847_v29 }
0x25b9   : > { %v2880_v61 = vmul.f32 0.6931472, %v4907_v9 }
0x25ba   : > { %v2850_v3 = vsub.f32 2.0, %v2849_v28 }
0x25bb   : > { %v2885_v15 = vrot.slane %v2880_v61, %v5404_v31  ;;  %v2889_v0 = vrot.slane %v2880_v61, %v5407_v32 }
0x25bc   : > { %v2851_v57 = vmul.f32 %v4905_v44, %v2850_v3 }
0x25bd   : > { %v2892_v46 = vsub.f32 %v2797_v43, %v2885_v15  ;;  %v2895_v12 = vsub.f32 %v2800_v50, %v2889_v0  ;;  %v2893_v58 = vsub.f32 %v6236_v60, %v2885_v15  ;;  %v2894_v60 = vsub.f32 %v6238_v26, %v2889_v0 }
0x25be   : > { %v2856_v14 = vrot.slane %v2851_v57, %v5404_v31  ;;  %v2860_v30 = vrot.slane %v2851_v57, %v5407_v32 }
0x25bf   : > { %v2926_v16 = vadd.f32 %v2906_v38, %v2892_v46  ;;  %v2929_v52 = vadd.f32 %v2921_v56, %v2895_v12  ;;  %v2927_v38 = vadd.f32 %v2910_v40, %v2893_v58  ;;  %v2928_v40 = vadd.f32 %v2917_v36, %v2894_v60 }
0x25c0   : > { %v6257_v29 = vmul.f32 %v4897_v8, %v2856_v14  ;;  %v6259_v9 = vmul.f32 %v4901_v33, %v2860_v30  ;;  %v6261_v28 = vmul.f32 %v4899_v55, %v2856_v14  ;;  %v6263_v61 = vmul.f32 %v4903_v10, %v2860_v30 }
0x25c1   : > { %2935 = vperm.xlu1 %4753, %v2926_v16   ;;  %2944 = vperm.xlu0 %4752, %v2929_v52  }
0x25c2   : > { %v2867_v43 = vmin.f32 %v6257_v29, %v6161_v7  ;;  %v2869_v50 = vmin.f32 %v6259_v9, %v6166_v21  ;;  %v2868_v8 = vmin.f32 %v6261_v28, %v6177_v48  ;;  %v2870_v55 = vmin.f32 %v6263_v61, %v6182_v42 }
0x25c4   : > { %v6275_v33 = vadd.f32 %v2867_v43, %v6081_v27  ;;  %v6278_v10 = vadd.f32 %v2869_v50, %v6083_v24  ;;  %v6281_v44 = vadd.f32 %v2868_v8, %v6085_v39  ;;  %v6284_v3 = vadd.f32 %v2870_v55, %v6087_v51 }
0x25c5   : > { %2938 = vperm.xlu1 %4753, %v2927_v38  }
0x25c9   : > { %2941 = vperm.xlu1 %4753, %v2928_v40  }
0x2640   : > { %v2936_v26 = vpop.permute.xlu1 %2935  ;;  %v2945_v0 = vpop.permute.xlu0 %2944 }
0x2641   : > { %v2962_v27 = vrot.slane %v2945_v0, %v5572_v1  ;;  %v2949_v24 = vrot.slane %v2936_v26, %v5569_v62 }
0x2644   : > { %v2939_v15 = vpop.permute.xlu1 %2938 }
0x2645   : > { %v2953_v57 = vrot.slane %v2939_v15, %v5572_v1 }
0x2647   : > { %v2954_v39 = vsel %vm1008_vm9, %v2953_v57, %v2949_v24 }
0x2648   : > { %v2942_v56 = vpop.permute.xlu1 %2941 }
0x2649   : > { %v2958_v46 = vrot.slane %v2942_v56, %v5569_v62 }
0x264b   : > { %v2963_v12 = vsel %vm1008_vm9, %v2962_v27, %v2958_v46 }
0x264c   : > { %v2964_v51 = vsel %vm1019_vm10, %v2963_v12, %v2954_v39 }
0x264d   : > { %v2966_v36 = vsel %vm1022_vm11, %v2964_v51, -inf }
0x264e   : > { %2967 = vmax.xlane.f32.xlu1 %v2966_v36 }
0x26db   : > { %v2968_v14 = vpop.xlane.xlu1 %2967 }
0x26dc   : > { %v2973_v30 = vrot.slane %v2968_v14, %v5404_v31  ;;  %v2977_v43 = vrot.slane %v2968_v14, %v5407_v32 }
0x26de   : > { %vm2980_vm12 = vcmp.eq.f32.partialorder %v2926_v16, %v2973_v30  ;;  %vm2981_vm13 = vcmp.eq.f32.partialorder %v2927_v38, %v2973_v30  ;;  %vm2982_vm14 = vcmp.eq.f32.partialorder %v2928_v40, %v2977_v43  ;;  %vm2983_vm15 = vcmp.eq.f32.partialorder %v2929_v52, %v2977_v43 }
0x26df   : > { %v2984_v58 = vsel %vm2980_vm12, %v5628_v4, 16  ;;  %v2985_v50 = vsel %vm2981_vm13, %v5633_v18, 16  ;;  %v2986_v60 = vsel %vm2982_vm14, %v5628_v4, 16  ;;  %v2987_v8 = vsel %vm2983_vm15, %v5633_v18, 16 }
0x26e0   : > { %2989 = vperm.xlu0 %4752, %v2984_v58   ;;  %v4573_v30 = vsel %vm3081_vm6, 1.0, %v6911_v41  ;;  %v4569_v58 = vmul.f32 -1.442695, %v6198_v25  ;;  %vm4222_vm13 = vcmask 1045504  }
0x26e2   : > { %4908 = vpow2.f32 %v4569_v58 }
0x26e4   : > { %2992 = vperm.xlu0 %4752, %v2985_v50  }
0x26e8   : > { %2995 = vperm.xlu0 %4752, %v2986_v60  }
0x26ec   : > { %2998 = vperm.xlu0 %4752, %v2987_v8   ;;  %v4909_v43 = vpop.eup %4908 }
0x26ed   : > { %v2655_v50 = vadd.f32 1.0, %v4909_v43 }
0x26ef   : > { %4910 = vrcp.f32 %v2655_v50 }
0x275f   : > { %v2990_v55 = vpop.permute.xlu0 %2989 }
0x2760   : > { %v3003_v57 = vrot.slane %v2990_v55, %v5569_v62 }
0x2763   : > { %v2993_v26 = vpop.permute.xlu0 %2992 }
0x2764   : > { %v3007_v15 = vrot.slane %v2993_v26, %v5572_v1 }
0x2766   : > { %v3008_v40 = vsel %vm1008_vm9, %v3007_v15, %v3003_v57  ;;  %v4911_v15 = vpop.eup %4910 }
0x2767   : > { %v2996_v16 = vpop.permute.xlu0 %2995 }
0x2768   : > { %v3012_v38 = vrot.slane %v2996_v16, %v5569_v62 }
0x276b   : > { %v2999_v0 = vpop.permute.xlu0 %2998 }
0x276c   : > { %v3016_v56 = vrot.slane %v2999_v0, %v5572_v1 }
0x276e   : > { %v3017_v27 = vsel %vm1008_vm9, %v3016_v56, %v3012_v38 }
0x276f   : > { %v3018_v52 = vsel %vm1019_vm10, %v3017_v27, %v3008_v40 }
0x2770   : > { %v3019_v24 = vsel %vm1022_vm11, %v3018_v52, 2147483647 }
0x2771   : > { %v3021_v46 = vshra.s32 %v3019_v24, 16  ;;  %v3020_v12 = vand.u32 65535, %v3019_v24 }
0x2773   : > { %v3023_v39 = vcvt.s32.f32 %v3021_v46  ;;  %v3022_v36 = vcvt.s32.f32 %v3020_v12 }
0x2775   : > { %3024 = vmin.xlane.f32.xlu0 %v3023_v39 }
0x2802   : > { %v3025_v51 = vpop.xlane.xlu0 %3024 }
0x2803   : > { %vm3026_vm1 = vcmp.eq.f32.partialorder %v3023_v39, %v3025_v51  ;;  %v3031_v60 = vcvt.f32.s32 %v3025_v51 }
0x2804   : > { %v3027_v14 = vsel %vm3026_vm1, %v3022_v36, inf }
0x2805   : > { %3028 = vmin.xlane.f32.xlu1 %v3027_v14  ;;  %v3032_v55 = vshll.u32 %v3031_v60, 16 }
0x2816   : > { %3085 = vrot.lane.b32.xlu1 %v4573_v30, %s6883_s20 }
0x2892   : > { %v3029_v8 = vpop.xlane.xlu1 %3028 }
0x2893   : > { %v3030_v26 = vcvt.f32.s32 %v3029_v8 }
0x2895   : > { %v3033_v16 = vadd.s32 %v3032_v55, %v3030_v26 }
0x2896   : > { %v3086_v0 = vpop.permute.xlu1 %3085 }
0x2897   : > { %vm3034_vm12 = vcmp.eq.s32.totalorder %v5564_v53, %v3033_v16  ;;  %v3088_v57 = vmul.f32 %v4911_v15, %v3086_v0 }
0x2898   : > { %v4572_v38 = vsel %vm3034_vm12, 1.0, %v6911_v41  ;;  %vm3664_vm12 = vcmp.lt.s32.totalorder %v5564_v53, 4 }
0x2899   : > { %v4214_v25 = vrot.slane %v4572_v38, 2  ;;  %v4232_v56 = vrot.slane %v3088_v57, 2  ;;  %v3040_v40 = vrot.slane %v4572_v38, %v5404_v31  ;;  %v3051_v24 = vrot.slane %v4572_v38, %v5407_v32 }
0x289b   : > { %3046 = vbcast.lane.b32.xlu1 %v3040_v40, 264  ;;  %3042 = vbcast.lane.b32.xlu0 %v3040_v40, 256  ;;  %v4223_v27 = vsel %vm4222_vm13, %v6125_v13, %v4214_v25  ;;  %v6318_v52 = vsel %vm4222_vm13, %v6128_v54, %v4232_v56 }
0x289c   : > { %6945 = vst [vmem:[#allocation25_spill] sm:$0xff] %v6318_v52  ;;  %4226 = vst [vmem:[%s6322_s18] sm:$0xff] %v4223_v27 }
0x289f   : > { %3053 = vbcast.lane.b32.xlu1 %v3051_v24, 256  ;;  %3098 = vrot.lane.b32.xlu0 %v6170_v63, %s6923_s14 }
0x28a3   : > { %3057 = vbcast.lane.b32.xlu1 %v3051_v24, 264 }
0x28a7   : > { %3094 = vrot.lane.b32.xlu1 %v3088_v57, %s6883_s20  ;;  %s4602_s20 = sshll.u32 %s5241_s25, 8 }
0x290d   : > { %v3043_v46 = vpop.permute.xlu0 %3042  ;;  %v3047_v39 = vpop.permute.xlu1 %3046 }
0x290e   : > { %v3059_v13 = vmul.f32 %v3043_v46, %v5664_v45  ;;  %v3060_v54 = vmul.f32 %v3047_v39, %v5667_v2 }
0x2910   : > { %v3063_v12 = vsel %vm572_vm4, %v3059_v13, 0.0  ;;  %v3064_v51 = vsel %vm572_vm4, %v3060_v54, 0.0 }
0x2911   : > { %v3065_v36 = vadd.f32 %v3064_v51, %v3063_v12  ;;  %v3054_v14 = vpop.permute.xlu1 %3053  ;;  %v3099_v13 = vpop.permute.xlu0 %3098 }
0x2912   : > { %v3061_v58 = vmul.f32 %v3054_v14, %v5672_v22  ;;  %v4994_v14 = vld [vmem:[%s6826_s7 + $0x8] sm:$0xff]  }
0x2913   : > { %v3066_v30 = vrot.slane %v3065_v36, 4 }
0x2914   : > { %v3072_v8 = vsel %vm572_vm4, %v3061_v58, 0.0 }
0x2915   : > { %v3067_v43 = vadd.f32 %v3066_v30, %v3065_v36  ;;  %v3058_v50 = vpop.permute.xlu1 %3057  ;;  %v4993_v36 = vld [vmem:[%s6826_s7] sm:$0xff]  }
0x2916   : > { %v3062_v60 = vmul.f32 %v3058_v50, %v5677_v47 }
0x2917   : > { %v3068_v26 = vrot.slane %v3067_v43, 2 }
0x2918   : > { %v3073_v55 = vsel %vm572_vm4, %v3062_v60, 0.0 }
0x2919   : > { %v3074_v16 = vadd.f32 %v3073_v55, %v3072_v8  ;;  %v3069_v0 = vadd.f32 %v3068_v26, %v3067_v43  ;;  %v3095_v39 = vpop.permute.xlu1 %3094 }
0x291b   : > { %v3075_v15 = vrot.slane %v3074_v16, 4  ;;  %v3070_v25 = vrot.slane %v3069_v0, 1 }
0x291d   : > { %v3076_v57 = vadd.f32 %v3075_v15, %v3074_v16  ;;  %v3071_v27 = vadd.f32 %v3070_v25, %v3069_v0 }
0x291f   : > { %v3077_v38 = vrot.slane %v3076_v57, 2 }
0x2921   : > { %v3078_v56 = vadd.f32 %v3077_v38, %v3076_v57 }
0x2923   : > { %v3079_v40 = vrot.slane %v3078_v56, 1 }
0x2925   : > { %v3080_v24 = vadd.f32 %v3079_v40, %v3078_v56 }
0x2927   : > { %v3091_v46 = vsel %vm1019_vm10, %v3080_v24, %v3071_v27  ;;  %v6359_v24 = vadd.f32 %v6257_v29, %v6161_v7 }
0x2928   : > { %v3101_v54 = vsel %vm572_vm4, %v3091_v46, %v3095_v39  ;;  %v6364_v46 = vadd.f32 %v6259_v9, %v6166_v21  ;;  %v6375_v9 = vadd.f32 %v6261_v28, %v6177_v48  ;;  %v4996_v48 = vld [vmem:[%s6823_s4 + $0x14] ss:$8 sps:$4 sm:$0xff]   ;;  %v4998_v28 = vld [vmem:[%s6823_s4 + $0x24] ss:$8 sps:$4 sm:$0xff]  }
0x2929   : > { %v3102_v12 = vsel %vm652_vm2, %v3101_v54, %v3099_v13 }
0x292a   : > { %v3103_v51 = vpack.c.bf16 %v3102_v12, %v3102_v12 }
0x292c   : > { %4574 = vmatmul.mubr.msk.bf16.vlgmr.msra.gmra.mrb[16].mxu1 %vm711_vm3, %v3103_v51 }
0x292d   : > { %4675 = vmatpush3.bf16.msra.mxu1 %v4993_v36  ;;  %4678 = vmatprep.mubr.msk.bf16.mxu1 %vm5146_vm5, %v6911_v41 }
0x292e   : > { %4676 = vmatprep.subr.bf16.mxu1 %v6911_v41 }
0x2931   : > { %4677 = vmatpush3.bf16.msra.mxu1 %v4994_v14 }
0x29ff   : > { %v3141_v30 = vpop.f32.mrb[16].mxu1 }
0x2a00   : > { %v3142_v58 = vadd.f32 %v3141_v30, %v5413_v34  ;;  %v3143_v43 = vpop.f32.mrb[17].mxu1 }
0x2a01   : > { %v3144_v50 = vadd.f32 %v3143_v43, %v5416_v35  ;;  %v3145_v60 = vpop.f32.mrb[18].mxu1 }
0x2a02   : > { %v3146_v8 = vpop.f32.mrb[19].mxu1  ;;  %3149 = vrot.lane.b32.xlu1 %v3142_v58, %s6881_s13  ;;  %v5001_v60 = vld [vmem:[%s6823_s4 + $0x30] ss:$8 sps:$4 sm:$0xff]  }
0x2a03   : > { %3170 = vrot.lane.b32.xlu0 %v3144_v50, %s6879_s23 }
0x2a07   : > { %3160 = vrot.lane.b32.xlu0 %v3144_v50, %s6881_s13  ;;  %v4995_v50 = vld [vmem:[%s6823_s4] ss:$8 sps:$4 sm:$0xff]   ;;  %s5041_s13 = scalar_lea.vmem %s5040_s0, 512 }
0x2a74   : > { %v3150_v55 = vpop.permute.xlu1 %3149 }
0x2a75   : > { %v3152_v26 = vadd.f32 %v3150_v55, %v3142_v58  ;;  %v3171_v38 = vpop.permute.xlu0 %3170 }
0x2a77   : > { %v4575_v16 = vmul.f32 -1.442695, %v3152_v26 }
0x2a79   : > { %4912 = vpow2.f32 %v4575_v16  ;;  %v3161_v39 = vpop.permute.xlu0 %3160  ;;  %v6411_v16 = vld [vmem:[%s6827_s8] ss:$0 sm:$0xff] }
0x2a7a   : > { %v3163_v13 = vadd.f32 %v3161_v39, %v3142_v58 }
0x2a7c   : > { %v4576_v54 = vmul.f32 -1.442695, %v3163_v13  ;;  %v6424_v13 = vld [vmem:[%s6828_s9] ss:$0 sm:$0xff] }
0x2a83   : > { %v4913_v15 = vpop.eup %4912 }
0x2a84   : > { %v3156_v0 = vadd.f32 1.0, %v4913_v15 }
0x2a86   : > { %4914 = vrcp.f32 %v3156_v0 }
0x2a90   : > { %v4915_v57 = vpop.eup %4914 }
0x2a91   : > { %v3173_v25 = vmul.f32 %v4915_v57, %v3171_v38 }
0x2a93   : > { %3175 = vrot.lane.b32.xlu1 %v3173_v25, %s6924_s27 }
0x2b05   : > { %v3176_v56 = vpop.permute.xlu1 %3175 }
0x2b06   : > { %v3178_v40 = vadd.f32 %v3176_v56, %v3142_v58  ;;  %v6380_v58 = vadd.f32 %v6263_v61, %v6182_v42  ;;  %v4997_v42 = vld [vmem:[%s6823_s4 + $0x10] ss:$8 sps:$4 sm:$0xff]   ;;  %v4999_v61 = vld [vmem:[%s6823_s4 + $0x20] ss:$8 sps:$4 sm:$0xff]  }
0x2b08   : > { %4916 = vtanh.f32 %v3178_v40 }
0x2b09   : > { %4918 = vpow2.f32 %v4576_v54 }
0x2b12   : > { %v4917_v27 = vpop.eup %4916 }
0x2b13   : > { %3182 = vrot.lane.b32.xlu1 %v4917_v27, %s6879_s23  ;;  %v4919_v12 = vpop.eup %4918 }
0x2b14   : > { %v3167_v51 = vadd.f32 1.0, %v4919_v12 }
0x2b16   : > { %4920 = vrcp.f32 %v3167_v51 }
0x2b17   : > { %3280 = vperm.xlu1 %4753, %v6359_v24  }
0x2b1b   : > { %3290 = vperm.xlu1 %4753, %v6364_v46  }
0x2b20   : > { %v4921_v36 = vpop.eup %4920 }
0x2b21   : > { %v3180_v14 = vsub.f32 1.0, %v4921_v36  ;;  %v3186_v29 = vmul.f32 %v4921_v36, %v6170_v63 }
0x2b85   : > { %v3183_v30 = vpop.permute.xlu1 %3182 }
0x2b86   : > { %v3185_v7 = vmul.f32 %v3183_v30, %v3180_v14 }
0x2b88   : > { %v6368_v43 = vadd.f32 %v3186_v29, %v3185_v7 }
0x2b8a   : > { %v3188_v21 = vpack.c.bf16 %v6368_v43, %v6368_v43 }
0x2b8c   : > { %3190 = vrot.lane.b32.xlu0 %v3188_v21, %s6879_s23 }
0x2b90   : > { %3285 = vperm.xlu0 %4752, %v6375_v9  }
0x2b94   : > { %3295 = vperm.xlu0 %4752, %v6380_v58  }
0x2b96   : > { %v3281_v8 = vpop.permute.xlu1 %3280 }
0x2b97   : > { %v3298_v54 = vmul.f32 %v6424_v13, %v3281_v8 }
0x2b9a   : > { %v3291_v56 = vpop.permute.xlu1 %3290 }
0x2b9b   : > { %v3300_v30 = vmul.f32 %v6424_v13, %v3291_v56 }
0x2bfe   : > { %v3191_v63 = vpop.permute.xlu0 %3190 }
0x2bff   : > { %4671 = vmatmul.mubr.msk.bf16.vlgmr.msra.gmra.mrb[20].mxu0 %vm572_vm4, %v3191_v63 }
0x2c00   : > { %3691 = vmatpush1.bf16.msra.mxu0 %v4995_v50  ;;  %3722 = vmatprep.mubr.bf16.mxu0 %v6912_v17  ;;  %v5000_v17 = vld [vmem:[%s6823_s4 + $0x34] ss:$8 sps:$4 sm:$0xff]  }
0x2c01   : > { %3692 = vmatprep.subr.bf16.mxu0 %v4996_v48 }
0x2c04   : > { %3693 = vmatpush1.bf16.msra.mxu0 %v4997_v42 }
0x2c05   : > { %3694 = vmatprep.subr.bf16.mxu0 %v4998_v28 }
0x2c08   : > { %3695 = vmatpush1.bf16.msra.mxu0 %v4999_v61 }
0x2c09   : > { %3696 = vmatprep.subr.bf16.mxu0 %v5000_v17  ;;  %v6438_v17 = vld [vmem:[%s6828_s9 + $0x1] ss:$0 sm:$0xff] }
0x2c0c   : > { %3697 = vmatpush1.bf16.msra.mxu0 %v5001_v60 }
0x2c0d   : > { %3698 = vmatprep.subr.bf16.mxu0 %v6931_v5 }
0x2c0f   : > { %v3286_v26 = vpop.permute.xlu0 %3285 }
0x2c10   : > { %3699 = vmatpush1.bf16.msra.mxu0 %v6932_v6  ;;  %v3299_v12 = vmul.f32 %v6424_v13, %v3286_v26 }
0x2c13   : > { %v3296_v40 = vpop.permute.xlu0 %3295 }
0x2c14   : > { %v3301_v7 = vmul.f32 %v6424_v13, %v3296_v40 }
0x2cd2   : > { %v3229_v55 = vpop.f32.mrb[20].mxu0 }
0x2cd3   : > { %v6414_v15 = vadd.f32 %v6411_v16, %v3229_v55  ;;  %v4672_v0 = vpop.f32.mrb[21].mxu0 }
0x2cd4   : > { %v3232_v57 = vpop.f32.mrb[22].mxu0 }
0x2cd5   : > { %v3248_v38 = vrot.slane %v6414_v15, %v6934_v19  ;;  %v4673_v25 = vpop.f32.mrb[23].mxu0 }
0x2cd7   : > { %v3249_v5 = vcombine.high %v3248_v38, %v3248_v38  ;;  %v3256_v6 = vrot.slane %v3248_v38, %v6934_v19 }
0x2cd9   : > { %v3263_v27 = vrot.slane %v3249_v5, %v6934_v19  ;;  %v3267_v39 = vrot.slane %v3256_v6, %v5404_v31 }
0x2cdb   : > { %v3271_v51 = vrot.slane %v3263_v27, %v5404_v31  ;;  %v3274_v36 = vadd.f32 %v3267_v39, %v6936_v23  ;;  %v3275_v14 = vadd.f32 %v3267_v39, %v6937_v59 }
0x2cdd   : > { %v3276_v29 = vadd.f32 %v6938_v49, %v3271_v51  ;;  %v3277_v21 = vadd.f32 %v6939_v11, %v3271_v51  ;;  %v3302_v63 = vadd.f32 %v3298_v54, %v3274_v36  ;;  %v3303_v50 = vadd.f32 %v3299_v12, %v3275_v14  ;;  %v6946_v12 = vld [vmem:[#allocation23_spill] sm:$0xff]  ;;  %v6947_v14 = vld [vmem:[#allocation22_spill] sm:$0xff] }
0x2cdf   : > { %v3304_v48 = vadd.f32 %v3300_v30, %v3276_v29  ;;  %v3305_v42 = vadd.f32 %v3301_v7, %v3277_v21  ;;  %4922 = vtanh.f32 %v3302_v63 }
0x2ce0   : > { %4924 = vtanh.f32 %v3303_v50 }
0x2ce1   : > { %4926 = vtanh.f32 %v3304_v48 }
0x2ce2   : > { %4928 = vtanh.f32 %v3305_v42 }
0x2ce9   : > { %v4923_v28 = vpop.eup %4922 }
0x2cea   : > { %v4925_v61 = vpop.eup %4924  ;;  %v3310_v60 = vmul.f32 %v6438_v17, %v4923_v28 }
0x2ceb   : > { %v4927_v8 = vpop.eup %4926  ;;  %v3311_v55 = vmul.f32 %v6438_v17, %v4925_v61 }
0x2cec   : > { %v4929_v26 = vpop.eup %4928  ;;  %v3314_v0 = vsel %vm938_vm7, %v3310_v60, 0.0  ;;  %v3312_v38 = vmul.f32 %v6438_v17, %v4927_v8 }
0x2ced   : > { %3315 = vadd.xlane.f32.xlu1 %v3314_v0  ;;  %v3317_v57 = vsel %vm938_vm7, %v3311_v55, 0.0  ;;  %v3313_v25 = vmul.f32 %v6438_v17, %v4929_v26 }
0x2cee   : > { %3318 = vadd.xlane.f32.xlu0 %v3317_v57  ;;  %v3320_v6 = vsel %vm938_vm7, %v3312_v38, 0.0 }
0x2cef   : > { %v3323_v5 = vsel %vm938_vm7, %v3313_v25, 0.0 }
0x2cf1   : > { %3324 = vadd.xlane.f32.xlu1 %v3323_v5 }
0x2cf2   : > { %3321 = vadd.xlane.f32.xlu0 %v3320_v6 }
0x2d7a   : > { %v3316_v56 = vpop.xlane.xlu1 %3315 }
0x2d7b   : > { %v3326_v40 = vadd.f32 %v3316_v56, %v6941_v20  ;;  %v3319_v27 = vpop.xlane.xlu0 %3318 }
0x2d7c   : > { %v3327_v39 = vadd.f32 %v3319_v27, %v6942_v37 }
0x2d7d   : > { %3335 = vperm.xlu0 %4752, %v3326_v40  }
0x2d7e   : > { %3338 = vperm.xlu1 %4753, %v3327_v39   ;;  %v3325_v54 = vpop.xlane.xlu1 %3324 }
0x2d7f   : > { %v3329_v51 = vadd.f32 %v3325_v54, %v6946_v12  ;;  %v3322_v36 = vpop.xlane.xlu0 %3321 }
0x2d80   : > { %v3328_v30 = vadd.f32 %v3322_v36, %v6947_v14 }
0x2d81   : > { %3344 = vperm.xlu0 %4752, %v3329_v51  }
0x2d82   : > { %3341 = vperm.xlu1 %4753, %v3328_v30  }
0x2dfc   : > { %v3336_v7 = vpop.permute.xlu0 %3335 }
0x2dfd   : > { %v3339_v29 = vpop.permute.xlu1 %3338  ;;  %v3349_v63 = vrot.slane %v3336_v7, %v5569_v62 }
0x2dfe   : > { %v3353_v21 = vrot.slane %v3339_v29, %v5572_v1  ;;  %v4579_v29 = vld [vmem:[%s5601_s19 + $0x4] ss:$0 sm:$0xff] }
0x2e00   : > { %v3345_v50 = vpop.permute.xlu0 %3344  ;;  %v3354_v61 = vsel %vm1008_vm9, %v3353_v21, %v3349_v63  ;;  %v4580_v21 = vld [vmem:[%s5601_s19 + $0xc] ss:$0 sm:$0xff] }
0x2e01   : > { %v3342_v48 = vpop.permute.xlu1 %3341  ;;  %v3362_v42 = vrot.slane %v3345_v50, %v5572_v1 }
0x2e02   : > { %v3358_v28 = vrot.slane %v3342_v48, %v5569_v62 }
0x2e04   : > { %v3363_v60 = vsel %vm1008_vm9, %v3362_v42, %v3358_v28 }
0x2e05   : > { %v3364_v8 = vsel %vm1019_vm10, %v3363_v60, %v3354_v61 }
0x2e06   : > { %v3366_v55 = vsel %vm1022_vm11, %v3364_v8, -inf }
0x2e07   : > { %3367 = vmax.xlane.f32.xlu1 %v3366_v55 }
0x2e18   : > { %3488 = vbcast.lane.b32.xlu1 %v4579_v29, 256 }
0x2e1c   : > { %3499 = vbcast.lane.b32.xlu1 %v4580_v21, 256 }
0x2e20   : > { %3503 = vbcast.lane.b32.xlu1 %v4580_v21, 264 }
0x2e94   : > { %v3368_v26 = vpop.xlane.xlu1 %3367 }
0x2e95   : > { %v3373_v0 = vrot.slane %v3368_v26, %v5404_v31  ;;  %v3377_v57 = vrot.slane %v3368_v26, %v5407_v32 }
0x2e97   : > { %v3380_v38 = vsub.f32 %v3326_v40, %v3373_v0  ;;  %v6462_v25 = vsub.f32 %v3327_v39, %v3373_v0  ;;  %v6464_v6 = vsub.f32 %v3328_v30, %v3377_v57  ;;  %v3383_v27 = vsub.f32 %v3329_v51, %v3377_v57 }
0x2e99   : > { %v3384_v5 = vmul.f32 1.442695, %v3380_v38  ;;  %v3386_v56 = vmul.f32 1.442695, %v6462_v25  ;;  %v3388_v54 = vmul.f32 1.442695, %v6464_v6 }
0x2e9a   : > { %v3390_v36 = vmul.f32 1.442695, %v3383_v27 }
0x2e9b   : > { %4930 = vpow2.f32 %v3384_v5  ;;  %v3489_v5 = vpop.permute.xlu1 %3488 }
0x2e9c   : > { %4932 = vpow2.f32 %v3386_v56 }
0x2e9d   : > { %4934 = vpow2.f32 %v3388_v54 }
0x2e9e   : > { %4936 = vpow2.f32 %v3390_v36 }
0x2e9f   : > { %v3500_v56 = vpop.permute.xlu1 %3499 }
0x2ea5   : > { %v4931_v7 = vpop.eup %4930 }
0x2ea6   : > { %3397 = vperm.xlu0 %4752, %v4931_v7   ;;  %v4933_v40 = vpop.eup %4932 }
0x2ea7   : > { %v4935_v39 = vpop.eup %4934 }
0x2ea8   : > { %v4937_v30 = vpop.eup %4936 }
0x2eaa   : > { %3400 = vperm.xlu0 %4752, %v4933_v40  }
0x2eae   : > { %3403 = vperm.xlu0 %4752, %v4935_v39  }
0x2eb2   : > { %3406 = vperm.xlu0 %4752, %v4937_v30  }
0x2f25   : > { %v3398_v51 = vpop.permute.xlu0 %3397 }
0x2f26   : > { %v3411_v28 = vrot.slane %v3398_v51, %v5569_v62 }
0x2f29   : > { %v3401_v63 = vpop.permute.xlu0 %3400 }
0x2f2a   : > { %v3415_v48 = vrot.slane %v3401_v63, %v5572_v1 }
0x2f2c   : > { %v3416_v8 = vsel %vm1008_vm9, %v3415_v48, %v3411_v28  ;;  %v3504_v28 = vpop.permute.xlu1 %3503 }
0x2f2d   : > { %v3404_v50 = vpop.permute.xlu0 %3403 }
0x2f2e   : > { %v3420_v61 = vrot.slane %v3404_v50, %v5569_v62 }
0x2f31   : > { %v3407_v42 = vpop.permute.xlu0 %3406 }
0x2f32   : > { %v3424_v60 = vrot.slane %v3407_v42, %v5572_v1 }
0x2f34   : > { %v3425_v55 = vsel %vm1008_vm9, %v3424_v60, %v3420_v61 }
0x2f35   : > { %v3426_v26 = vsel %vm1019_vm10, %v3425_v55, %v3416_v8 }
0x2f36   : > { %v3428_v0 = vsel %vm1022_vm11, %v3426_v26, 0.0 }
0x2f37   : > { %3429 = vadd.xlane.f32.xlu0 %v3428_v0 }
0x2f4d   : > { %3492 = vbcast.lane.b32.xlu0 %v4579_v29, 264 }
0x2fc4   : > { %v3430_v57 = vpop.xlane.xlu0 %3429 }
0x2fc5   : > { %4938 = vrcp.f32 %v3430_v57 }
0x2fc6   : > { %4940 = vlog2.f32 %v3430_v57 }
0x2fc8   : > { %v3493_v0 = vpop.permute.xlu0 %3492 }
0x2fcf   : > { %v4939_v54 = vpop.eup %4938 }
0x2fd0   : > { %v4941_v36 = vpop.eup %4940  ;;  %v3432_v21 = vmul.f32 %v4939_v54, %v3430_v57 }
0x2fd1   : > { %v3463_v51 = vmul.f32 0.6931472, %v4941_v36 }
0x2fd2   : > { %v3433_v63 = vsub.f32 2.0, %v3432_v21 }
0x2fd3   : > { %v3468_v50 = vrot.slane %v3463_v51, %v5404_v31  ;;  %v3472_v48 = vrot.slane %v3463_v51, %v5407_v32 }
0x2fd4   : > { %v3434_v42 = vmul.f32 %v4939_v54, %v3433_v63 }
0x2fd5   : > { %v3475_v61 = vsub.f32 %v3380_v38, %v3468_v50  ;;  %v3478_v60 = vsub.f32 %v3383_v27, %v3472_v48  ;;  %v3476_v55 = vsub.f32 %v6462_v25, %v3468_v50  ;;  %v3477_v38 = vsub.f32 %v6464_v6, %v3472_v48 }
0x2fd6   : > { %v3439_v29 = vrot.slane %v3434_v42, %v5404_v31  ;;  %v3443_v8 = vrot.slane %v3434_v42, %v5407_v32 }
0x2fd7   : > { %v3509_v26 = vadd.f32 %v3489_v5, %v3475_v61  ;;  %v3512_v52 = vadd.f32 %v3504_v28, %v3478_v60  ;;  %v3510_v27 = vadd.f32 %v3493_v0, %v3476_v55  ;;  %v3511_v63 = vadd.f32 %v3500_v56, %v3477_v38 }
0x2fd8   : > { %v6483_v57 = vmul.f32 %v4931_v7, %v3439_v29  ;;  %v6485_v36 = vmul.f32 %v4935_v39, %v3443_v8  ;;  %v6487_v21 = vmul.f32 %v4933_v40, %v3439_v29  ;;  %v6489_v51 = vmul.f32 %v4937_v30, %v3443_v8 }
0x2fd9   : > { %3518 = vperm.xlu1 %4753, %v3509_v26   ;;  %3527 = vperm.xlu0 %4752, %v3512_v52  }
0x2fda   : > { %v3450_v54 = vmin.f32 %v6483_v57, %v6359_v24  ;;  %v3451_v25 = vmin.f32 %v6487_v21, %v6375_v9  ;;  %v3452_v7 = vmin.f32 %v6485_v36, %v6364_v46  ;;  %v3453_v40 = vmin.f32 %v6489_v51, %v6380_v58 }
0x2fdc   : > { %v6501_v39 = vadd.f32 %v3450_v54, %v6275_v33  ;;  %v6504_v30 = vadd.f32 %v3451_v25, %v6281_v44  ;;  %v6507_v6 = vadd.f32 %v3452_v7, %v6278_v10  ;;  %v6510_v5 = vadd.f32 %v3453_v40, %v6284_v3 }
0x2fdd   : > { %3521 = vperm.xlu1 %4753, %v3510_v27  }
0x2fe1   : > { %3524 = vperm.xlu1 %4753, %v3511_v63  }
0x3058   : > { %v3519_v50 = vpop.permute.xlu1 %3518  ;;  %v3528_v42 = vpop.permute.xlu0 %3527 }
0x3059   : > { %v3545_v33 = vrot.slane %v3528_v42, %v5572_v1  ;;  %v3532_v60 = vrot.slane %v3519_v50, %v5569_v62 }
0x305c   : > { %v3522_v48 = vpop.permute.xlu1 %3521 }
0x305d   : > { %v3536_v28 = vrot.slane %v3522_v48, %v5572_v1 }
0x305f   : > { %v3537_v10 = vsel %vm1008_vm9, %v3536_v28, %v3532_v60 }
0x3060   : > { %v3525_v61 = vpop.permute.xlu1 %3524 }
0x3061   : > { %v3541_v44 = vrot.slane %v3525_v61, %v5569_v62 }
0x3063   : > { %v3546_v29 = vsel %vm1008_vm9, %v3545_v33, %v3541_v44 }
0x3064   : > { %v3547_v3 = vsel %vm1019_vm10, %v3546_v29, %v3537_v10 }
0x3065   : > { %v3549_v56 = vsel %vm1022_vm11, %v3547_v3, -inf }
0x3066   : > { %3550 = vmax.xlane.f32.xlu1 %v3549_v56 }
0x30f3   : > { %v3551_v8 = vpop.xlane.xlu1 %3550 }
0x30f4   : > { %v3556_v55 = vrot.slane %v3551_v8, %v5404_v31  ;;  %v3560_v38 = vrot.slane %v3551_v8, %v5407_v32 }
0x30f6   : > { %vm3563_vm5 = vcmp.eq.f32.partialorder %v3509_v26, %v3556_v55  ;;  %vm3564_vm14 = vcmp.eq.f32.partialorder %v3510_v27, %v3556_v55  ;;  %vm3565_vm15 = vcmp.eq.f32.partialorder %v3511_v63, %v3560_v38  ;;  %vm3566_vm1 = vcmp.eq.f32.partialorder %v3512_v52, %v3560_v38 }
0x30f7   : > { %v3567_v0 = vsel %vm3563_vm5, %v5628_v4, 16  ;;  %v3568_v54 = vsel %vm3564_vm14, %v5633_v18, 16  ;;  %v3569_v25 = vsel %vm3565_vm15, %v5628_v4, 16  ;;  %v3570_v7 = vsel %vm3566_vm1, %v5633_v18, 16 }
0x30f8   : > { %3572 = vperm.xlu0 %4752, %v3567_v0   ;;  %v4582_v55 = vsel %vm3664_vm12, 1.0, %v6911_v41  ;;  %v4578_v0 = vmul.f32 -1.442695, %v6414_v15  ;;  %vm4199_vm5 = vcmp.lt.s32.totalorder %v5564_v53, 5 }
0x30fa   : > { %4942 = vpow2.f32 %v4578_v0 }
0x30fc   : > { %3575 = vperm.xlu0 %4752, %v3568_v54  }
0x3100   : > { %3578 = vperm.xlu0 %4752, %v3569_v25  }
0x3104   : > { %3581 = vperm.xlu0 %4752, %v3570_v7   ;;  %v4943_v25 = vpop.eup %4942 }
0x3177   : > { %v3573_v40 = vpop.permute.xlu0 %3572 }
0x3178   : > { %v3586_v27 = vrot.slane %v3573_v40, %v5569_v62 }
0x317b   : > { %v3576_v50 = vpop.permute.xlu0 %3575 }
0x317c   : > { %v3590_v48 = vrot.slane %v3576_v50, %v5572_v1 }
0x317e   : > { %v3591_v61 = vsel %vm1008_vm9, %v3590_v48, %v3586_v27 }
0x317f   : > { %v3579_v26 = vpop.permute.xlu0 %3578 }
0x3180   : > { %v3595_v28 = vrot.slane %v3579_v26, %v5569_v62  ;;  %v3238_v26 = vadd.f32 1.0, %v4943_v25 }
0x3182   : > { %4944 = vrcp.f32 %v3238_v26 }
0x3183   : > { %v3582_v42 = vpop.permute.xlu0 %3581 }
0x3184   : > { %v3599_v63 = vrot.slane %v3582_v42, %v5572_v1 }
0x3186   : > { %v3600_v52 = vsel %vm1008_vm9, %v3599_v63, %v3595_v28 }
0x3187   : > { %v3601_v33 = vsel %vm1019_vm10, %v3600_v52, %v3591_v61 }
0x3188   : > { %v3602_v60 = vsel %vm1022_vm11, %v3601_v33, 2147483647 }
0x3189   : > { %v3604_v44 = vshra.s32 %v3602_v60, 16  ;;  %v3603_v29 = vand.u32 65535, %v3602_v60 }
0x318b   : > { %v3606_v10 = vcvt.s32.f32 %v3604_v44  ;;  %v3605_v56 = vcvt.s32.f32 %v3603_v29 }
0x318c   : > { %v4945_v28 = vpop.eup %4944 }
0x318d   : > { %3607 = vmin.xlane.f32.xlu0 %v3606_v10 }
0x321a   : > { %v3608_v3 = vpop.xlane.xlu0 %3607 }
0x321b   : > { %vm3609_vm6 = vcmp.eq.f32.partialorder %v3606_v10, %v3608_v3  ;;  %v3614_v38 = vcvt.f32.s32 %v3608_v3 }
0x321c   : > { %v3610_v8 = vsel %vm3609_vm6, %v3605_v56, inf }
0x321d   : > { %3611 = vmin.xlane.f32.xlu1 %v3610_v8  ;;  %v3615_v7 = vshll.u32 %v3614_v38, 16 }
0x322e   : > { %3668 = vrot.lane.b32.xlu1 %v4582_v55, %s6948_s17 }
0x32aa   : > { %v3612_v54 = vpop.xlane.xlu1 %3611 }
0x32ab   : > { %v3613_v40 = vcvt.f32.s32 %v3612_v54 }
0x32ad   : > { %v3616_v50 = vadd.s32 %v3615_v7, %v3613_v40 }
0x32ae   : > { %v3669_v27 = vpop.permute.xlu1 %3668 }
0x32af   : > { %vm3617_vm13 = vcmp.eq.s32.totalorder %v5564_v53, %v3616_v50  ;;  %v6548_v63 = vmul.f32 %v4945_v28, %v3669_v27 }
0x32b0   : > { %v6540_v48 = vsel %vm3617_vm13, 1.0, %v6911_v41 }
0x32b1   : > { %v3623_v42 = vrot.slane %v6540_v48, %v5404_v31  ;;  %v3634_v15 = vrot.slane %v6540_v48, %v5407_v32 }
0x32b3   : > { %3629 = vbcast.lane.b32.xlu1 %v3623_v42, 264  ;;  %3625 = vbcast.lane.b32.xlu0 %v3623_v42, 256 }
0x32b7   : > { %3636 = vbcast.lane.b32.xlu1 %v3634_v15, 256  ;;  %3681 = vrot.lane.b32.xlu0 %v6368_v43, %s6923_s14  ;;  %s6949_s14 = smov 32  }
0x32bb   : > { %3640 = vbcast.lane.b32.xlu1 %v3634_v15, 264 }
0x32bf   : > { %3677 = vrot.lane.b32.xlu1 %v6548_v63, %s6948_s17 }
0x3325   : > { %v3626_v61 = vpop.permute.xlu0 %3625  ;;  %v3630_v52 = vpop.permute.xlu1 %3629 }
0x3326   : > { %v3642_v33 = vmul.f32 %v3626_v61, %v5664_v45  ;;  %v3643_v60 = vmul.f32 %v3630_v52, %v5667_v2 }
0x3328   : > { %v3646_v44 = vsel %vm572_vm4, %v3642_v33, 0.0  ;;  %v3647_v10 = vsel %vm572_vm4, %v3643_v60, 0.0 }
0x3329   : > { %v3648_v29 = vadd.f32 %v3647_v10, %v3646_v44  ;;  %v3637_v3 = vpop.permute.xlu1 %3636  ;;  %v3682_v33 = vpop.permute.xlu0 %3681 }
0x332a   : > { %v3644_v8 = vmul.f32 %v3637_v3, %v5672_v22 }
0x332b   : > { %v3649_v56 = vrot.slane %v3648_v29, 4 }
0x332c   : > { %v3655_v54 = vsel %vm572_vm4, %v3644_v8, 0.0 }
0x332d   : > { %v3650_v55 = vadd.f32 %v3649_v56, %v3648_v29  ;;  %v3641_v0 = vpop.permute.xlu1 %3640 }
0x332e   : > { %v3645_v38 = vmul.f32 %v3641_v0, %v5677_v47 }
0x332f   : > { %v3651_v45 = vrot.slane %v3650_v55, 2 }
0x3330   : > { %v3656_v25 = vsel %vm572_vm4, %v3645_v38, 0.0 }
0x3331   : > { %v3657_v7 = vadd.f32 %v3656_v25, %v3655_v54  ;;  %v3652_v40 = vadd.f32 %v3651_v45, %v3650_v55  ;;  %v3678_v52 = vpop.permute.xlu1 %3677 }
0x3333   : > { %v3658_v2 = vrot.slane %v3657_v7, 4  ;;  %v3653_v42 = vrot.slane %v3652_v40, 1 }
0x3335   : > { %v3659_v50 = vadd.f32 %v3658_v2, %v3657_v7  ;;  %v3654_v28 = vadd.f32 %v3653_v42, %v3652_v40  ;;  %v6578_v42 = vadd.f32 %v6485_v36, %v6364_v46  ;;  %v6585_v46 = vadd.f32 %v6487_v21, %v6375_v9 }
0x3336   : > { %v6590_v36 = vadd.f32 %v6489_v51, %v6380_v58 }
0x3337   : > { %v3660_v26 = vrot.slane %v3659_v50, 2 }
0x3339   : > { %v3661_v15 = vadd.f32 %v3660_v26, %v3659_v50  ;;  %v6573_v26 = vadd.f32 %v6483_v57, %v6359_v24 }
0x333b   : > { %v3662_v27 = vrot.slane %v3661_v15, 1 }
0x333d   : > { %v3663_v61 = vadd.f32 %v3662_v27, %v3661_v15 }
0x333f   : > { %v3674_v22 = vsel %vm1019_vm10, %v3663_v61, %v3654_v28 }
0x3340   : > { %v3684_v47 = vsel %vm572_vm4, %v3674_v22, %v3678_v52 }
0x3341   : > { %v3685_v60 = vsel %vm652_vm2, %v3684_v47, %v3682_v33 }
0x3342   : > { %v3686_v44 = vpack.c.bf16 %v3685_v60, %v3685_v60 }
0x3344   : > { %4583 = vmatmul.mubr.msk.bf16.vlgmr.msra.gmra.mrb[24].mxu0 %vm711_vm3, %v3686_v44 }
0x3417   : > { %v3724_v10 = vpop.f32.mrb[24].mxu0 }
0x3418   : > { %v3725_v29 = vadd.f32 %v3724_v10, %v5413_v34  ;;  %v3726_v3 = vpop.f32.mrb[25].mxu0 }
0x3419   : > { %v3727_v56 = vadd.f32 %v3726_v3, %v5416_v35  ;;  %v3728_v8 = vpop.f32.mrb[26].mxu0 }
0x341a   : > { %v3729_v55 = vpop.f32.mrb[27].mxu0  ;;  %3732 = vrot.lane.b32.xlu1 %v3725_v29, %s6949_s14 }
0x341b   : > { %3753 = vrot.lane.b32.xlu0 %v3727_v56, %s6950_s29 }
0x341f   : > { %3743 = vrot.lane.b32.xlu0 %v3727_v56, %s6949_s14 }
0x348c   : > { %v3733_v0 = vpop.permute.xlu1 %3732 }
0x348d   : > { %v3735_v38 = vadd.f32 %v3733_v0, %v3725_v29  ;;  %v3754_v34 = vpop.permute.xlu0 %3753 }
0x348f   : > { %v4584_v54 = vmul.f32 -1.442695, %v3735_v38 }
0x3491   : > { %4946 = vpow2.f32 %v4584_v54  ;;  %v3744_v15 = vpop.permute.xlu0 %3743 }
0x3492   : > { %v3746_v27 = vadd.f32 %v3744_v15, %v3725_v29 }
0x3494   : > { %v4585_v28 = vmul.f32 -1.442695, %v3746_v27 }
0x349b   : > { %v4947_v25 = vpop.eup %4946 }
0x349c   : > { %v3739_v45 = vadd.f32 1.0, %v4947_v25 }
0x349e   : > { %4948 = vrcp.f32 %v3739_v45 }
0x34a8   : > { %v4949_v7 = vpop.eup %4948 }
0x34a9   : > { %v3756_v2 = vmul.f32 %v4949_v7, %v3754_v34 }
0x34ab   : > { %3758 = vrot.lane.b32.xlu1 %v3756_v2, %s6924_s27  ;;  %s6952_s27 = sshll.u32 %s5324_s26, 4 }
0x34ac   : > { %s6705_s30 = scalar_lea.vmem [#allocation6], %s6952_s27 }
0x34ad   : > { %s4342_s23 = sshll.u32 %s6705_s30, 4  ;;  %s6719_s23 = int_to_ptr.vmem [resolvable:$true] %s4342_s23 }
0x34ae   : > { %s5035_s27 = scalar_lea.vmem %s6719_s23, 256  ;;  %p5042_p0 = scmp.lt.s32.totalorder %s6719_s23, %s5040_s0 }
0x34af   : > { %p5036_p12 = scmp.ne.s32.totalorder %s6719_s23, %s5035_s27  ;;  %p5043_p2 = scmp.lt.s32.totalorder %s5041_s13, %s5035_s27 }
0x34b1   : > { %p5037_p8 = pnand %p5036_p12, %p6953_p13  ;;  %p5044_p4 = por %p5043_p2, %p5042_p0 }
0x34b3   : > { %p5038_p10 = pneg %p5037_p8 }
0x34b5   : > { %p5045_p5 = pnand %p5044_p4, %p5038_p10 }
0x351d   : > { %v3759_v35 = vpop.permute.xlu1 %3758 }
0x351e   : > { %v3761_v40 = vadd.f32 %v3759_v35, %v3725_v29 }
0x3520   : > { %4950 = vtanh.f32 %v3761_v40 }
0x3521   : > { %4952 = vpow2.f32 %v4585_v28 }
0x352a   : > { %v4951_v50 = vpop.eup %4950 }
0x352b   : > { %3765 = vrot.lane.b32.xlu1 %v4951_v50, %s6950_s29  ;;  %v4953_v61 = vpop.eup %4952 }
0x352c   : > { %v3750_v22 = vadd.f32 1.0, %v4953_v61 }
0x352e   : > { %4954 = vrcp.f32 %v3750_v22 }
0x352f   : > { %3863 = vperm.xlu1 %4753, %v6573_v26  }
0x3533   : > { %3873 = vperm.xlu1 %4753, %v6578_v42  }
0x3538   : > { %v4955_v52 = vpop.eup %4954 }
0x3539   : > { %v3763_v33 = vsub.f32 1.0, %v4955_v52  ;;  %v3769_v57 = vmul.f32 %v4955_v52, %v6368_v43 }
0x359d   : > { %v3766_v47 = vpop.permute.xlu1 %3765 }
0x359e   : > { %v3768_v24 = vmul.f32 %v3766_v47, %v3763_v33 }
0x35a0   : > { %v3770_v60 = vadd.f32 %v3769_v57, %v3768_v24 }
0x35a2   : > { %v3771_v44 = vpack.c.bf16 %v3770_v60, %v3770_v60 }
0x35a4   : > { %3773 = vrot.lane.b32.xlu0 %v3771_v44, %s6950_s29  ;;  %s6726_s29 = scalar_lea.hbm %s6830_s11, %s4602_s20 }
0x35a8   : > { %3868 = vperm.xlu0 %4752, %v6585_v46  }
0x35ac   : > { %3878 = vperm.xlu0 %4752, %v6590_v36  }
0x35ae   : > { %v3864_v43 = vpop.permute.xlu1 %3863 }
0x35af   : > { %v3881_v45 = vmul.f32 %v6424_v13, %v3864_v43 }
0x35b2   : > { %v3874_v51 = vpop.permute.xlu1 %3873 }
0x35b3   : > { %v3883_v35 = vmul.f32 %v6424_v13, %v3874_v51 }
0x3616   : > { %v3774_v10 = vpop.permute.xlu0 %3773 }
0x3617   : > { %4679 = vmatmul.mubr.msk.bf16.vlgmr.msra.gmra.mrb[20].mxu1 %vm572_vm4, %v3774_v10 }
0x3627   : > { %v3869_v3 = vpop.permute.xlu0 %3868 }
0x362b   : > { %v3879_v38 = vpop.permute.xlu0 %3878 }
0x362c   : > { %v3884_v40 = vmul.f32 %v6424_v13, %v3879_v38 }
0x36ea   : > { %v3812_v29 = vpop.f32.mrb[20].mxu1 }
0x36eb   : > { %v6595_v56 = vadd.f32 %v6411_v16, %v3812_v29  ;;  %v4680_v8 = vpop.f32.mrb[21].mxu1  ;;  %v3882_v16 = vmul.f32 %v6424_v13, %v3869_v3 }
0x36ec   : > { %v3815_v9 = vpop.f32.mrb[22].mxu1 }
0x36ed   : > { %v3831_v21 = vrot.slane %v6595_v56, %v6934_v19  ;;  %v4681_v55 = vpop.f32.mrb[23].mxu1 }
0x36ef   : > { %v3832_v0 = vcombine.high %v3831_v21, %v3831_v21  ;;  %v3839_v58 = vrot.slane %v3831_v21, %v6934_v19 }
0x36f1   : > { %v3846_v54 = vrot.slane %v3832_v0, %v6934_v19  ;;  %v3850_v25 = vrot.slane %v3839_v58, %v5404_v31 }
0x36f3   : > { %v3854_v7 = vrot.slane %v3846_v54, %v5404_v31  ;;  %v3857_v34 = vadd.f32 %v3850_v25, %v6936_v23  ;;  %v3858_v2 = vadd.f32 %v3850_v25, %v6937_v59 }
0x36f5   : > { %v3859_v50 = vadd.f32 %v6938_v49, %v3854_v7  ;;  %v3860_v19 = vadd.f32 %v6939_v11, %v3854_v7  ;;  %v3885_v15 = vadd.f32 %v3881_v45, %v3857_v34  ;;  %v3886_v27 = vadd.f32 %v3882_v16, %v3858_v2 }
0x36f7   : > { %v3887_v28 = vadd.f32 %v3883_v35, %v3859_v50  ;;  %v3888_v61 = vadd.f32 %v3884_v40, %v3860_v19  ;;  %4956 = vtanh.f32 %v3885_v15 }
0x36f8   : > { %4958 = vtanh.f32 %v3886_v27 }
0x36f9   : > { %4960 = vtanh.f32 %v3887_v28 }
0x36fa   : > { %4962 = vtanh.f32 %v3888_v61 }
0x3701   : > { %v4957_v22 = vpop.eup %4956 }
0x3702   : > { %v4959_v23 = vpop.eup %4958  ;;  %v3893_v59 = vmul.f32 %v6438_v17, %v4957_v22 }
0x3703   : > { %v4961_v52 = vpop.eup %4960  ;;  %v3894_v33 = vmul.f32 %v6438_v17, %v4959_v23 }
0x3704   : > { %v4963_v13 = vpop.eup %4962  ;;  %v3897_v49 = vsel %vm938_vm7, %v3893_v59, 0.0  ;;  %v3895_v47 = vmul.f32 %v6438_v17, %v4961_v52  ;;  %v4588_v59 = vld [vmem:[%s5601_s19 + $0x5] ss:$0 sm:$0xff]  ;;  %v4589_v52 = vld [vmem:[%s5601_s19 + $0xd] ss:$0 sm:$0xff]  ;;  %s5150_s19 = smov 112  }
0x3705   : > { %3898 = vadd.xlane.f32.xlu1 %v3897_v49  ;;  %v3900_v11 = vsel %vm938_vm7, %v3894_v33, 0.0  ;;  %v3896_v24 = vmul.f32 %v6438_v17, %v4963_v13 }
0x3706   : > { %3901 = vadd.xlane.f32.xlu0 %v3900_v11  ;;  %v3903_v60 = vsel %vm938_vm7, %v3895_v47, 0.0 }
0x3707   : > { %v3906_v57 = vsel %vm938_vm7, %v3896_v24, 0.0 }
0x3709   : > { %3907 = vadd.xlane.f32.xlu1 %v3906_v57 }
0x370a   : > { %3904 = vadd.xlane.f32.xlu0 %v3903_v60 }
0x3792   : > { %v3899_v44 = vpop.xlane.xlu1 %3898 }
0x3793   : > { %v3909_v10 = vadd.f32 %v3899_v44, %v6941_v20  ;;  %v3902_v43 = vpop.xlane.xlu0 %3901 }
0x3794   : > { %v3910_v29 = vadd.f32 %v3902_v43, %v6942_v37 }
0x3795   : > { %3918 = vperm.xlu0 %4752, %v3909_v10  }
0x3796   : > { %3921 = vperm.xlu1 %4753, %v3910_v29   ;;  %v3908_v3 = vpop.xlane.xlu1 %3907 }
0x3797   : > { %v3912_v8 = vadd.f32 %v3908_v3, %v6946_v12  ;;  %v3905_v9 = vpop.xlane.xlu0 %3904 }
0x3798   : > { %v3911_v17 = vadd.f32 %v3905_v9, %v6947_v14 }
0x3799   : > { %3927 = vperm.xlu0 %4752, %v3912_v8  }
0x379a   : > { %3924 = vperm.xlu1 %4753, %v3911_v17  }
0x3814   : > { %v3919_v21 = vpop.permute.xlu0 %3918 }
0x3815   : > { %v3922_v55 = vpop.permute.xlu1 %3921  ;;  %v3932_v58 = vrot.slane %v3919_v21, %v5569_v62 }
0x3816   : > { %v3936_v0 = vrot.slane %v3922_v55, %v5572_v1 }
0x3818   : > { %v3928_v20 = vpop.permute.xlu0 %3927  ;;  %v3937_v54 = vsel %vm1008_vm9, %v3936_v0, %v3932_v58 }
0x3819   : > { %v3925_v51 = vpop.permute.xlu1 %3924  ;;  %v3945_v37 = vrot.slane %v3928_v20, %v5572_v1 }
0x381a   : > { %v3941_v38 = vrot.slane %v3925_v51, %v5569_v62 }
0x381c   : > { %v3946_v12 = vsel %vm1008_vm9, %v3945_v37, %v3941_v38 }
0x381d   : > { %v3947_v14 = vsel %vm1019_vm10, %v3946_v12, %v3937_v54 }
0x381e   : > { %v3949_v25 = vsel %vm1022_vm11, %v3947_v14, -inf }
0x381f   : > { %3950 = vmax.xlane.f32.xlu1 %v3949_v25 }
0x3830   : > { %4067 = vbcast.lane.b32.xlu1 %v4588_v59, 256 }
0x3834   : > { %4078 = vbcast.lane.b32.xlu1 %v4589_v52, 256 }
0x3838   : > { %4082 = vbcast.lane.b32.xlu1 %v4589_v52, 264 }
0x38ac   : > { %v3951_v45 = vpop.xlane.xlu1 %3950 }
0x38ad   : > { %v3956_v16 = vrot.slane %v3951_v45, %v5404_v31  ;;  %v3960_v7 = vrot.slane %v3951_v45, %v5407_v32 }
0x38af   : > { %v3963_v34 = vsub.f32 %v3909_v10, %v3956_v16  ;;  %v6633_v2 = vsub.f32 %v3910_v29, %v3956_v16  ;;  %v6635_v40 = vsub.f32 %v3911_v17, %v3960_v7  ;;  %v3966_v19 = vsub.f32 %v3912_v8, %v3960_v7 }
0x38b0   : > { %v4068_v8 = vpop.permute.xlu1 %4067 }
0x38b1   : > { %v3967_v35 = vmul.f32 1.442695, %v3963_v34  ;;  %v3969_v50 = vmul.f32 1.442695, %v6633_v2  ;;  %v3971_v15 = vmul.f32 1.442695, %v6635_v40 }
0x38b2   : > { %v3973_v27 = vmul.f32 1.442695, %v3966_v19 }
0x38b3   : > { %4964 = vpow2.f32 %v3967_v35 }
0x38b4   : > { %4966 = vpow2.f32 %v3969_v50  ;;  %v4079_v9 = vpop.permute.xlu1 %4078 }
0x38b5   : > { %4968 = vpow2.f32 %v3971_v15 }
0x38b6   : > { %4970 = vpow2.f32 %v3973_v27 }
0x38b8   : > { %v4083_v38 = vpop.permute.xlu1 %4082 }
0x38bd   : > { %v4965_v28 = vpop.eup %4964 }
0x38be   : > { %3980 = vperm.xlu0 %4752, %v4965_v28   ;;  %v4967_v61 = vpop.eup %4966 }
0x38bf   : > { %v4969_v22 = vpop.eup %4968 }
0x38c0   : > { %v4971_v23 = vpop.eup %4970 }
0x38c2   : > { %3983 = vperm.xlu0 %4752, %v4967_v61  }
0x38c6   : > { %3986 = vperm.xlu0 %4752, %v4969_v22  }
0x38ca   : > { %3989 = vperm.xlu0 %4752, %v4971_v23  }
0x393d   : > { %v3981_v33 = vpop.permute.xlu0 %3980 }
0x393e   : > { %v3994_v24 = vrot.slane %v3981_v33, %v5569_v62 }
0x3941   : > { %v3984_v13 = vpop.permute.xlu0 %3983 }
0x3942   : > { %v3998_v11 = vrot.slane %v3984_v13, %v5572_v1 }
0x3944   : > { %v3999_v44 = vsel %vm1008_vm9, %v3998_v11, %v3994_v24 }
0x3945   : > { %v3987_v49 = vpop.permute.xlu0 %3986 }
0x3946   : > { %v4003_v57 = vrot.slane %v3987_v49, %v5569_v62 }
0x3949   : > { %v3990_v47 = vpop.permute.xlu0 %3989 }
0x394a   : > { %v4007_v60 = vrot.slane %v3990_v47, %v5572_v1 }
0x394c   : > { %v4008_v10 = vsel %vm1008_vm9, %v4007_v60, %v4003_v57 }
0x394d   : > { %v4009_v43 = vsel %vm1019_vm10, %v4008_v10, %v3999_v44 }
0x394e   : > { %v4011_v29 = vsel %vm1022_vm11, %v4009_v43, 0.0 }
0x394f   : > { %4012 = vadd.xlane.f32.xlu0 %v4011_v29 }
0x3965   : > { %4071 = vbcast.lane.b32.xlu0 %v4588_v59, 264 }
0x39dc   : > { %v4013_v3 = vpop.xlane.xlu0 %4012 }
0x39dd   : > { %4972 = vrcp.f32 %v4013_v3 }
0x39de   : > { %4974 = vlog2.f32 %v4013_v3 }
0x39e0   : > { %v4072_v59 = vpop.permute.xlu0 %4071 }
0x39e7   : > { %v4973_v17 = vpop.eup %4972 }
0x39e8   : > { %v4975_v21 = vpop.eup %4974  ;;  %v4015_v55 = vmul.f32 %v4973_v17, %v4013_v3 }
0x39e9   : > { %v4042_v0 = vmul.f32 0.6931472, %v4975_v21 }
0x39ea   : > { %v4016_v58 = vsub.f32 2.0, %v4015_v55 }
0x39eb   : > { %v4047_v20 = vrot.slane %v4042_v0, %v5404_v31  ;;  %v4051_v51 = vrot.slane %v4042_v0, %v5407_v32 }
0x39ec   : > { %v4017_v37 = vmul.f32 %v4973_v17, %v4016_v58 }
0x39ed   : > { %v4054_v54 = vsub.f32 %v3963_v34, %v4047_v20  ;;  %v4057_v12 = vsub.f32 %v3966_v19, %v4051_v51  ;;  %v4055_v16 = vsub.f32 %v6633_v2, %v4047_v20  ;;  %v4056_v13 = vsub.f32 %v6635_v40, %v4051_v51 }
0x39ee   : > { %v4022_v14 = vrot.slane %v4017_v37, %v5404_v31  ;;  %v4026_v25 = vrot.slane %v4017_v37, %v5407_v32 }
0x39ef   : > { %v4088_v45 = vadd.f32 %v4068_v8, %v4054_v54  ;;  %v4091_v7 = vadd.f32 %v4083_v38, %v4057_v12  ;;  %v4089_v49 = vadd.f32 %v4072_v59, %v4055_v16  ;;  %v6951_v59 = vld [vmem:[#allocation25_spill] sm:$0xff] }
0x39f0   : > { %v4029_v35 = vmul.f32 %v4965_v28, %v4022_v14  ;;  %v4030_v50 = vmul.f32 %v4967_v61, %v4022_v14  ;;  %v4031_v15 = vmul.f32 %v4969_v22, %v4026_v25  ;;  %v4032_v27 = vmul.f32 %v4971_v23, %v4026_v25 }
0x39f1   : > { %4097 = vperm.xlu1 %4753, %v4088_v45   ;;  %4106 = vperm.xlu0 %4752, %v4091_v7   ;;  %v4090_v23 = vadd.f32 %v4079_v9, %v4056_v13 }
0x39f2   : > { %v4033_v52 = vmin.f32 %v4029_v35, %v6573_v26  ;;  %v4034_v34 = vmin.f32 %v4030_v50, %v6585_v46  ;;  %v4035_v19 = vmin.f32 %v4031_v15, %v6578_v42  ;;  %v4036_v33 = vmin.f32 %v4032_v27, %v6590_v36 }
0x39f4   : > { %v4037_v2 = vadd.f32 %v4033_v52, %v6501_v39  ;;  %v4038_v28 = vadd.f32 %v4034_v34, %v6504_v30  ;;  %v4039_v61 = vadd.f32 %v4035_v19, %v6507_v6  ;;  %v4040_v22 = vadd.f32 %v4036_v33, %v6510_v5 }
0x39f5   : > { %4100 = vperm.xlu1 %4753, %v4089_v49   ;;  %v4591_v52 = vsel %vm4199_vm5, 1.0, %v6911_v41 }
0x39f9   : > { %4103 = vperm.xlu1 %4753, %v4090_v23  }
0x3a70   : > { %v4098_v26 = vpop.permute.xlu1 %4097  ;;  %v4107_v11 = vpop.permute.xlu0 %4106 }
0x3a71   : > { %v4124_v40 = vrot.slane %v4107_v11, %v5572_v1  ;;  %v4111_v47 = vrot.slane %v4098_v26, %v5569_v62 }
0x3a74   : > { %v4101_v46 = vpop.permute.xlu1 %4100 }
0x3a75   : > { %v4115_v42 = vrot.slane %v4101_v46, %v5572_v1 }
0x3a77   : > { %v4116_v30 = vsel %vm1008_vm9, %v4115_v42, %v4111_v47 }
0x3a78   : > { %v4104_v36 = vpop.permute.xlu1 %4103 }
0x3a79   : > { %v4120_v39 = vrot.slane %v4104_v36, %v5569_v62 }
0x3a7b   : > { %v4125_v6 = vsel %vm1008_vm9, %v4124_v40, %v4120_v39 }
0x3a7c   : > { %v4126_v5 = vsel %vm1019_vm10, %v4125_v6, %v4116_v30 }
0x3a7d   : > { %v4128_v24 = vsel %vm1022_vm11, %v4126_v5, -inf }
0x3a7e   : > { %4129 = vmax.xlane.f32.xlu1 %v4128_v24 }
0x3b0b   : > { %v4130_v57 = vpop.xlane.xlu1 %4129 }
0x3b0c   : > { %v4135_v60 = vrot.slane %v4130_v57, %v5404_v31  ;;  %v4139_v10 = vrot.slane %v4130_v57, %v5407_v32 }
0x3b0e   : > { %vm4142_vm2 = vcmp.eq.f32.partialorder %v4088_v45, %v4135_v60  ;;  %vm4143_vm3 = vcmp.eq.f32.partialorder %v4089_v49, %v4135_v60  ;;  %vm4144_vm4 = vcmp.eq.f32.partialorder %v4090_v23, %v4139_v10  ;;  %vm4145_vm7 = vcmp.eq.f32.partialorder %v4091_v7, %v4139_v10 }
0x3b0f   : > { %v4146_v44 = vsel %vm4142_vm2, %v5628_v4, 16  ;;  %v4147_v43 = vsel %vm4143_vm3, %v5633_v18, 16  ;;  %v4148_v29 = vsel %vm4144_vm4, %v5628_v4, 16  ;;  %v4149_v3 = vsel %vm4145_vm7, %v5633_v18, 16 }
0x3b10   : > { %4151 = vperm.xlu0 %4752, %v4146_v44  }
0x3b14   : > { %4154 = vperm.xlu0 %4752, %v4147_v43  }
0x3b18   : > { %4157 = vperm.xlu0 %4752, %v4148_v29  }
0x3b1c   : > { %4160 = vperm.xlu0 %4752, %v4149_v3  }
0x3b20   : > { %4260 = vperm.xlu0 %4752, %v4037_v2  }
0x3b24   : > { %4263 = vperm.xlu0 %4752, %v4038_v28  }
0x3b28   : > { %4266 = vperm.xlu0 %4752, %v4039_v61  }
0x3b2c   : > { %4269 = vperm.xlu0 %4752, %v4040_v22  }
0x3b8f   : > { %v4152_v31 = vpop.permute.xlu0 %4151 }
0x3b90   : > { %v4165_v21 = vrot.slane %v4152_v31, %v5569_v62 }
0x3b93   : > { %v4155_v8 = vpop.permute.xlu0 %4154 }
0x3b94   : > { %v4169_v9 = vrot.slane %v4155_v8, %v5572_v1 }
0x3b96   : > { %v4170_v0 = vsel %vm1008_vm9, %v4169_v9, %v4165_v21 }
0x3b97   : > { %v4158_v32 = vpop.permute.xlu0 %4157 }
0x3b98   : > { %v4174_v55 = vrot.slane %v4158_v32, %v5569_v62 }
0x3b9b   : > { %v4161_v17 = vpop.permute.xlu0 %4160 }
0x3b9c   : > { %v4178_v4 = vrot.slane %v4161_v17, %v5572_v1 }
0x3b9e   : > { %v4179_v18 = vsel %vm1008_vm9, %v4178_v4, %v4174_v55 }
0x3b9f   : > { %v4261_v58 = vpop.permute.xlu0 %4260  ;;  %v4180_v20 = vsel %vm1019_vm10, %v4179_v18, %v4170_v0 }
0x3ba0   : > { %v4181_v51 = vsel %vm1022_vm11, %v4180_v20, 2147483647  ;;  %v4274_v45 = vrot.slane %v4261_v58, %v5569_v62 }
0x3ba1   : > { %v4183_v37 = vshra.s32 %v4181_v51, 16 }
0x3ba3   : > { %v4264_v38 = vpop.permute.xlu0 %4263  ;;  %v4185_v54 = vcvt.s32.f32 %v4183_v37 }
0x3ba4   : > { %v4278_v14 = vrot.slane %v4264_v38, %v5572_v1 }
0x3ba5   : > { %4186 = vmin.xlane.f32.xlu0 %v4185_v54 }
0x3ba6   : > { %v4279_v35 = vsel %vm1008_vm9, %v4278_v14, %v4274_v45 }
0x3ba7   : > { %v4267_v12 = vpop.permute.xlu0 %4266 }
0x3ba8   : > { %v4283_v16 = vrot.slane %v4267_v12, %v5569_v62  ;;  %v4587_v62 = vmul.f32 -1.442695, %v6595_v56 }
0x3baa   : > { %4976 = vpow2.f32 %v4587_v62 }
0x3bab   : > { %v4270_v25 = vpop.permute.xlu0 %4269 }
0x3bac   : > { %v4287_v7 = vrot.slane %v4270_v25, %v5572_v1  ;;  %v4182_v1 = vand.u32 65535, %v4181_v51 }
0x3bae   : > { %v4288_v50 = vsel %vm1008_vm9, %v4287_v7, %v4283_v16  ;;  %v4184_v33 = vcvt.s32.f32 %v4182_v1 }
0x3baf   : > { %v4289_v15 = vsel %vm1019_vm10, %v4288_v50, %v4279_v35  ;;  %vm4250_vm10 = vcmask 39936  }
0x3bb0   : > { %v4291_v27 = vsel %vm1022_vm11, %v4289_v15, 0.0  ;;  %vm4302_vm11 = vcmask 0  }
0x3bb1   : > { %4292 = vadd.xlane.f32.xlu1 %v4291_v27 }
0x3bb4   : > { %v4977_v34 = vpop.eup %4976 }
0x3bb5   : > { %v3821_v13 = vadd.f32 1.0, %v4977_v34 }
0x3bb7   : > { %4978 = vrcp.f32 %v3821_v13 }
0x3bbb   : > { %4244 = vrot.lane.b32.xlu0 %v6951_v59, %s5150_s19 }
0x3bc1   : > { %v4979_v23 = vpop.eup %4978 }
0x3bc2   : > { %4203 = vrot.lane.b32.xlu1 %v4591_v52, %s6948_s17 }
0x3c32   : > { %v6699_v19 = vpop.xlane.xlu0 %4186 }
0x3c33   : > { %vm4188_vm9 = vcmp.eq.f32.partialorder %v4185_v54, %v6699_v19 }
0x3c34   : > { %v4189_v49 = vsel %vm4188_vm9, %v4184_v33, inf }
0x3c35   : > { %4190 = vmin.xlane.f32.xlu1 %v4189_v49 }
0x3c36   : > { %v4245_v2 = vpop.permute.xlu0 %4244 }
0x3c37   : > { %v4251_v28 = vsel %vm4250_vm10, %v4245_v2, 0.0 }
0x3c38   : > { %4253 = vst [vmem:[%s6705_s30] sm:$0xff] %v4251_v28 }
0x3c3e   : > { %v4293_v56 = vpop.xlane.xlu1 %4292 }
0x3c3f   : > { %v4294_v61 = vrot.slane %v4293_v56, 4 }
0x3c41   : > { %v4295_v22 = vadd.f32 %v4294_v61, %v4293_v56 }
0x3c42   : > { %v4204_v26 = vpop.permute.xlu1 %4203 }
0x3c43   : > { %v4296_v46 = vrot.slane %v4295_v22, 2  ;;  %v4206_v11 = vmul.f32 %v4979_v23, %v4204_v26 }
0x3c45   : > { %v4235_v42 = vrot.slane %v4206_v11, 6  ;;  %v4297_v36 = vadd.f32 %v4296_v46, %v4295_v22 }
0x3c47   : > { %v4240_v40 = vsel %vm715_vm0, %v6548_v63, %v4235_v42  ;;  %v4298_v47 = vrot.slane %v4297_v36, 1 }
0x3c48   : > { %v4241_v39 = vsel %vm4220_vm8, %v4240_v40, 0.0 }
0x3c49   : > { %4246 = vrot.lane.b32.xlu0 %v4241_v39, %s5150_s19  ;;  %v4299_v30 = vadd.f32 %v4298_v47, %v4297_v36  ;;  %s4310_s19 = scalar_lea.sflag [#allocation7], %s5324_s26 }
0x3c4b   : > { %4682 = vpush %v4299_v30 }
0x3c7c   : > { %s4683_s2 = spop %4682 }
0x3c7d   : > { %v4301_v63 = vstv %s4683_s2 }
0x3c7e   : > { %4303 = vst.msk [vmem:[%s517_s1] sm:$0x1] %vm4302_vm11, %v4301_v63 }
0x3cbb   : > { %v4247_v6 = vpop.permute.xlu0 %4246 }
0x3cbc   : > { %v4252_v5 = vsel %vm4250_vm10, %v4247_v6, 0.0 }
0x3cbd   : > { %4254 = vst [vmem:[%s6705_s30 + $0x8] sm:$0xff] %v4252_v5 }
0x3cbe   : > { %5048 = shalt.err (!%p5045_p5)
}
0x3cbf   : > { %s5049_s30 = scalar_lea.hbm %s6726_s29, 256  ;;  %s5053_s17 = scalar_lea.hbm %s6830_s11, 512 }
0x3cc0   : > { %p5050_p7 = scmp.ne.s32.totalorder %s6726_s29, %s5049_s30  ;;  %p5054_p3 = scmp.lt.u32.totalorder %s6726_s29, %s6830_s11 }
0x3cc1   : > { %p5055_p6 = scmp.lt.u32.totalorder %s5053_s17, %s5049_s30  ;;  %p5057_p12 = scmp.lt.u32.totalorder %s5049_s30, %s6726_s29 }
0x3cc2   : > { %p5051_p9 = pnand %p5050_p7, %p6953_p13 }
0x3cc3   : > { %p5056_p11 = por %p5055_p6, %p5054_p3 }
0x3cc4   : > { %p5052_p1 = pneg %p5051_p9 }
0x3cc5   : > { %p5058_p8 = por %p5057_p12, %p5056_p11 }
0x3cc7   : > { %p5059_p10 = pnand %p5058_p8, %p5052_p1 }
0x3cc9   : > { %5062 = shalt.err (!%p5059_p10)
}
0x3cca   : > { %s5152_s27 = smov 128   ;;  %s5153_s0 = smov 8   ;;  %v4193_v24 = vcvt.f32.s32 %v6699_v19  ;;  %v4191_v57 = vpop.xlane.xlu1 %4190 }
0x3ccb   : > { %4687 = dma.vmem_to_hbm [thread:$0]  (%p6953_p13), %s6719_s23, 256, %s6726_s29, %s4310_s19, %s5152_s27, %s5152_s27, %s5153_s0   ;;  %v4192_v44 = vcvt.f32.s32 %v4191_v57 }
0x3ccc   : > { %v4194_v60 = vshll.u32 %v4193_v24, 16  ;;  %s4326_s13 = sshll.u32 %s6322_s18, 4  ;;  %s6770_s19 = scalar_lea.hbm %s6829_s10, %s4602_s20  ;;  %s6761_s13 = int_to_ptr.vmem [resolvable:$true] %s4326_s13 }
0x3ccd   : > { %s4305_s30 = scalar_lea.sflag [#allocation4], %s5324_s26  ;;  %s5063_s1 = scalar_lea.vmem %s6761_s13, 256 }
0x3cce   : > { %v4195_v10 = vadd.s32 %v4194_v60, %v4192_v44  ;;  %p5064_p0 = scmp.ne.s32.totalorder %s6761_s13, %s5063_s1  ;;  %s5154_s2 = smov [#allocation5]  }
0x3ccf   : > { %s5067_s17 = sshll.u32 %s5154_s2, 4  ;;  %s5068_s17 = int_to_ptr.vmem [resolvable:$false] %s5067_s17 }
0x3cd0   : > { %vm4196_vm14 = vcmp.eq.s32.totalorder %v5564_v53, %v4195_v10  ;;  %p5065_p2 = pnand %p5064_p0, %p6953_p13  ;;  %s5069_s14 = scalar_lea.vmem %s5068_s17, 512 }
0x3cd1   : > { %v4590_v43 = vsel %vm4196_vm14, 1.0, %v6911_v41  ;;  %p5070_p5 = scmp.lt.s32.totalorder %s6761_s13, %s5068_s17  ;;  %p5071_p7 = scmp.lt.s32.totalorder %s5069_s14, %s5063_s1 }
0x3cd2   : > { %v4217_v29 = vrot.slane %v4590_v43, 6  ;;  %p5066_p4 = pneg %p5065_p2 }
0x3cd3   : > { %p5072_p9 = por %p5071_p7, %p5070_p5 }
0x3cd4   : > { %v4224_v3 = vsel %vm715_vm0, %v6540_v48, %v4217_v29 }
0x3cd5   : > { %v4225_v31 = vsel %vm4220_vm8, %v4224_v3, 0.0  ;;  %p5073_p1 = pnand %p5072_p9, %p5066_p4 }
0x3cd6   : > { %4227 = vst [vmem:[%s6322_s18 + $0x8] sm:$0xff] %v4225_v31 }
0x3cd7   : > { %5076 = shalt.err (!%p5073_p1)
}
0x3cd8   : > { %s5077_s25 = scalar_lea.hbm %s6770_s19, 256  ;;  %s5081_s28 = scalar_lea.hbm %s6829_s10, 512 }
0x3cd9   : > { %p5078_p3 = scmp.ne.s32.totalorder %s6770_s19, %s5077_s25  ;;  %p5082_p12 = scmp.lt.u32.totalorder %s6770_s19, %s6829_s10 }
0x3cda   : > { %p5083_p8 = scmp.lt.u32.totalorder %s5081_s28, %s5077_s25  ;;  %p5085_p0 = scmp.lt.u32.totalorder %s5077_s25, %s6770_s19 }
0x3cdb   : > { %p5079_p6 = pnand %p5078_p3, %p6953_p13 }
0x3cdc   : > { %p5084_p10 = por %p5083_p8, %p5082_p12 }
0x3cdd   : > { %p5080_p11 = pneg %p5079_p6 }
0x3cde   : > { %p5086_p2 = por %p5085_p0, %p5084_p10 }
0x3ce0   : > { %p5087_p4 = pnand %p5086_p2, %p5080_p11 }
0x3ce2   : > { %5090 = shalt.err (!%p5087_p4)
}
0x3ce3   : > { %4686 = dma.vmem_to_hbm [thread:$0]  (%p6953_p13), %s6761_s13, 256, %s6770_s19, %s4305_s30, %s5152_s27, %s5152_s27, %s5153_s0  }
0x3ce4 PF: > { %s4360_s1 = sand.u32 1, %s5121_s21   ;;  %p6954_p5 = scmp.ne.s32.totalorder %s6894_s16, 0 }
0x3ce5   : > { %p6955_p7 = scmp.ge.s32.totalorder %s5133_s24, 2  ;;  %s4361_s2 = scalar_lea.sflag [#allocation4], %s4360_s1 }
0x3ce7   : > { %p4695_p9 = pnand %p6955_p7, %p6954_p5 }
0x3ce9   : > { %5112 = dma.done.wait (!%p4695_p9), %s4361_s2, 256  }
0x3cea   : > { %5114 = vsyncadd (!%p4695_p9), %s4361_s2, 4294967040  ;;  %s4370_s15 = scalar_lea.sflag [#allocation7], %s4360_s1 }
0x3ceb   : > { %5116 = dma.done.wait (!%p4695_p9), %s4370_s15, 256  }
0x3cec   : > { %5118 = vsyncadd (!%p4695_p9), %s4370_s15, 4294967040  ;;  %s6956_s24 = sld [smem:[#allocation12_spill]]  ;;  %s6957_s26 = sld [smem:[#allocation11_spill]] }
0x3ced   : > { %s6958_s23 = sld [smem:[#allocation13_spill]]  ;;  %s6959_s21 = smov %s5125_s22 }
0x3cf2   : > { %p29_p13 = scmp.ge.s32.totalorder %s6956_s24, 4   ;;  %s6960_s22 = smov %s6957_s26 }
0x3cf4   :  { %31 = sbr.rel (!%p29_p13) target bundleno = 11 (0xb), region = 143 }
0x3cfb   :  { %4381 = vsyncpa [#allocation3], 1 }
0x3cfc   :  { %4383 = vsyncpa [#allocation3 + $0x1], 1 }
0x3cfd   :  { %4384 = vsyncpa [#allocation4], 1 }
0x3cfe   :  { %4386 = vsyncpa [#allocation4 + $0x1], 1 }
0x3cff   :  { %4387 = vsyncpa [#allocation7], 1 }
0x3d00   :  { %4389 = vsyncpa [#allocation7 + $0x1], 1 }

</bundles_post_ra>
